<compile_context>
chip_gen: v7x
topology: tpu7x:2x2x1
jax: 0.10.0
libtpu: 0.0.40
codegen_flags: <defaults>
</compile_context>

<pallas_src>
import functools
import math

import jax
import jax.numpy as jnp
from jax.experimental import pallas as pl
from jax.experimental.pallas import tpu as pltpu


# ------------------------------- kernel --------------------------------------

def _ae_kernel(q0_ref, x_ref,
               wx_ref, bx_ref, wo0_ref, bo0_ref,
               wh_ref, bh_ref, wo1_ref, bo1_ref,
               mask0_ref, ones0_ref, mask1_ref, ones1_ref,
               o_ref, *, num_heads, n_tokens, dim_in, io_mode):
    """Fused AE forward for one batch tile.

    q0_ref   : (num_inds, dim_v)        fc_q0(I), precomputed in the wrapper
    x_ref    : (TB, N*dim_in) ["dense"] or (TB, N, dim_in) ["safe"]
    wx_ref   : (dim_in, 3*dim_v)        [Wk0 | Wv0 | Wq1] fused
    wh_ref   : (dim_v, 2*dim_v)         [Wk1 | Wv1] fused
    mask*_ref: (H*rk, dim_v)            row h*rk+k keeps only head-h features
    ones*_ref: (H*rk, H*rk)             block-diagonal ones (per-head denom)
    o_ref    : (TB, N*dim_v)            lane-dense packed output slab
    """
    tb = x_ref.shape[0]
    num_inds, dim_v = q0_ref.shape
    n = n_tokens
    scale = 1.0 / math.sqrt(dim_v)
    f32 = jnp.float32
    pd = x_ref.dtype                      # MXU operand dtype (f32 or bf16)

    # (TB, N*dim_in) -> (TB*N, dim_in)  [dense], trivial merge in safe mode.
    x_flat = x_ref[...].reshape(tb * n, dim_in)

    def mha(q3, k2, v2, rk, mask_ref, ones_ref):
        """Multi-head attention without any per-head lane slicing.

        q3: (tb, rq, dim_v) f32,  k2/v2: (tb*rk, dim_v) f32.
        """
        rq = q3.shape[1]
        hk = num_heads * rk
        k3 = k2.reshape(tb, rk, dim_v)
        v3 = v2.reshape(tb, rk, dim_v)
        mask = mask_ref[...]
        # Tile K/V H times along rows and zero out non-head features; head h's
        # keys/values live in rows [h*rk, (h+1)*rk).  Pure sublane concat + VPU.
        kstack = (jnp.concatenate([k3] * num_heads, axis=1) * mask).astype(pd)
        vstack = (jnp.concatenate([v3] * num_heads, axis=1) * mask).astype(pd)
        # Per-head scores stacked along the key axis: one batched matmul.
        s = jnp.einsum('bqd,bkd->bqk', q3.astype(pd), kstack,
                       preferred_element_type=f32) * scale
        # A single per-row max is a valid stability shift for every head block
        # (softmax is shift-invariant per block); keeps the reduce lane-dense.
        e = jnp.exp(s - jnp.max(s, axis=-1, keepdims=True))
        # Per-head denominators broadcast back to every column via a
        # block-diagonal ones matmul (MXU slot, no 4-D reshapes).
        denom = jnp.dot(e.reshape(tb * rq, hk), ones_ref[...],
                        preferred_element_type=f32).reshape(tb, rq, hk)
        p = e * pl.reciprocal(denom, approx=True)
        o = q3 + jnp.einsum('bqk,bkd->bqd', p.astype(pd), vstack,
                            preferred_element_type=f32)
        return o.reshape(tb * rq, dim_v)

    def rff(o_flat, w_ref, b_ref):
        # O + relu(fc_o(O))
        return o_flat + jnp.maximum(
            jnp.dot(o_flat.astype(pd), w_ref[...], preferred_element_type=f32)
            + b_ref[...].astype(f32), 0.0)

    # Fused projections of X: [fc_k0 | fc_v0 | fc_q1] in one matmul.
    xproj = (jnp.dot(x_flat, wx_ref[...], preferred_element_type=f32)
             + bx_ref[...].astype(f32))                      # (TB*N, 3*dim_v)
    k0 = xproj[:, :dim_v]
    v0 = xproj[:, dim_v:2 * dim_v]
    q1 = xproj[:, 2 * dim_v:]

    # ------------------------- MAB0: H = MAB(I, X) ---------------------------
    q0b = jnp.broadcast_to(q0_ref[...].astype(f32)[None],
                           (tb, num_inds, dim_v))
    o0 = mha(q0b, k0, v0, n, mask0_ref, ones0_ref)           # (TB*S, dim_v)
    h_flat = rff(o0, wo0_ref, bo0_ref)

    # Fused projections of H: [fc_k1 | fc_v1] in one matmul.
    hproj = (jnp.dot(h_flat.astype(pd), wh_ref[...], preferred_element_type=f32)
             + bh_ref[...].astype(f32))                      # (TB*S, 2*dim_v)
    k1 = hproj[:, :dim_v]
    v1 = hproj[:, dim_v:]

    # ------------------------ MAB1: out = MAB(X, H) --------------------------
    o1 = mha(q1.reshape(tb, n, dim_v), k1, v1, num_inds, mask1_ref, ones1_ref)
    out_flat = rff(o1, wo1_ref, bo1_ref)                     # (TB*N, dim_v)

    if io_mode == "dense":
        # Lane-dense packing via a plain reshape (review item 2).
        o_ref[...] = out_flat.reshape(tb, n * dim_v).astype(o_ref.dtype)
    else:
        # Proven fallback: lane-axis concat packing.
        out3 = out_flat.reshape(tb, n, dim_v)
        o_ref[...] = jnp.concatenate([out3[:, j, :] for j in range(n)],
                                     axis=-1).astype(o_ref.dtype)


# ------------------------------- wrapper --------------------------------------

_IO_MODE_CACHE = []   # remembers which I/O lowering variant compiled


def _tensorcores_per_chip():
    """Best-effort TensorCores-per-device guess: v5e/v6e -> 1, otherwise 2."""
    try:
        kind = jax.devices()[0].device_kind.lower()
    except Exception:
        return 1
    single_core = ("v5e", "v5 lite", "v5lite", "v6e", "v6 lite", "v6lite")
    if any(tag in kind for tag in single_core):
        return 1
    return 2


def ae_forward(X, I, p0, p1, *, num_heads, compute_dtype=None, block_b=None):
    """AE forward. X: (B, N, dim_in), I: (num_inds, dim_out) -> (B, N, dim_out)."""
    B, N, dim_in = X.shape
    num_inds, dim_v = I.shape
    assert dim_v % num_heads == 0
    ds = dim_v // num_heads
    f32 = jnp.float32
    pd = jnp.dtype(compute_dtype) if compute_dtype is not None else X.dtype

    wq0, bq0, wk0, bk0, wv0, bv0, wo0, bo0 = p0
    wq1, bq1, wk1, bk1, wv1, bv1, wo1, bo1 = p1

    # fc_q0(I) is batch-invariant -> hoisted out of the kernel.
    q0 = (jnp.dot(I, wq0) + bq0).astype(pd)                  # (num_inds, dim_v)

    # Fused shared-input projection weights (biases stay f32 for the adds).
    wx = jnp.concatenate([wk0, wv0, wq1], axis=1).astype(pd)   # (dim_in, 3dv)
    bx = jnp.concatenate([bk0, bv0, bq1], axis=1).astype(f32)
    wh = jnp.concatenate([wk1, wv1], axis=1).astype(pd)        # (dim_v, 2dv)
    bh = jnp.concatenate([bk1, bv1], axis=1).astype(f32)
    wo0p, bo0p = wo0.astype(pd), bo0.astype(f32)
    wo1p, bo1p = wo1.astype(pd), bo1.astype(f32)

    # Head mask (H*rk, dim_v) and block-diagonal ones (H*rk, H*rk) constants.
    def head_mask(rk):
        h_idx = jnp.repeat(jnp.arange(num_heads), rk)[:, None]
        f_head = (jnp.arange(dim_v) // ds)[None, :]
        return (h_idx == f_head).astype(f32)

    def block_ones(rk):
        blk = jnp.arange(num_heads * rk) // rk
        return (blk[:, None] == blk[None, :]).astype(f32)

    mask0, ones0 = head_mask(N), block_ones(N)
    mask1, ones1 = head_mask(num_inds), block_ones(num_inds)

    Xp = X.astype(pd)

    # Batch tile: one grid step per TensorCore (grid=1 on single-TC chips).
    if block_b is None:
        ncores = _tensorcores_per_chip()
        tb = B
        if ncores > 1 and B % ncores == 0:
            cand = B // ncores
            if cand % 8 == 0:           # keep 2-D block shapes (8,128)-legal
                tb = cand
    else:
        tb = max(1, min(block_b, B))
        while B % tb:
            tb -= 1
        if tb != B and tb % 8 != 0:
            tb = B
    grid = (B // tb,)

    def full_spec(a):
        nd = a.ndim
        return pl.BlockSpec(a.shape, lambda b: (0,) * nd)

    common_ops = (wx, bx, wo0p, bo0p, wh, bh, wo1p, bo1p,
                  mask0, ones0, mask1, ones1)
    common_specs = [full_spec(a) for a in common_ops]
    out_spec = pl.BlockSpec((tb, N * dim_v), lambda b: (b, 0))
    out_shape = jax.ShapeDtypeStruct((B, N * dim_v), X.dtype)

    def run(io_mode):
        if io_mode == "dense":
            x_op = Xp.reshape(B, N * dim_in)        # lane-dense X slab (free)
            x_spec = pl.BlockSpec((tb, N * dim_in), lambda b: (b, 0))
        else:
            x_op = Xp
            x_spec = pl.BlockSpec((tb, N, dim_in), lambda b: (b, 0, 0))
        kernel = functools.partial(_ae_kernel, num_heads=num_heads,
                                   n_tokens=N, dim_in=dim_in, io_mode=io_mode)
        return pl.pallas_call(
            kernel,
            out_shape=out_shape,
            grid_spec=pltpu.PrefetchScalarGridSpec(
                num_scalar_prefetch=0,
                grid=grid,
                in_specs=[full_spec(q0), x_spec] + common_specs,
                out_specs=out_spec,
            ),
            compiler_params=pltpu.CompilerParams(
                dimension_semantics=("parallel",)),
        )(q0, x_op, *common_ops)

    modes = list(_IO_MODE_CACHE) + [m for m in ("dense", "safe")
                                    if m not in _IO_MODE_CACHE]
    last_err = None
    for mode in modes:
        try:
            out_flat = run(mode)
            if mode not in _IO_MODE_CACHE:
                _IO_MODE_CACHE.append(mode)
            return out_flat.reshape(B, N, dim_v)
        except Exception as err:    # mixed-minor reshape not lowered -> fallback
            last_err = err
    raise last_err


# ----------------------------- pure-JAX reference ----------------------------

def _mab_reference(Q_in, K_in, params, num_heads):
    """Literal replica of the PyTorch MAB.forward (ln=False)."""
    wq, bq, wk, bk, wv, bv, wo, bo = params
    dim_v = wq.shape[1]
    Q = Q_in @ wq + bq
    K = K_in @ wk + bk
    V = K_in @ wv + bv
    Q_ = jnp.concatenate(jnp.split(Q, num_heads, axis=2), axis=0)
    K_ = jnp.concatenate(jnp.split(K, num_heads, axis=2), axis=0)
    V_ = jnp.concatenate(jnp.split(V, num_heads, axis=2), axis=0)
    A = jax.nn.softmax(
        jnp.einsum('bqd,bkd->bqk', Q_, K_) / math.sqrt(dim_v), axis=2)
    O = jnp.concatenate(
        jnp.split(Q_ + jnp.einsum('bqk,bkd->bqd', A, V_), num_heads, axis=0),
        axis=2)
    return O + jax.nn.relu(O @ wo + bo)


def ae_reference(X, I, p0, p1, *, num_heads):
    B = X.shape[0]
    I_rep = jnp.broadcast_to(I[None], (B,) + I.shape)
    H = _mab_reference(I_rep, X, p0, num_heads)
    return _mab_reference(X, H, p1, num_heads)


def init_mab_params(key, dim_q, dim_k, dim_v):
    """nn.Linear-style init; weights stored as (in, out), i.e. PyTorch W^T."""
    keys = jax.random.split(key, 8)

    def lin(kw, kb, fan_in, fan_out):
        bound = 1.0 / math.sqrt(fan_in)
        w = jax.random.uniform(kw, (fan_in, fan_out), jnp.float32, -bound, bound)
        b = jax.random.uniform(kb, (1, fan_out), jnp.float32, -bound, bound)
        return w, b

    wq, bq = lin(keys[0], keys[1], dim_q, dim_v)   # fc_q: Linear(dim_Q, dim_V)
    wk, bk = lin(keys[2], keys[3], dim_k, dim_v)   # fc_k: Linear(dim_K, dim_V)
    wv, bv = lin(keys[4], keys[5], dim_k, dim_v)   # fc_v: Linear(dim_K, dim_V)
    wo, bo = lin(keys[6], keys[7], dim_v, dim_v)   # fc_o: Linear(dim_V, dim_V)
    return (wq, bq, wk, bk, wv, bv, wo, bo)


if __name__ == "__main__":
    # AE(dim_in=16, dim_out=32, num_heads=4, num_inds=4, ln=False)
    B, N = 16, 8
    dim_in, dim_out = 16, 32
    num_heads, num_inds = 4, 4

    root = jax.random.PRNGKey(0)
    k_x, k_i, k_p0, k_p1 = jax.random.split(root, 4)

    X = jax.random.normal(k_x, (B, N, dim_in), jnp.float32)

    # Xavier-uniform init for the inducing points I (nn.init.xavier_uniform_).
    fan_in, fan_out = num_inds * dim_out, dim_out
    xav = math.sqrt(6.0 / (fan_in + fan_out))
    I = jax.random.uniform(k_i, (num_inds, dim_out), jnp.float32, -xav, xav)

    # mab0 = MAB(dim_Q=dim_out, dim_K=dim_in,  dim_V=dim_out)
    # mab1 = MAB(dim_Q=dim_in,  dim_K=dim_out, dim_V=dim_out)
    p0 = init_mab_params(k_p0, dim_out, dim_in, dim_out)
    p1 = init_mab_params(k_p1, dim_in, dim_out, dim_out)

    ref = ae_reference(X, I, p0, p1, num_heads=num_heads)

    # f32 path (exact except for the approximate EUP reciprocal in softmax).
    out = ae_forward(X, I, p0, p1, num_heads=num_heads)
    out = jax.block_until_ready(out)
    assert out.shape == (B, N, dim_out)
    err_f32 = float(jnp.max(jnp.abs(out - ref)))
    assert jnp.allclose(out, ref, atol=2e-2, rtol=2e-2), f"f32 mismatch: {err_f32}"

    # bf16 operand path (v6e/v7x fast path): bf16 only at the MXU inputs,
    # f32 accumulation / softmax / residuals inside the kernel.
    out_bf16 = ae_forward(X, I, p0, p1, num_heads=num_heads,
                          compute_dtype=jnp.bfloat16)
    out_bf16 = jax.block_until_ready(out_bf16)
    err_bf16 = float(jnp.max(jnp.abs(out_bf16 - ref)))
    assert jnp.allclose(out_bf16, ref, atol=1.5e-1, rtol=1.5e-1), \
        f"bf16 mismatch: {err_bf16}"

    print("KERNEL_OK")
</pallas_src>

<mosaic_0001>
module attributes {stable_mosaic.version = 11 : i64} {
  func.func @_ae_kernel(%arg0: i32, %arg1: memref<4x32xf32, #tpu.memory_space<vmem>>, %arg2: memref<8x128xf32, #tpu.memory_space<vmem>>, %arg3: memref<16x96xf32, #tpu.memory_space<vmem>>, %arg4: memref<1x96xf32, #tpu.memory_space<vmem>>, %arg5: memref<32x32xf32, #tpu.memory_space<vmem>>, %arg6: memref<1x32xf32, #tpu.memory_space<vmem>>, %arg7: memref<32x64xf32, #tpu.memory_space<vmem>>, %arg8: memref<1x64xf32, #tpu.memory_space<vmem>>, %arg9: memref<32x32xf32, #tpu.memory_space<vmem>>, %arg10: memref<1x32xf32, #tpu.memory_space<vmem>>, %arg11: memref<32x32xf32, #tpu.memory_space<vmem>>, %arg12: memref<32x32xf32, #tpu.memory_space<vmem>>, %arg13: memref<16x32xf32, #tpu.memory_space<vmem>>, %arg14: memref<16x16xf32, #tpu.memory_space<vmem>>, %arg15: memref<8x256xf32, #tpu.memory_space<vmem>>) attributes {dimension_semantics = [#tpu.dimension_semantics<parallel>], iteration_bounds = array<i64: 2>, scalar_prefetch = 0 : i64, scratch_operands = 0 : i64, tpu.core_type = #tpu.core_type<tc>, window_params = [{pipeline_mode = #tpu.pipeline_mode<synchronous>, transform_indices = @transform_0, window_bounds = array<i64: 4, 32>}, {transform_indices = @transform_1, window_bounds = array<i64: 8, 128>}, {pipeline_mode = #tpu.pipeline_mode<synchronous>, transform_indices = @transform_2, window_bounds = array<i64: 16, 96>}, {pipeline_mode = #tpu.pipeline_mode<synchronous>, transform_indices = @transform_3, window_bounds = array<i64: 1, 96>}, {pipeline_mode = #tpu.pipeline_mode<synchronous>, transform_indices = @transform_4, window_bounds = array<i64: 32, 32>}, {pipeline_mode = #tpu.pipeline_mode<synchronous>, transform_indices = @transform_5, window_bounds = array<i64: 1, 32>}, {pipeline_mode = #tpu.pipeline_mode<synchronous>, transform_indices = @transform_6, window_bounds = array<i64: 32, 64>}, {pipeline_mode = #tpu.pipeline_mode<synchronous>, transform_indices = @transform_7, window_bounds = array<i64: 1, 64>}, {pipeline_mode = #tpu.pipeline_mode<synchronous>, transform_indices = @transform_8, window_bounds = array<i64: 32, 32>}, {pipeline_mode = #tpu.pipeline_mode<synchronous>, transform_indices = @transform_9, window_bounds = array<i64: 1, 32>}, {pipeline_mode = #tpu.pipeline_mode<synchronous>, transform_indices = @transform_10, window_bounds = array<i64: 32, 32>}, {pipeline_mode = #tpu.pipeline_mode<synchronous>, transform_indices = @transform_11, window_bounds = array<i64: 32, 32>}, {pipeline_mode = #tpu.pipeline_mode<synchronous>, transform_indices = @transform_12, window_bounds = array<i64: 16, 32>}, {pipeline_mode = #tpu.pipeline_mode<synchronous>, transform_indices = @transform_13, window_bounds = array<i64: 16, 16>}, {transform_indices = @transform_14, window_bounds = array<i64: 8, 256>}]} {
    %c0 = arith.constant 0 : index
    %c0_0 = arith.constant 0 : index
    %0 = vector.load %arg2[%c0, %c0_0] : memref<8x128xf32, #tpu.memory_space<vmem>>, vector<8x128xf32>
    %1 = vector.shape_cast %0 : vector<8x128xf32> to vector<64x16xf32>
    %c0_1 = arith.constant 0 : index
    %c0_2 = arith.constant 0 : index
    %2 = vector.load %arg3[%c0_1, %c0_2] : memref<16x96xf32, #tpu.memory_space<vmem>>, vector<16x96xf32>
    %cst = arith.constant dense<0.000000e+00> : vector<64x96xf32>
    %3 = tpu.matmul %1, %2, %cst {dimension_numbers = #tpu.dot_dimension_numbers<[1], [0], [0], [1], [0, 0, 1, 1], [], []>} : vector<64x16xf32>, vector<16x96xf32>, vector<64x96xf32> -> vector<64x96xf32>
    %c0_3 = arith.constant 0 : index
    %c0_4 = arith.constant 0 : index
    %4 = vector.load %arg4[%c0_3, %c0_4] : memref<1x96xf32, #tpu.memory_space<vmem>>, vector<1x96xf32>
    %5 = vector.broadcast %4 : vector<1x96xf32> to vector<64x96xf32>
    %6 = arith.addf %3, %5 : vector<64x96xf32>
    %7 = vector.extract_strided_slice %6 {offsets = [0, 0], sizes = [64, 32], strides = [1, 1]} : vector<64x96xf32> to vector<64x32xf32>
    %8 = vector.extract_strided_slice %6 {offsets = [0, 32], sizes = [64, 32], strides = [1, 1]} : vector<64x96xf32> to vector<64x32xf32>
    %9 = vector.extract_strided_slice %6 {offsets = [0, 64], sizes = [64, 32], strides = [1, 1]} : vector<64x96xf32> to vector<64x32xf32>
    %c0_5 = arith.constant 0 : index
    %c0_6 = arith.constant 0 : index
    %10 = vector.load %arg1[%c0_5, %c0_6] : memref<4x32xf32, #tpu.memory_space<vmem>>, vector<4x32xf32>
    %11 = vector.shape_cast %10 : vector<4x32xf32> to vector<1x4x32xf32>
    %12 = vector.shape_cast %11 : vector<1x4x32xf32> to vector<1x4x32xf32>
    %13 = vector.broadcast %12 : vector<1x4x32xf32> to vector<8x4x32xf32>
    %14 = vector.shape_cast %7 : vector<64x32xf32> to vector<8x8x32xf32>
    %15 = vector.shape_cast %8 : vector<64x32xf32> to vector<8x8x32xf32>
    %c0_7 = arith.constant 0 : index
    %c0_8 = arith.constant 0 : index
    %16 = vector.load %arg11[%c0_7, %c0_8] : memref<32x32xf32, #tpu.memory_space<vmem>>, vector<32x32xf32>
    %17 = tpu.concatenate %14, %14, %14, %14 in 1 : vector<8x8x32xf32>, vector<8x8x32xf32>, vector<8x8x32xf32>, vector<8x8x32xf32> -> vector<8x32x32xf32>
    %18 = vector.shape_cast %16 : vector<32x32xf32> to vector<1x32x32xf32>
    %19 = vector.broadcast %18 : vector<1x32x32xf32> to vector<8x32x32xf32>
    %20 = arith.mulf %17, %19 : vector<8x32x32xf32>
    %21 = tpu.concatenate %15, %15, %15, %15 in 1 : vector<8x8x32xf32>, vector<8x8x32xf32>, vector<8x8x32xf32>, vector<8x8x32xf32> -> vector<8x32x32xf32>
    %22 = vector.shape_cast %16 : vector<32x32xf32> to vector<1x32x32xf32>
    %23 = vector.broadcast %22 : vector<1x32x32xf32> to vector<8x32x32xf32>
    %24 = arith.mulf %21, %23 : vector<8x32x32xf32>
    "tpu.trace_start"() <{level = 10 : i32, message = "bqd,bkd->bqk"}> : () -> ()
    %cst_9 = arith.constant dense<0.000000e+00> : vector<8x4x32xf32>
    %25 = tpu.matmul %13, %20, %cst_9 {dimension_numbers = #tpu.dot_dimension_numbers<[2], [2], [1], [1], [0, 0, 0, 1, 1, 1], [0], [0]>} : vector<8x4x32xf32>, vector<8x32x32xf32>, vector<8x4x32xf32> -> vector<8x4x32xf32>
    "tpu.trace_stop"() : () -> ()
    %cst_10 = arith.constant 0.176776692 : f32
    %26 = vector.broadcast %cst_10 : f32 to vector<8x4x32xf32>
    %27 = arith.mulf %25, %26 : vector<8x4x32xf32>
    %cst_11 = arith.constant dense<0xFF800000> : vector<8x4xf32>
    %28 = vector.multi_reduction <maximumf>, %27, %cst_11 [2] : vector<8x4x32xf32> to vector<8x4xf32>
    %29 = vector.shape_cast %28 : vector<8x4xf32> to vector<8x4x1xf32>
    %30 = vector.broadcast %29 : vector<8x4x1xf32> to vector<8x4x32xf32>
    %31 = arith.subf %27, %30 : vector<8x4x32xf32>
    %32 = math.exp %31 : vector<8x4x32xf32>
    %33 = vector.shape_cast %32 : vector<8x4x32xf32> to vector<32x32xf32>
    %c0_12 = arith.constant 0 : index
    %c0_13 = arith.constant 0 : index
    %34 = vector.load %arg12[%c0_12, %c0_13] : memref<32x32xf32, #tpu.memory_space<vmem>>, vector<32x32xf32>
    %cst_14 = arith.constant dense<0.000000e+00> : vector<32x32xf32>
    %35 = tpu.matmul %33, %34, %cst_14 {dimension_numbers = #tpu.dot_dimension_numbers<[1], [0], [0], [1], [0, 0, 1, 1], [], []>} : vector<32x32xf32>, vector<32x32xf32>, vector<32x32xf32> -> vector<32x32xf32>
    %36 = vector.shape_cast %35 : vector<32x32xf32> to vector<8x4x32xf32>
    %37 = tpu.reciprocal %36 {approx = true} : vector<8x4x32xf32> -> vector<8x4x32xf32>
    %38 = arith.mulf %32, %37 : vector<8x4x32xf32>
    "tpu.trace_start"() <{level = 10 : i32, message = "bqk,bkd->bqd"}> : () -> ()
    %cst_15 = arith.constant dense<0.000000e+00> : vector<8x4x32xf32>
    %39 = tpu.matmul %38, %24, %cst_15 {dimension_numbers = #tpu.dot_dimension_numbers<[2], [1], [1], [2], [0, 0, 0, 1, 1, 2], [0], [0]>} : vector<8x4x32xf32>, vector<8x32x32xf32>, vector<8x4x32xf32> -> vector<8x4x32xf32>
    "tpu.trace_stop"() : () -> ()
    %40 = arith.addf %13, %39 : vector<8x4x32xf32>
    %41 = vector.shape_cast %40 : vector<8x4x32xf32> to vector<32x32xf32>
    %c0_16 = arith.constant 0 : index
    %c0_17 = arith.constant 0 : index
    %42 = vector.load %arg5[%c0_16, %c0_17] : memref<32x32xf32, #tpu.memory_space<vmem>>, vector<32x32xf32>
    %cst_18 = arith.constant dense<0.000000e+00> : vector<32x32xf32>
    %43 = tpu.matmul %41, %42, %cst_18 {dimension_numbers = #tpu.dot_dimension_numbers<[1], [0], [0], [1], [0, 0, 1, 1], [], []>} : vector<32x32xf32>, vector<32x32xf32>, vector<32x32xf32> -> vector<32x32xf32>
    %c0_19 = arith.constant 0 : index
    %c0_20 = arith.constant 0 : index
    %44 = vector.load %arg6[%c0_19, %c0_20] : memref<1x32xf32, #tpu.memory_space<vmem>>, vector<1x32xf32>
    %45 = vector.broadcast %44 : vector<1x32xf32> to vector<32x32xf32>
    %46 = arith.addf %43, %45 : vector<32x32xf32>
    %cst_21 = arith.constant 0.000000e+00 : f32
    %47 = vector.broadcast %cst_21 : f32 to vector<32x32xf32>
    %48 = arith.maximumf %46, %47 : vector<32x32xf32>
    %49 = arith.addf %41, %48 : vector<32x32xf32>
    %c0_22 = arith.constant 0 : index
    %c0_23 = arith.constant 0 : index
    %50 = vector.load %arg7[%c0_22, %c0_23] : memref<32x64xf32, #tpu.memory_space<vmem>>, vector<32x64xf32>
    %cst_24 = arith.constant dense<0.000000e+00> : vector<32x64xf32>
    %51 = tpu.matmul %49, %50, %cst_24 {dimension_numbers = #tpu.dot_dimension_numbers<[1], [0], [0], [1], [0, 0, 1, 1], [], []>} : vector<32x32xf32>, vector<32x64xf32>, vector<32x64xf32> -> vector<32x64xf32>
    %c0_25 = arith.constant 0 : index
    %c0_26 = arith.constant 0 : index
    %52 = vector.load %arg8[%c0_25, %c0_26] : memref<1x64xf32, #tpu.memory_space<vmem>>, vector<1x64xf32>
    %53 = vector.broadcast %52 : vector<1x64xf32> to vector<32x64xf32>
    %54 = arith.addf %51, %53 : vector<32x64xf32>
    %55 = vector.extract_strided_slice %54 {offsets = [0, 0], sizes = [32, 32], strides = [1, 1]} : vector<32x64xf32> to vector<32x32xf32>
    %56 = vector.extract_strided_slice %54 {offsets = [0, 32], sizes = [32, 32], strides = [1, 1]} : vector<32x64xf32> to vector<32x32xf32>
    %57 = vector.shape_cast %9 : vector<64x32xf32> to vector<8x8x32xf32>
    %58 = vector.shape_cast %55 : vector<32x32xf32> to vector<8x4x32xf32>
    %59 = vector.shape_cast %56 : vector<32x32xf32> to vector<8x4x32xf32>
    %c0_27 = arith.constant 0 : index
    %c0_28 = arith.constant 0 : index
    %60 = vector.load %arg13[%c0_27, %c0_28] : memref<16x32xf32, #tpu.memory_space<vmem>>, vector<16x32xf32>
    %61 = tpu.concatenate %58, %58, %58, %58 in 1 : vector<8x4x32xf32>, vector<8x4x32xf32>, vector<8x4x32xf32>, vector<8x4x32xf32> -> vector<8x16x32xf32>
    %62 = vector.shape_cast %60 : vector<16x32xf32> to vector<1x16x32xf32>
    %63 = vector.broadcast %62 : vector<1x16x32xf32> to vector<8x16x32xf32>
    %64 = arith.mulf %61, %63 : vector<8x16x32xf32>
    %65 = tpu.concatenate %59, %59, %59, %59 in 1 : vector<8x4x32xf32>, vector<8x4x32xf32>, vector<8x4x32xf32>, vector<8x4x32xf32> -> vector<8x16x32xf32>
    %66 = vector.shape_cast %60 : vector<16x32xf32> to vector<1x16x32xf32>
    %67 = vector.broadcast %66 : vector<1x16x32xf32> to vector<8x16x32xf32>
    %68 = arith.mulf %65, %67 : vector<8x16x32xf32>
    "tpu.trace_start"() <{level = 10 : i32, message = "bqd,bkd->bqk"}> : () -> ()
    %cst_29 = arith.constant dense<0.000000e+00> : vector<8x8x16xf32>
    %69 = tpu.matmul %57, %64, %cst_29 {dimension_numbers = #tpu.dot_dimension_numbers<[2], [2], [1], [1], [0, 0, 0, 1, 1, 1], [0], [0]>} : vector<8x8x32xf32>, vector<8x16x32xf32>, vector<8x8x16xf32> -> vector<8x8x16xf32>
    "tpu.trace_stop"() : () -> ()
    %cst_30 = arith.constant 0.176776692 : f32
    %70 = vector.broadcast %cst_30 : f32 to vector<8x8x16xf32>
    %71 = arith.mulf %69, %70 : vector<8x8x16xf32>
    %cst_31 = arith.constant dense<0xFF800000> : vector<8x8xf32>
    %72 = vector.multi_reduction <maximumf>, %71, %cst_31 [2] : vector<8x8x16xf32> to vector<8x8xf32>
    %73 = vector.shape_cast %72 : vector<8x8xf32> to vector<8x8x1xf32>
    %74 = vector.broadcast %73 : vector<8x8x1xf32> to vector<8x8x16xf32>
    %75 = arith.subf %71, %74 : vector<8x8x16xf32>
    %76 = math.exp %75 : vector<8x8x16xf32>
    %77 = vector.shape_cast %76 : vector<8x8x16xf32> to vector<64x16xf32>
    %c0_32 = arith.constant 0 : index
    %c0_33 = arith.constant 0 : index
    %78 = vector.load %arg14[%c0_32, %c0_33] : memref<16x16xf32, #tpu.memory_space<vmem>>, vector<16x16xf32>
    %cst_34 = arith.constant dense<0.000000e+00> : vector<64x16xf32>
    %79 = tpu.matmul %77, %78, %cst_34 {dimension_numbers = #tpu.dot_dimension_numbers<[1], [0], [0], [1], [0, 0, 1, 1], [], []>} : vector<64x16xf32>, vector<16x16xf32>, vector<64x16xf32> -> vector<64x16xf32>
    %80 = vector.shape_cast %79 : vector<64x16xf32> to vector<8x8x16xf32>
    %81 = tpu.reciprocal %80 {approx = true} : vector<8x8x16xf32> -> vector<8x8x16xf32>
    %82 = arith.mulf %76, %81 : vector<8x8x16xf32>
    "tpu.trace_start"() <{level = 10 : i32, message = "bqk,bkd->bqd"}> : () -> ()
    %cst_35 = arith.constant dense<0.000000e+00> : vector<8x8x32xf32>
    %83 = tpu.matmul %82, %68, %cst_35 {dimension_numbers = #tpu.dot_dimension_numbers<[2], [1], [1], [2], [0, 0, 0, 1, 1, 2], [0], [0]>} : vector<8x8x16xf32>, vector<8x16x32xf32>, vector<8x8x32xf32> -> vector<8x8x32xf32>
    "tpu.trace_stop"() : () -> ()
    %84 = arith.addf %57, %83 : vector<8x8x32xf32>
    %85 = vector.shape_cast %84 : vector<8x8x32xf32> to vector<64x32xf32>
    %c0_36 = arith.constant 0 : index
    %c0_37 = arith.constant 0 : index
    %86 = vector.load %arg9[%c0_36, %c0_37] : memref<32x32xf32, #tpu.memory_space<vmem>>, vector<32x32xf32>
    %cst_38 = arith.constant dense<0.000000e+00> : vector<64x32xf32>
    %87 = tpu.matmul %85, %86, %cst_38 {dimension_numbers = #tpu.dot_dimension_numbers<[1], [0], [0], [1], [0, 0, 1, 1], [], []>} : vector<64x32xf32>, vector<32x32xf32>, vector<64x32xf32> -> vector<64x32xf32>
    %c0_39 = arith.constant 0 : index
    %c0_40 = arith.constant 0 : index
    %88 = vector.load %arg10[%c0_39, %c0_40] : memref<1x32xf32, #tpu.memory_space<vmem>>, vector<1x32xf32>
    %89 = vector.broadcast %88 : vector<1x32xf32> to vector<64x32xf32>
    %90 = arith.addf %87, %89 : vector<64x32xf32>
    %cst_41 = arith.constant 0.000000e+00 : f32
    %91 = vector.broadcast %cst_41 : f32 to vector<64x32xf32>
    %92 = arith.maximumf %90, %91 : vector<64x32xf32>
    %93 = arith.addf %85, %92 : vector<64x32xf32>
    %94 = vector.shape_cast %93 : vector<64x32xf32> to vector<8x256xf32>
    %c0_42 = arith.constant 0 : index
    %c0_43 = arith.constant 0 : index
    %95 = vector.load %arg15[%c0_42, %c0_43] : memref<8x256xf32, #tpu.memory_space<vmem>>, vector<8x256xf32>
    tpu.vector_store %arg15[%c0_42, %c0_43], %94 {strides = array<i32>} : memref<8x256xf32, #tpu.memory_space<vmem>>, vector<8x256xf32>,
    return
  }
  func.func @transform_0(%arg0: i32) -> (i32, i32) {
    %c0_i32 = arith.constant 0 : i32
    %c0_i32_0 = arith.constant 0 : i32
    %c0_i32_1 = arith.constant 0 : i32
    return %c0_i32, %c0_i32_0 : i32, i32
  }
  func.func @transform_1(%arg0: i32) -> (i32, i32) {
    %c0_i32 = arith.constant 0 : i32
    %c0_i32_0 = arith.constant 0 : i32
    return %arg0, %c0_i32 : i32, i32
  }
  func.func @transform_2(%arg0: i32) -> (i32, i32) {
    %c0_i32 = arith.constant 0 : i32
    %c0_i32_0 = arith.constant 0 : i32
    %c0_i32_1 = arith.constant 0 : i32
    return %c0_i32, %c0_i32_0 : i32, i32
  }
  func.func @transform_3(%arg0: i32) -> (i32, i32) {
    %c0_i32 = arith.constant 0 : i32
    %c0_i32_0 = arith.constant 0 : i32
    %c0_i32_1 = arith.constant 0 : i32
    return %c0_i32, %c0_i32_0 : i32, i32
  }
  func.func @transform_4(%arg0: i32) -> (i32, i32) {
    %c0_i32 = arith.constant 0 : i32
    %c0_i32_0 = arith.constant 0 : i32
    %c0_i32_1 = arith.constant 0 : i32
    return %c0_i32, %c0_i32_0 : i32, i32
  }
  func.func @transform_5(%arg0: i32) -> (i32, i32) {
    %c0_i32 = arith.constant 0 : i32
    %c0_i32_0 = arith.constant 0 : i32
    %c0_i32_1 = arith.constant 0 : i32
    return %c0_i32, %c0_i32_0 : i32, i32
  }
  func.func @transform_6(%arg0: i32) -> (i32, i32) {
    %c0_i32 = arith.constant 0 : i32
    %c0_i32_0 = arith.constant 0 : i32
    %c0_i32_1 = arith.constant 0 : i32
    return %c0_i32, %c0_i32_0 : i32, i32
  }
  func.func @transform_7(%arg0: i32) -> (i32, i32) {
    %c0_i32 = arith.constant 0 : i32
    %c0_i32_0 = arith.constant 0 : i32
    %c0_i32_1 = arith.constant 0 : i32
    return %c0_i32, %c0_i32_0 : i32, i32
  }
  func.func @transform_8(%arg0: i32) -> (i32, i32) {
    %c0_i32 = arith.constant 0 : i32
    %c0_i32_0 = arith.constant 0 : i32
    %c0_i32_1 = arith.constant 0 : i32
    return %c0_i32, %c0_i32_0 : i32, i32
  }
  func.func @transform_9(%arg0: i32) -> (i32, i32) {
    %c0_i32 = arith.constant 0 : i32
    %c0_i32_0 = arith.constant 0 : i32
    %c0_i32_1 = arith.constant 0 : i32
    return %c0_i32, %c0_i32_0 : i32, i32
  }
  func.func @transform_10(%arg0: i32) -> (i32, i32) {
    %c0_i32 = arith.constant 0 : i32
    %c0_i32_0 = arith.constant 0 : i32
    %c0_i32_1 = arith.constant 0 : i32
    return %c0_i32, %c0_i32_0 : i32, i32
  }
  func.func @transform_11(%arg0: i32) -> (i32, i32) {
    %c0_i32 = arith.constant 0 : i32
    %c0_i32_0 = arith.constant 0 : i32
    %c0_i32_1 = arith.constant 0 : i32
    return %c0_i32, %c0_i32_0 : i32, i32
  }
  func.func @transform_12(%arg0: i32) -> (i32, i32) {
    %c0_i32 = arith.constant 0 : i32
    %c0_i32_0 = arith.constant 0 : i32
    %c0_i32_1 = arith.constant 0 : i32
    return %c0_i32, %c0_i32_0 : i32, i32
  }
  func.func @transform_13(%arg0: i32) -> (i32, i32) {
    %c0_i32 = arith.constant 0 : i32
    %c0_i32_0 = arith.constant 0 : i32
    %c0_i32_1 = arith.constant 0 : i32
    return %c0_i32, %c0_i32_0 : i32, i32
  }
  func.func @transform_14(%arg0: i32) -> (i32, i32) {
    %c0_i32 = arith.constant 0 : i32
    %c0_i32_0 = arith.constant 0 : i32
    return %arg0, %c0_i32 : i32, i32
  }
}

module attributes {stable_mosaic.version = 11 : i64} {
  func.func @_ae_kernel(%arg0: i32, %arg1: memref<4x32xf32, #tpu.memory_space<vmem>>, %arg2: memref<8x8x16xf32, #tpu.memory_space<vmem>>, %arg3: memref<16x96xf32, #tpu.memory_space<vmem>>, %arg4: memref<1x96xf32, #tpu.memory_space<vmem>>, %arg5: memref<32x32xf32, #tpu.memory_space<vmem>>, %arg6: memref<1x32xf32, #tpu.memory_space<vmem>>, %arg7: memref<32x64xf32, #tpu.memory_space<vmem>>, %arg8: memref<1x64xf32, #tpu.memory_space<vmem>>, %arg9: memref<32x32xf32, #tpu.memory_space<vmem>>, %arg10: memref<1x32xf32, #tpu.memory_space<vmem>>, %arg11: memref<32x32xf32, #tpu.memory_space<vmem>>, %arg12: memref<32x32xf32, #tpu.memory_space<vmem>>, %arg13: memref<16x32xf32, #tpu.memory_space<vmem>>, %arg14: memref<16x16xf32, #tpu.memory_space<vmem>>, %arg15: memref<8x256xf32, #tpu.memory_space<vmem>>) attributes {dimension_semantics = [#tpu.dimension_semantics<parallel>], iteration_bounds = array<i64: 2>, scalar_prefetch = 0 : i64, scratch_operands = 0 : i64, tpu.core_type = #tpu.core_type<tc>, window_params = [{pipeline_mode = #tpu.pipeline_mode<synchronous>, transform_indices = @transform_0, window_bounds = array<i64: 4, 32>}, {transform_indices = @transform_1, window_bounds = array<i64: 8, 8, 16>}, {pipeline_mode = #tpu.pipeline_mode<synchronous>, transform_indices = @transform_2, window_bounds = array<i64: 16, 96>}, {pipeline_mode = #tpu.pipeline_mode<synchronous>, transform_indices = @transform_3, window_bounds = array<i64: 1, 96>}, {pipeline_mode = #tpu.pipeline_mode<synchronous>, transform_indices = @transform_4, window_bounds = array<i64: 32, 32>}, {pipeline_mode = #tpu.pipeline_mode<synchronous>, transform_indices = @transform_5, window_bounds = array<i64: 1, 32>}, {pipeline_mode = #tpu.pipeline_mode<synchronous>, transform_indices = @transform_6, window_bounds = array<i64: 32, 64>}, {pipeline_mode = #tpu.pipeline_mode<synchronous>, transform_indices = @transform_7, window_bounds = array<i64: 1, 64>}, {pipeline_mode = #tpu.pipeline_mode<synchronous>, transform_indices = @transform_8, window_bounds = array<i64: 32, 32>}, {pipeline_mode = #tpu.pipeline_mode<synchronous>, transform_indices = @transform_9, window_bounds = array<i64: 1, 32>}, {pipeline_mode = #tpu.pipeline_mode<synchronous>, transform_indices = @transform_10, window_bounds = array<i64: 32, 32>}, {pipeline_mode = #tpu.pipeline_mode<synchronous>, transform_indices = @transform_11, window_bounds = array<i64: 32, 32>}, {pipeline_mode = #tpu.pipeline_mode<synchronous>, transform_indices = @transform_12, window_bounds = array<i64: 16, 32>}, {pipeline_mode = #tpu.pipeline_mode<synchronous>, transform_indices = @transform_13, window_bounds = array<i64: 16, 16>}, {transform_indices = @transform_14, window_bounds = array<i64: 8, 256>}]} {
    %c0 = arith.constant 0 : index
    %c0_0 = arith.constant 0 : index
    %c0_1 = arith.constant 0 : index
    %0 = vector.load %arg2[%c0, %c0_0, %c0_1] : memref<8x8x16xf32, #tpu.memory_space<vmem>>, vector<8x8x16xf32>
    %1 = vector.shape_cast %0 : vector<8x8x16xf32> to vector<64x16xf32>
    %c0_2 = arith.constant 0 : index
    %c0_3 = arith.constant 0 : index
    %2 = vector.load %arg3[%c0_2, %c0_3] : memref<16x96xf32, #tpu.memory_space<vmem>>, vector<16x96xf32>
    %cst = arith.constant dense<0.000000e+00> : vector<64x96xf32>
    %3 = tpu.matmul %1, %2, %cst {dimension_numbers = #tpu.dot_dimension_numbers<[1], [0], [0], [1], [0, 0, 1, 1], [], []>} : vector<64x16xf32>, vector<16x96xf32>, vector<64x96xf32> -> vector<64x96xf32>
    %c0_4 = arith.constant 0 : index
    %c0_5 = arith.constant 0 : index
    %4 = vector.load %arg4[%c0_4, %c0_5] : memref<1x96xf32, #tpu.memory_space<vmem>>, vector<1x96xf32>
    %5 = vector.broadcast %4 : vector<1x96xf32> to vector<64x96xf32>
    %6 = arith.addf %3, %5 : vector<64x96xf32>
    %7 = vector.extract_strided_slice %6 {offsets = [0, 0], sizes = [64, 32], strides = [1, 1]} : vector<64x96xf32> to vector<64x32xf32>
    %8 = vector.extract_strided_slice %6 {offsets = [0, 32], sizes = [64, 32], strides = [1, 1]} : vector<64x96xf32> to vector<64x32xf32>
    %9 = vector.extract_strided_slice %6 {offsets = [0, 64], sizes = [64, 32], strides = [1, 1]} : vector<64x96xf32> to vector<64x32xf32>
    %c0_6 = arith.constant 0 : index
    %c0_7 = arith.constant 0 : index
    %10 = vector.load %arg1[%c0_6, %c0_7] : memref<4x32xf32, #tpu.memory_space<vmem>>, vector<4x32xf32>
    %11 = vector.shape_cast %10 : vector<4x32xf32> to vector<1x4x32xf32>
    %12 = vector.shape_cast %11 : vector<1x4x32xf32> to vector<1x4x32xf32>
    %13 = vector.broadcast %12 : vector<1x4x32xf32> to vector<8x4x32xf32>
    %14 = vector.shape_cast %7 : vector<64x32xf32> to vector<8x8x32xf32>
    %15 = vector.shape_cast %8 : vector<64x32xf32> to vector<8x8x32xf32>
    %c0_8 = arith.constant 0 : index
    %c0_9 = arith.constant 0 : index
    %16 = vector.load %arg11[%c0_8, %c0_9] : memref<32x32xf32, #tpu.memory_space<vmem>>, vector<32x32xf32>
    %17 = tpu.concatenate %14, %14, %14, %14 in 1 : vector<8x8x32xf32>, vector<8x8x32xf32>, vector<8x8x32xf32>, vector<8x8x32xf32> -> vector<8x32x32xf32>
    %18 = vector.shape_cast %16 : vector<32x32xf32> to vector<1x32x32xf32>
    %19 = vector.broadcast %18 : vector<1x32x32xf32> to vector<8x32x32xf32>
    %20 = arith.mulf %17, %19 : vector<8x32x32xf32>
    %21 = tpu.concatenate %15, %15, %15, %15 in 1 : vector<8x8x32xf32>, vector<8x8x32xf32>, vector<8x8x32xf32>, vector<8x8x32xf32> -> vector<8x32x32xf32>
    %22 = vector.shape_cast %16 : vector<32x32xf32> to vector<1x32x32xf32>
    %23 = vector.broadcast %22 : vector<1x32x32xf32> to vector<8x32x32xf32>
    %24 = arith.mulf %21, %23 : vector<8x32x32xf32>
    "tpu.trace_start"() <{level = 10 : i32, message = "bqd,bkd->bqk"}> : () -> ()
    %cst_10 = arith.constant dense<0.000000e+00> : vector<8x4x32xf32>
    %25 = tpu.matmul %13, %20, %cst_10 {dimension_numbers = #tpu.dot_dimension_numbers<[2], [2], [1], [1], [0, 0, 0, 1, 1, 1], [0], [0]>} : vector<8x4x32xf32>, vector<8x32x32xf32>, vector<8x4x32xf32> -> vector<8x4x32xf32>
    "tpu.trace_stop"() : () -> ()
    %cst_11 = arith.constant 0.176776692 : f32
    %26 = vector.broadcast %cst_11 : f32 to vector<8x4x32xf32>
    %27 = arith.mulf %25, %26 : vector<8x4x32xf32>
    %cst_12 = arith.constant dense<0xFF800000> : vector<8x4xf32>
    %28 = vector.multi_reduction <maximumf>, %27, %cst_12 [2] : vector<8x4x32xf32> to vector<8x4xf32>
    %29 = vector.shape_cast %28 : vector<8x4xf32> to vector<8x4x1xf32>
    %30 = vector.broadcast %29 : vector<8x4x1xf32> to vector<8x4x32xf32>
    %31 = arith.subf %27, %30 : vector<8x4x32xf32>
    %32 = math.exp %31 : vector<8x4x32xf32>
    %33 = vector.shape_cast %32 : vector<8x4x32xf32> to vector<32x32xf32>
    %c0_13 = arith.constant 0 : index
    %c0_14 = arith.constant 0 : index
    %34 = vector.load %arg12[%c0_13, %c0_14] : memref<32x32xf32, #tpu.memory_space<vmem>>, vector<32x32xf32>
    %cst_15 = arith.constant dense<0.000000e+00> : vector<32x32xf32>
    %35 = tpu.matmul %33, %34, %cst_15 {dimension_numbers = #tpu.dot_dimension_numbers<[1], [0], [0], [1], [0, 0, 1, 1], [], []>} : vector<32x32xf32>, vector<32x32xf32>, vector<32x32xf32> -> vector<32x32xf32>
    %36 = vector.shape_cast %35 : vector<32x32xf32> to vector<8x4x32xf32>
    %37 = tpu.reciprocal %36 {approx = true} : vector<8x4x32xf32> -> vector<8x4x32xf32>
    %38 = arith.mulf %32, %37 : vector<8x4x32xf32>
    "tpu.trace_start"() <{level = 10 : i32, message = "bqk,bkd->bqd"}> : () -> ()
    %cst_16 = arith.constant dense<0.000000e+00> : vector<8x4x32xf32>
    %39 = tpu.matmul %38, %24, %cst_16 {dimension_numbers = #tpu.dot_dimension_numbers<[2], [1], [1], [2], [0, 0, 0, 1, 1, 2], [0], [0]>} : vector<8x4x32xf32>, vector<8x32x32xf32>, vector<8x4x32xf32> -> vector<8x4x32xf32>
    "tpu.trace_stop"() : () -> ()
    %40 = arith.addf %13, %39 : vector<8x4x32xf32>
    %41 = vector.shape_cast %40 : vector<8x4x32xf32> to vector<32x32xf32>
    %c0_17 = arith.constant 0 : index
    %c0_18 = arith.constant 0 : index
    %42 = vector.load %arg5[%c0_17, %c0_18] : memref<32x32xf32, #tpu.memory_space<vmem>>, vector<32x32xf32>
    %cst_19 = arith.constant dense<0.000000e+00> : vector<32x32xf32>
    %43 = tpu.matmul %41, %42, %cst_19 {dimension_numbers = #tpu.dot_dimension_numbers<[1], [0], [0], [1], [0, 0, 1, 1], [], []>} : vector<32x32xf32>, vector<32x32xf32>, vector<32x32xf32> -> vector<32x32xf32>
    %c0_20 = arith.constant 0 : index
    %c0_21 = arith.constant 0 : index
    %44 = vector.load %arg6[%c0_20, %c0_21] : memref<1x32xf32, #tpu.memory_space<vmem>>, vector<1x32xf32>
    %45 = vector.broadcast %44 : vector<1x32xf32> to vector<32x32xf32>
    %46 = arith.addf %43, %45 : vector<32x32xf32>
    %cst_22 = arith.constant 0.000000e+00 : f32
    %47 = vector.broadcast %cst_22 : f32 to vector<32x32xf32>
    %48 = arith.maximumf %46, %47 : vector<32x32xf32>
    %49 = arith.addf %41, %48 : vector<32x32xf32>
    %c0_23 = arith.constant 0 : index
    %c0_24 = arith.constant 0 : index
    %50 = vector.load %arg7[%c0_23, %c0_24] : memref<32x64xf32, #tpu.memory_space<vmem>>, vector<32x64xf32>
    %cst_25 = arith.constant dense<0.000000e+00> : vector<32x64xf32>
    %51 = tpu.matmul %49, %50, %cst_25 {dimension_numbers = #tpu.dot_dimension_numbers<[1], [0], [0], [1], [0, 0, 1, 1], [], []>} : vector<32x32xf32>, vector<32x64xf32>, vector<32x64xf32> -> vector<32x64xf32>
    %c0_26 = arith.constant 0 : index
    %c0_27 = arith.constant 0 : index
    %52 = vector.load %arg8[%c0_26, %c0_27] : memref<1x64xf32, #tpu.memory_space<vmem>>, vector<1x64xf32>
    %53 = vector.broadcast %52 : vector<1x64xf32> to vector<32x64xf32>
    %54 = arith.addf %51, %53 : vector<32x64xf32>
    %55 = vector.extract_strided_slice %54 {offsets = [0, 0], sizes = [32, 32], strides = [1, 1]} : vector<32x64xf32> to vector<32x32xf32>
    %56 = vector.extract_strided_slice %54 {offsets = [0, 32], sizes = [32, 32], strides = [1, 1]} : vector<32x64xf32> to vector<32x32xf32>
    %57 = vector.shape_cast %9 : vector<64x32xf32> to vector<8x8x32xf32>
    %58 = vector.shape_cast %55 : vector<32x32xf32> to vector<8x4x32xf32>
    %59 = vector.shape_cast %56 : vector<32x32xf32> to vector<8x4x32xf32>
    %c0_28 = arith.constant 0 : index
    %c0_29 = arith.constant 0 : index
    %60 = vector.load %arg13[%c0_28, %c0_29] : memref<16x32xf32, #tpu.memory_space<vmem>>, vector<16x32xf32>
    %61 = tpu.concatenate %58, %58, %58, %58 in 1 : vector<8x4x32xf32>, vector<8x4x32xf32>, vector<8x4x32xf32>, vector<8x4x32xf32> -> vector<8x16x32xf32>
    %62 = vector.shape_cast %60 : vector<16x32xf32> to vector<1x16x32xf32>
    %63 = vector.broadcast %62 : vector<1x16x32xf32> to vector<8x16x32xf32>
    %64 = arith.mulf %61, %63 : vector<8x16x32xf32>
    %65 = tpu.concatenate %59, %59, %59, %59 in 1 : vector<8x4x32xf32>, vector<8x4x32xf32>, vector<8x4x32xf32>, vector<8x4x32xf32> -> vector<8x16x32xf32>
    %66 = vector.shape_cast %60 : vector<16x32xf32> to vector<1x16x32xf32>
    %67 = vector.broadcast %66 : vector<1x16x32xf32> to vector<8x16x32xf32>
    %68 = arith.mulf %65, %67 : vector<8x16x32xf32>
    "tpu.trace_start"() <{level = 10 : i32, message = "bqd,bkd->bqk"}> : () -> ()
    %cst_30 = arith.constant dense<0.000000e+00> : vector<8x8x16xf32>
    %69 = tpu.matmul %57, %64, %cst_30 {dimension_numbers = #tpu.dot_dimension_numbers<[2], [2], [1], [1], [0, 0, 0, 1, 1, 1], [0], [0]>} : vector<8x8x32xf32>, vector<8x16x32xf32>, vector<8x8x16xf32> -> vector<8x8x16xf32>
    "tpu.trace_stop"() : () -> ()
    %cst_31 = arith.constant 0.176776692 : f32
    %70 = vector.broadcast %cst_31 : f32 to vector<8x8x16xf32>
    %71 = arith.mulf %69, %70 : vector<8x8x16xf32>
    %cst_32 = arith.constant dense<0xFF800000> : vector<8x8xf32>
    %72 = vector.multi_reduction <maximumf>, %71, %cst_32 [2] : vector<8x8x16xf32> to vector<8x8xf32>
    %73 = vector.shape_cast %72 : vector<8x8xf32> to vector<8x8x1xf32>
    %74 = vector.broadcast %73 : vector<8x8x1xf32> to vector<8x8x16xf32>
    %75 = arith.subf %71, %74 : vector<8x8x16xf32>
    %76 = math.exp %75 : vector<8x8x16xf32>
    %77 = vector.shape_cast %76 : vector<8x8x16xf32> to vector<64x16xf32>
    %c0_33 = arith.constant 0 : index
    %c0_34 = arith.constant 0 : index
    %78 = vector.load %arg14[%c0_33, %c0_34] : memref<16x16xf32, #tpu.memory_space<vmem>>, vector<16x16xf32>
    %cst_35 = arith.constant dense<0.000000e+00> : vector<64x16xf32>
    %79 = tpu.matmul %77, %78, %cst_35 {dimension_numbers = #tpu.dot_dimension_numbers<[1], [0], [0], [1], [0, 0, 1, 1], [], []>} : vector<64x16xf32>, vector<16x16xf32>, vector<64x16xf32> -> vector<64x16xf32>
    %80 = vector.shape_cast %79 : vector<64x16xf32> to vector<8x8x16xf32>
    %81 = tpu.reciprocal %80 {approx = true} : vector<8x8x16xf32> -> vector<8x8x16xf32>
    %82 = arith.mulf %76, %81 : vector<8x8x16xf32>
    "tpu.trace_start"() <{level = 10 : i32, message = "bqk,bkd->bqd"}> : () -> ()
    %cst_36 = arith.constant dense<0.000000e+00> : vector<8x8x32xf32>
    %83 = tpu.matmul %82, %68, %cst_36 {dimension_numbers = #tpu.dot_dimension_numbers<[2], [1], [1], [2], [0, 0, 0, 1, 1, 2], [0], [0]>} : vector<8x8x16xf32>, vector<8x16x32xf32>, vector<8x8x32xf32> -> vector<8x8x32xf32>
    "tpu.trace_stop"() : () -> ()
    %84 = arith.addf %57, %83 : vector<8x8x32xf32>
    %85 = vector.shape_cast %84 : vector<8x8x32xf32> to vector<64x32xf32>
    %c0_37 = arith.constant 0 : index
    %c0_38 = arith.constant 0 : index
    %86 = vector.load %arg9[%c0_37, %c0_38] : memref<32x32xf32, #tpu.memory_space<vmem>>, vector<32x32xf32>
    %cst_39 = arith.constant dense<0.000000e+00> : vector<64x32xf32>
    %87 = tpu.matmul %85, %86, %cst_39 {dimension_numbers = #tpu.dot_dimension_numbers<[1], [0], [0], [1], [0, 0, 1, 1], [], []>} : vector<64x32xf32>, vector<32x32xf32>, vector<64x32xf32> -> vector<64x32xf32>
    %c0_40 = arith.constant 0 : index
    %c0_41 = arith.constant 0 : index
    %88 = vector.load %arg10[%c0_40, %c0_41] : memref<1x32xf32, #tpu.memory_space<vmem>>, vector<1x32xf32>
    %89 = vector.broadcast %88 : vector<1x32xf32> to vector<64x32xf32>
    %90 = arith.addf %87, %89 : vector<64x32xf32>
    %cst_42 = arith.constant 0.000000e+00 : f32
    %91 = vector.broadcast %cst_42 : f32 to vector<64x32xf32>
    %92 = arith.maximumf %90, %91 : vector<64x32xf32>
    %93 = arith.addf %85, %92 : vector<64x32xf32>
    %94 = vector.shape_cast %93 : vector<64x32xf32> to vector<8x8x32xf32>
    %95 = vector.extract_strided_slice %94 {offsets = [0, 0, 0], sizes = [8, 1, 32], strides = [1, 1, 1]} : vector<8x8x32xf32> to vector<8x1x32xf32>
    %96 = vector.shape_cast %95 : vector<8x1x32xf32> to vector<8x32xf32>
    %97 = vector.extract_strided_slice %94 {offsets = [0, 1, 0], sizes = [8, 1, 32], strides = [1, 1, 1]} : vector<8x8x32xf32> to vector<8x1x32xf32>
    %98 = vector.shape_cast %97 : vector<8x1x32xf32> to vector<8x32xf32>
    %99 = vector.extract_strided_slice %94 {offsets = [0, 2, 0], sizes = [8, 1, 32], strides = [1, 1, 1]} : vector<8x8x32xf32> to vector<8x1x32xf32>
    %100 = vector.shape_cast %99 : vector<8x1x32xf32> to vector<8x32xf32>
    %101 = vector.extract_strided_slice %94 {offsets = [0, 3, 0], sizes = [8, 1, 32], strides = [1, 1, 1]} : vector<8x8x32xf32> to vector<8x1x32xf32>
    %102 = vector.shape_cast %101 : vector<8x1x32xf32> to vector<8x32xf32>
    %103 = vector.extract_strided_slice %94 {offsets = [0, 4, 0], sizes = [8, 1, 32], strides = [1, 1, 1]} : vector<8x8x32xf32> to vector<8x1x32xf32>
    %104 = vector.shape_cast %103 : vector<8x1x32xf32> to vector<8x32xf32>
    %105 = vector.extract_strided_slice %94 {offsets = [0, 5, 0], sizes = [8, 1, 32], strides = [1, 1, 1]} : vector<8x8x32xf32> to vector<8x1x32xf32>
    %106 = vector.shape_cast %105 : vector<8x1x32xf32> to vector<8x32xf32>
    %107 = vector.extract_strided_slice %94 {offsets = [0, 6, 0], sizes = [8, 1, 32], strides = [1, 1, 1]} : vector<8x8x32xf32> to vector<8x1x32xf32>
    %108 = vector.shape_cast %107 : vector<8x1x32xf32> to vector<8x32xf32>
    %109 = vector.extract_strided_slice %94 {offsets = [0, 7, 0], sizes = [8, 1, 32], strides = [1, 1, 1]} : vector<8x8x32xf32> to vector<8x1x32xf32>
    %110 = vector.shape_cast %109 : vector<8x1x32xf32> to vector<8x32xf32>
    %111 = tpu.concatenate %96, %98, %100, %102, %104, %106, %108, %110 in 1 : vector<8x32xf32>, vector<8x32xf32>, vector<8x32xf32>, vector<8x32xf32>, vector<8x32xf32>, vector<8x32xf32>, vector<8x32xf32>, vector<8x32xf32> -> vector<8x256xf32>
    %c0_43 = arith.constant 0 : index
    %c0_44 = arith.constant 0 : index
    %112 = vector.load %arg15[%c0_43, %c0_44] : memref<8x256xf32, #tpu.memory_space<vmem>>, vector<8x256xf32>
    tpu.vector_store %arg15[%c0_43, %c0_44], %111 {strides = array<i32>} : memref<8x256xf32, #tpu.memory_space<vmem>>, vector<8x256xf32>,
    return
  }
  func.func @transform_0(%arg0: i32) -> (i32, i32) {
    %c0_i32 = arith.constant 0 : i32
    %c0_i32_0 = arith.constant 0 : i32
    %c0_i32_1 = arith.constant 0 : i32
    return %c0_i32, %c0_i32_0 : i32, i32
  }
  func.func @transform_1(%arg0: i32) -> (i32, i32, i32) {
    %c0_i32 = arith.constant 0 : i32
    %c0_i32_0 = arith.constant 0 : i32
    %c0_i32_1 = arith.constant 0 : i32
    return %arg0, %c0_i32, %c0_i32_0 : i32, i32, i32
  }
  func.func @transform_2(%arg0: i32) -> (i32, i32) {
    %c0_i32 = arith.constant 0 : i32
    %c0_i32_0 = arith.constant 0 : i32
    %c0_i32_1 = arith.constant 0 : i32
    return %c0_i32, %c0_i32_0 : i32, i32
  }
  func.func @transform_3(%arg0: i32) -> (i32, i32) {
    %c0_i32 = arith.constant 0 : i32
    %c0_i32_0 = arith.constant 0 : i32
    %c0_i32_1 = arith.constant 0 : i32
    return %c0_i32, %c0_i32_0 : i32, i32
  }
  func.func @transform_4(%arg0: i32) -> (i32, i32) {
    %c0_i32 = arith.constant 0 : i32
    %c0_i32_0 = arith.constant 0 : i32
    %c0_i32_1 = arith.constant 0 : i32
    return %c0_i32, %c0_i32_0 : i32, i32
  }
  func.func @transform_5(%arg0: i32) -> (i32, i32) {
    %c0_i32 = arith.constant 0 : i32
    %c0_i32_0 = arith.constant 0 : i32
    %c0_i32_1 = arith.constant 0 : i32
    return %c0_i32, %c0_i32_0 : i32, i32
  }
  func.func @transform_6(%arg0: i32) -> (i32, i32) {
    %c0_i32 = arith.constant 0 : i32
    %c0_i32_0 = arith.constant 0 : i32
    %c0_i32_1 = arith.constant 0 : i32
    return %c0_i32, %c0_i32_0 : i32, i32
  }
  func.func @transform_7(%arg0: i32) -> (i32, i32) {
    %c0_i32 = arith.constant 0 : i32
    %c0_i32_0 = arith.constant 0 : i32
    %c0_i32_1 = arith.constant 0 : i32
    return %c0_i32, %c0_i32_0 : i32, i32
  }
  func.func @transform_8(%arg0: i32) -> (i32, i32) {
    %c0_i32 = arith.constant 0 : i32
    %c0_i32_0 = arith.constant 0 : i32
    %c0_i32_1 = arith.constant 0 : i32
    return %c0_i32, %c0_i32_0 : i32, i32
  }
  func.func @transform_9(%arg0: i32) -> (i32, i32) {
    %c0_i32 = arith.constant 0 : i32
    %c0_i32_0 = arith.constant 0 : i32
    %c0_i32_1 = arith.constant 0 : i32
    return %c0_i32, %c0_i32_0 : i32, i32
  }
  func.func @transform_10(%arg0: i32) -> (i32, i32) {
    %c0_i32 = arith.constant 0 : i32
    %c0_i32_0 = arith.constant 0 : i32
    %c0_i32_1 = arith.constant 0 : i32
    return %c0_i32, %c0_i32_0 : i32, i32
  }
  func.func @transform_11(%arg0: i32) -> (i32, i32) {
    %c0_i32 = arith.constant 0 : i32
    %c0_i32_0 = arith.constant 0 : i32
    %c0_i32_1 = arith.constant 0 : i32
    return %c0_i32, %c0_i32_0 : i32, i32
  }
  func.func @transform_12(%arg0: i32) -> (i32, i32) {
    %c0_i32 = arith.constant 0 : i32
    %c0_i32_0 = arith.constant 0 : i32
    %c0_i32_1 = arith.constant 0 : i32
    return %c0_i32, %c0_i32_0 : i32, i32
  }
  func.func @transform_13(%arg0: i32) -> (i32, i32) {
    %c0_i32 = arith.constant 0 : i32
    %c0_i32_0 = arith.constant 0 : i32
    %c0_i32_1 = arith.constant 0 : i32
    return %c0_i32, %c0_i32_0 : i32, i32
  }
  func.func @transform_14(%arg0: i32) -> (i32, i32) {
    %c0_i32 = arith.constant 0 : i32
    %c0_i32_0 = arith.constant 0 : i32
    return %arg0, %c0_i32 : i32, i32
  }
}

</mosaic_0001>

<bundles_post_ra>
// kernel: tpu_custom_call.1
= control target key start
LH: loop header
LB: loop body
LE: loop exit
PB: predicated region body
PF: predicated region fallthrough
CT: control target
= control target key end

     0   :  { %s7835_s0 = inlined_call_operand.hbm [shape: f32[4,32], index: 0, kind: input, shape index: {}]   ;;  %s7836_s1 = inlined_call_operand.hbm [shape: f32[16,8,16], index: 1, kind: input, shape index: {}]   ;;  %s7837_s2 = inlined_call_operand.hbm [shape: f32[16,96], index: 2, kind: input, shape index: {}]   ;;  %s7838_s3 = inlined_call_operand.vmem [shape: f32[1,96], index: 3, kind: input, shape index: {}]   ;;  %s7839_s4 = inlined_call_operand.hbm [shape: f32[32,32], index: 4, kind: input, shape index: {}]   ;;  %s7840_s5 = inlined_call_operand.hbm [shape: f32[1,32], index: 5, kind: input, shape index: {}]   ;;  %s7841_s6 = inlined_call_operand.hbm [shape: f32[32,64], index: 6, kind: input, shape index: {}]   ;;  %s7842_s7 = inlined_call_operand.hbm [shape: f32[1,64], index: 7, kind: input, shape index: {}]   ;;  %s7843_s8 = inlined_call_operand.hbm [shape: f32[32,32], index: 8, kind: input, shape index: {}]   ;;  %s7844_s9 = inlined_call_operand.hbm [shape: f32[1,32], index: 9, kind: input, shape index: {}]   ;;  %s7845_s10 = inlined_call_operand.vmem [shape: f32[32,32], index: 10, kind: input, shape index: {}]   ;;  %s7846_s11 = inlined_call_operand.hbm [shape: f32[32,32], index: 11, kind: input, shape index: {}]   ;;  %s7847_s12 = inlined_call_operand.hbm [shape: f32[16,32], index: 12, kind: input, shape index: {}]   ;;  %s7848_s13 = inlined_call_operand.vmem [shape: f32[16,16], index: 13, kind: input, shape index: {}]   ;;  %s7849_s14 = inlined_call_operand.hbm [shape: f32[16,256], index: 14, kind: output, shape index: {}]  }
   0x1   :  { %7860 = sst [smem:[#allocation30_spill]] %s7835_s0 }
   0x2   :  { %7861 = sst [smem:[#allocation31_spill]] %s7836_s1 }
   0x3   :  { %7862 = sst [smem:[#allocation32_spill]] %s7837_s2 }
   0x4   :  { %7863 = sst [smem:[#allocation33_spill]] %s7838_s3 }
   0x5   :  { %7864 = sst [smem:[#allocation34_spill]] %s7845_s10 }
   0x6   :  { %7865 = sst [smem:[#allocation35_spill]] %s7848_s13 }
   0x7   :  { %7866 = sst [smem:[#allocation36_spill]] %s7849_s14 }
   0x8   :  { %19 = vsyncpa [#allocation3], 0 }
   0x9   :  { %20 = vsyncpa [#allocation6], 0 }
   0xa   :  { %22 = vsyncpa [#allocation6 + $0x1], 0 }
   0xb   :  { %23 = vsyncpa [#allocation9], 0 }
   0xc   :  { %24 = vsyncpa [#allocation12], 0 }
   0xd   :  { %25 = vsyncpa [#allocation15], 0 }
   0xe   :  { %26 = vsyncpa [#allocation18], 0 }
   0xf   :  { %27 = vsyncpa [#allocation4], 0 }
  0x10   :  { %29 = vsyncpa [#allocation4 + $0x1], 0  ;;  %s6617_s29 = smov 0   ;;  %s6619_s30 = smov 0  }
  0x11   :  { %s6621_s15 = smov 0   ;;  %s6623_s16 = smov 0  }
  0x12 LB: > { %s6522_s17 = smov [#allocation7]   ;;  %s6638_s19 = sadd.s32 4294967295, %s6520_s16   ;;  %s6520_s16 = sphi %s6623_s16, %s7908_s16   ;;  %s6516_s15 = sphi %s6621_s15, %s7907_s15   ;;  %s6512_s30 = sphi %s6619_s30, %s7906_s30   ;;  %s6508_s29 = sphi %s6617_s29, %s7905_s29  }
  0x13   : > { %s388_s18 = sshll.u32 %s6522_s17, 4  ;;  %p4848_p0 = scmp.ge.s32.totalorder %s6520_s16, 1  ;;  %s6643_s18 = int_to_ptr.vmem [resolvable:$true] %s388_s18 }
  0x14   : > { %p7855_p1 = scmp.eq.s32.totalorder %s6638_s19, 0  ;;  %p365_p2 = scmp.lt.s32.totalorder %s6520_s16, 3 }
  0x15   : > { %s6523_s21 = smov [#allocation8]   ;;  %s6524_s24 = smov [#allocation11]  }
  0x16   : > { %p6645_p3 = pnand %p4848_p0, %p365_p2  ;;  %s404_s22 = sshll.u32 %s6523_s21, 4  ;;  %s6658_s22 = int_to_ptr.vmem [resolvable:$true] %s404_s22 }
  0x17   : > { %s428_s25 = sshll.u32 %s6524_s24, 4  ;;  %s7870_s2 = sld [smem:[#allocation32_spill]]  ;;  %s6660_s25 = int_to_ptr.vmem [resolvable:$true] %s428_s25 }
  0x18   : > { %s7867_s20 = scalar_select %p6645_p3, 1, 0 }
  0x19   : > { %p5825_p5 = pneg %p6645_p3 }
  0x1a   : > { %7868 = sst [smem:[#allocation29_spill]] %s7867_s20 }
  0x1b   : > { %p6654_p6 = pnand %p5825_p5, %p7855_p1 }
  0x1d   : > { %s6120_s28 = scalar_lea.hbm %s7870_s2, 256  ;;  %p6670_p8 = pneg %p6654_p6 }
  0x1e   : > { %p6121_p7 = scmp.ne.s32.totalorder %s7870_s2, %s6120_s28  ;;  %p6127_p11 = scmp.lt.u32.totalorder %s6120_s28, %s7870_s2 }
  0x20   : > { %p6123_p9 = pnand %p6670_p8, %p6121_p7 }
  0x22   : > { %p6124_p10 = pneg %p6123_p9 }
  0x24   : > { %p6129_p12 = pnand %p6127_p11, %p6124_p10 }
  0x26   : > { %6132 = shalt.err (!%p6129_p12)
}
  0x27   : > { %s6133_s14 = scalar_lea.vmem %s6643_s18, 256  ;;  %p6141_p5 = scmp.lt.s32.totalorder %s6643_s18, %s6643_s18 }
  0x28   : > { %p6134_p13 = scmp.ne.s32.totalorder %s6643_s18, %s6133_s14  ;;  %p6142_p4 = scmp.lt.s32.totalorder %s6133_s14, %s6133_s14 }
  0x2a   : > { %p6136_p0 = pnand %p6134_p13, %p6670_p8  ;;  %p6143_p7 = por %p6142_p4, %p6141_p5 }
  0x2c   : > { %p6137_p2 = pneg %p6136_p0 }
  0x2e   : > { %p6144_p9 = pnand %p6143_p7, %p6137_p2 }
  0x30   : > { %6147 = shalt.err (!%p6144_p9)
}
  0x31   : > { %s7857_s26 = smov 128   ;;  %s7858_s13 = smov 8  }
  0x32   : > { %5831 = dma.hbm_to_vmem [thread:$0]  (!%p6654_p6), %s7870_s2, 256, %s6643_s18, [#allocation6], %s7857_s26, %s7857_s26, %s7858_s13  }
  0x33   : > { %s6148_s14 = scalar_lea.hbm %s7839_s4, 512 }
  0x34   : > { %p6149_p4 = scmp.ne.s32.totalorder %s7839_s4, %s6148_s14  ;;  %p6155_p12 = scmp.lt.u32.totalorder %s6148_s14, %s7839_s4 }
  0x36   : > { %p6151_p10 = pnand %p6149_p4, %p6670_p8 }
  0x38   : > { %p6152_p11 = pneg %p6151_p10 }
  0x3a   : > { %p6157_p13 = pnand %p6155_p12, %p6152_p11 }
  0x3c   : > { %6160 = shalt.err (!%p6157_p13)
}
  0x3d   : > { %s6161_s18 = scalar_lea.vmem %s6658_s22, 512  ;;  %p6169_p7 = scmp.lt.s32.totalorder %s6658_s22, %s6658_s22 }
  0x3e   : > { %p6162_p0 = scmp.ne.s32.totalorder %s6658_s22, %s6161_s18  ;;  %p6170_p9 = scmp.lt.s32.totalorder %s6161_s18, %s6161_s18 }
  0x40   : > { %p6164_p2 = pnand %p6162_p0, %p6670_p8  ;;  %p6171_p4 = por %p6170_p9, %p6169_p7 }
  0x42   : > { %p6165_p5 = pneg %p6164_p2 }
  0x44   : > { %p6172_p10 = pnand %p6171_p4, %p6165_p5 }
  0x46   : > { %6175 = shalt.err (!%p6172_p10)
}
  0x47   : > { %5834 = dma.hbm_to_vmem [thread:$0]  (!%p6654_p6), %s7839_s4, 512, %s6658_s22, [#allocation9], %s7857_s26, %s7857_s26, %s7858_s13  }
  0x48   : > { %s6176_s27 = scalar_lea.hbm %s7841_s6, 512 }
  0x49   : > { %p6177_p11 = scmp.ne.s32.totalorder %s7841_s6, %s6176_s27  ;;  %p6183_p0 = scmp.lt.u32.totalorder %s6176_s27, %s7841_s6 }
  0x4b   : > { %p6179_p12 = pnand %p6177_p11, %p6670_p8 }
  0x4d   : > { %p6180_p13 = pneg %p6179_p12 }
  0x4f   : > { %p6185_p2 = pnand %p6183_p0, %p6180_p13 }
  0x51   : > { %6188 = shalt.err (!%p6185_p2)
}
  0x52   : > { %s6189_s22 = scalar_lea.vmem %s6660_s25, 512  ;;  %p6197_p4 = scmp.lt.s32.totalorder %s6660_s25, %s6660_s25 }
  0x53   : > { %p6190_p5 = scmp.ne.s32.totalorder %s6660_s25, %s6189_s22  ;;  %p6198_p10 = scmp.lt.s32.totalorder %s6189_s22, %s6189_s22 }
  0x55   : > { %p6192_p7 = pnand %p6190_p5, %p6670_p8  ;;  %p6199_p11 = por %p6198_p10, %p6197_p4 }
  0x57   : > { %p6193_p9 = pneg %p6192_p7 }
  0x59   : > { %p6200_p12 = pnand %p6199_p11, %p6193_p9 }
  0x5b   : > { %6203 = shalt.err (!%p6200_p12)
}
  0x5c   : > { %5840 = dma.hbm_to_vmem [thread:$0]  (!%p6654_p6), %s7841_s6, 512, %s6660_s25, [#allocation12], %s7857_s26, %s7857_s26, %s7858_s13  }
  0x5d   : > { %s6527_s3 = smov [#allocation14]   ;;  %s6528_s20 = smov [#allocation17]  }
  0x5e   : > { %s452_s10 = sshll.u32 %s6527_s3, 4  ;;  %s479_s27 = sshll.u32 %s6528_s20, 4  ;;  %s453_s10 = int_to_ptr.vmem [resolvable:$true] %s452_s10  ;;  %s480_s27 = int_to_ptr.vmem [resolvable:$true] %s479_s27 }
  0x5f   : > { %s6204_s24 = scalar_lea.hbm %s7843_s8, 512 }
  0x60   : > { %p6205_p13 = scmp.ne.s32.totalorder %s7843_s8, %s6204_s24  ;;  %p6211_p5 = scmp.lt.u32.totalorder %s6204_s24, %s7843_s8 }
  0x62   : > { %p6207_p0 = pnand %p6205_p13, %p6670_p8 }
  0x64   : > { %p6208_p2 = pneg %p6207_p0 }
  0x66   : > { %p6213_p7 = pnand %p6211_p5, %p6208_p2 }
  0x68   : > { %6216 = shalt.err (!%p6213_p7)
}
  0x69   : > { %s6217_s25 = scalar_lea.vmem %s453_s10, 512  ;;  %p6225_p11 = scmp.lt.s32.totalorder %s453_s10, %s453_s10 }
  0x6a   : > { %p6218_p9 = scmp.ne.s32.totalorder %s453_s10, %s6217_s25  ;;  %p6226_p12 = scmp.lt.s32.totalorder %s6217_s25, %s6217_s25 }
  0x6c   : > { %p6220_p4 = pnand %p6218_p9, %p6670_p8  ;;  %p6227_p1 = por %p6226_p12, %p6225_p11 }
  0x6e   : > { %p6221_p10 = pneg %p6220_p4 }
  0x70   : > { %p6228_p3 = pnand %p6227_p1, %p6221_p10 }
  0x72   : > { %6231 = shalt.err (!%p6228_p3)
}
  0x73   : > { %5846 = dma.hbm_to_vmem [thread:$0]  (!%p6654_p6), %s7843_s8, 512, %s453_s10, [#allocation15], %s7857_s26, %s7857_s26, %s7858_s13  }
  0x74   : > { %s6232_s28 = scalar_lea.hbm %s7846_s11, 512 }
  0x75   : > { %p6233_p1 = scmp.ne.s32.totalorder %s7846_s11, %s6232_s28  ;;  %p6239_p0 = scmp.lt.u32.totalorder %s6232_s28, %s7846_s11 }
  0x77   : > { %p6235_p3 = pnand %p6233_p1, %p6670_p8 }
  0x79   : > { %p6236_p13 = pneg %p6235_p3 }
  0x7b   : > { %p6241_p2 = pnand %p6239_p0, %p6236_p13 }
  0x7d   : > { %6244 = shalt.err (!%p6241_p2)
}
  0x7e   : > { %s6245_s18 = scalar_lea.vmem %s480_s27, 512  ;;  %p6253_p4 = scmp.lt.s32.totalorder %s480_s27, %s480_s27 }
  0x7f   : > { %p6246_p5 = scmp.ne.s32.totalorder %s480_s27, %s6245_s18  ;;  %p6254_p10 = scmp.lt.s32.totalorder %s6245_s18, %s6245_s18 }
  0x81   : > { %p6248_p7 = pnand %p6246_p5, %p6670_p8  ;;  %p6255_p11 = por %p6254_p10, %p6253_p4 }
  0x83   : > { %p6249_p9 = pneg %p6248_p7 }
  0x85   : > { %p6256_p12 = pnand %p6255_p11, %p6249_p9 }
  0x87   : > { %6259 = shalt.err (!%p6256_p12)
}
  0x88   : > { %5852 = dma.hbm_to_vmem [thread:$0]  (!%p6654_p6), %s7846_s11, 512, %s480_s27, [#allocation18], %s7857_s26, %s7857_s26, %s7858_s13  }
  0x89   : > { %s6529_s2 = smov [#allocation2]   ;;  %s6530_s3 = smov [#allocation10]  }
  0x8a   : > { %s378_s1 = sshll.u32 %s6529_s2, 4  ;;  %s418_s20 = sshll.u32 %s6530_s3, 4  ;;  %s379_s1 = int_to_ptr.vmem [resolvable:$true] %s378_s1  ;;  %s419_s20 = int_to_ptr.vmem [resolvable:$true] %s418_s20 }
  0x8b   : > { %s7872_s0 = sld [smem:[#allocation30_spill]] }
  0x91   : > { %s6260_s24 = scalar_lea.hbm %s7872_s0, 64 }
  0x92   : > { %p6261_p1 = scmp.ne.s32.totalorder %s7872_s0, %s6260_s24  ;;  %p6267_p0 = scmp.lt.u32.totalorder %s6260_s24, %s7872_s0 }
  0x94   : > { %p6263_p3 = pnand %p6261_p1, %p6670_p8 }
  0x96   : > { %p6264_p13 = pneg %p6263_p3 }
  0x98   : > { %p6269_p2 = pnand %p6267_p0, %p6264_p13 }
  0x9a   : > { %6272 = shalt.err (!%p6269_p2)
}
  0x9b   : > { %s6273_s27 = scalar_lea.vmem %s379_s1, 64  ;;  %p6281_p4 = scmp.lt.s32.totalorder %s379_s1, %s379_s1 }
  0x9c   : > { %p6274_p5 = scmp.ne.s32.totalorder %s379_s1, %s6273_s27  ;;  %p6282_p10 = scmp.lt.s32.totalorder %s6273_s27, %s6273_s27 }
  0x9e   : > { %p6276_p7 = pnand %p6274_p5, %p6670_p8  ;;  %p6283_p11 = por %p6282_p10, %p6281_p4 }
  0xa0   : > { %p6277_p9 = pneg %p6276_p7 }
  0xa2   : > { %p6284_p12 = pnand %p6283_p11, %p6277_p9 }
  0xa4   : > { %6287 = shalt.err (!%p6284_p12)
}
  0xa5   : > { %5828 = dma.hbm_to_vmem [thread:$0]  (!%p6654_p6), %s7872_s0, 64, %s379_s1, [#allocation3]  }
  0xa6   : > { %s6288_s17 = scalar_lea.hbm %s7840_s5, 16 }
  0xa7   : > { %p6289_p1 = scmp.ne.s32.totalorder %s7840_s5, %s6288_s17  ;;  %p6295_p0 = scmp.lt.u32.totalorder %s6288_s17, %s7840_s5 }
  0xa9   : > { %p6291_p3 = pnand %p6289_p1, %p6670_p8 }
  0xab   : > { %p6292_p13 = pneg %p6291_p3 }
  0xad   : > { %p6297_p2 = pnand %p6295_p0, %p6292_p13 }
  0xaf   : > { %6300 = shalt.err (!%p6297_p2)
}
  0xb0   : > { %s6301_s10 = scalar_lea.vmem %s419_s20, 16  ;;  %s6308_s1 = scalar_lea.vmem %s419_s20, 32 }
  0xb1   : > { %p6302_p5 = scmp.ne.s32.totalorder %s419_s20, %s6301_s10  ;;  %p6309_p4 = scmp.lt.s32.totalorder %s419_s20, %s419_s20 }
  0xb2   : > { %p6310_p10 = scmp.lt.s32.totalorder %s6308_s1, %s6301_s10 }
  0xb3   : > { %p6304_p7 = pnand %p6302_p5, %p6670_p8 }
  0xb4   : > { %p6311_p11 = por %p6310_p10, %p6309_p4 }
  0xb5   : > { %p6305_p9 = pneg %p6304_p7 }
  0xb7   : > { %p6312_p12 = pnand %p6311_p11, %p6305_p9 }
  0xb9   : > { %6315 = shalt.err (!%p6312_p12)
}
  0xba   : > { %5837 = dma.hbm_to_vmem [thread:$0]  (!%p6654_p6), %s7840_s5, 16, %s419_s20, [#allocation9]  }
  0xbb   : > { %s6531_s2 = smov [#allocation13]   ;;  %s6532_s28 = smov [#allocation16]  }
  0xbc   : > { %s442_s3 = sshll.u32 %s6531_s2, 4  ;;  %s466_s17 = sshll.u32 %s6532_s28, 4  ;;  %s443_s3 = int_to_ptr.vmem [resolvable:$true] %s442_s3  ;;  %s467_s17 = int_to_ptr.vmem [resolvable:$true] %s466_s17 }
  0xbd   : > { %s6316_s22 = scalar_lea.hbm %s7842_s7, 16 }
  0xbe   : > { %p6317_p1 = scmp.ne.s32.totalorder %s7842_s7, %s6316_s22  ;;  %p6323_p0 = scmp.lt.u32.totalorder %s6316_s22, %s7842_s7 }
  0xc0   : > { %p6319_p3 = pnand %p6317_p1, %p6670_p8 }
  0xc2   : > { %p6320_p13 = pneg %p6319_p3 }
  0xc4   : > { %p6325_p2 = pnand %p6323_p0, %p6320_p13 }
  0xc6   : > { %6328 = shalt.err (!%p6325_p2)
}
  0xc7   : > { %s6329_s20 = scalar_lea.vmem %s443_s3, 16  ;;  %s6336_s25 = scalar_lea.vmem %s443_s3, 32 }
  0xc8   : > { %p6330_p5 = scmp.ne.s32.totalorder %s443_s3, %s6329_s20  ;;  %p6337_p4 = scmp.lt.s32.totalorder %s443_s3, %s443_s3 }
  0xc9   : > { %p6338_p10 = scmp.lt.s32.totalorder %s6336_s25, %s6329_s20 }
  0xca   : > { %p6332_p7 = pnand %p6330_p5, %p6670_p8 }
  0xcb   : > { %p6339_p11 = por %p6338_p10, %p6337_p4 }
  0xcc   : > { %p6333_p9 = pneg %p6332_p7 }
  0xce   : > { %p6340_p12 = pnand %p6339_p11, %p6333_p9 }
  0xd0   : > { %6343 = shalt.err (!%p6340_p12)
}
  0xd1   : > { %5843 = dma.hbm_to_vmem [thread:$0]  (!%p6654_p6), %s7842_s7, 16, %s443_s3, [#allocation12]  }
  0xd2   : > { %s6344_s22 = scalar_lea.hbm %s7844_s9, 16 }
  0xd3   : > { %p6345_p1 = scmp.ne.s32.totalorder %s7844_s9, %s6344_s22  ;;  %p6351_p0 = scmp.lt.u32.totalorder %s6344_s22, %s7844_s9 }
  0xd5   : > { %p6347_p3 = pnand %p6345_p1, %p6670_p8 }
  0xd7   : > { %p6348_p13 = pneg %p6347_p3 }
  0xd9   : > { %p6353_p2 = pnand %p6351_p0, %p6348_p13 }
  0xdb   : > { %6356 = shalt.err (!%p6353_p2)
}
  0xdc   : > { %s6357_s20 = scalar_lea.vmem %s467_s17, 16  ;;  %s6364_s3 = scalar_lea.vmem %s467_s17, 32 }
  0xdd   : > { %p6358_p5 = scmp.ne.s32.totalorder %s467_s17, %s6357_s20  ;;  %p6365_p4 = scmp.lt.s32.totalorder %s467_s17, %s467_s17 }
  0xde   : > { %p6366_p10 = scmp.lt.s32.totalorder %s6364_s3, %s6357_s20 }
  0xdf   : > { %p6360_p7 = pnand %p6358_p5, %p6670_p8 }
  0xe0   : > { %p6367_p11 = por %p6366_p10, %p6365_p4 }
  0xe1   : > { %p6361_p9 = pneg %p6360_p7 }
  0xe3   : > { %p6368_p12 = pnand %p6367_p11, %p6361_p9 }
  0xe5   : > { %6371 = shalt.err (!%p6368_p12)
}
  0xe6   : > { %5849 = dma.hbm_to_vmem [thread:$0]  (!%p6654_p6), %s7844_s9, 16, %s467_s17, [#allocation15]  }
  0xe7   : > { %s6533_s28 = smov [#allocation19]   ;;  %s6372_s18 = scalar_lea.hbm %s7847_s12, 256 }
  0xe8   : > { %s492_s24 = sshll.u32 %s6533_s28, 4  ;;  %p6373_p1 = scmp.ne.s32.totalorder %s7847_s12, %s6372_s18  ;;  %s493_s24 = int_to_ptr.vmem [resolvable:$true] %s492_s24 }
  0xe9   : > { %p6379_p0 = scmp.lt.u32.totalorder %s6372_s18, %s7847_s12 }
  0xea   : > { %p6375_p3 = pnand %p6373_p1, %p6670_p8 }
  0xec   : > { %p6376_p13 = pneg %p6375_p3 }
  0xee   : > { %p6381_p2 = pnand %p6379_p0, %p6376_p13 }
  0xf0   : > { %6384 = shalt.err (!%p6381_p2)
}
  0xf1   : > { %s6385_s17 = scalar_lea.vmem %s493_s24, 256  ;;  %p6393_p4 = scmp.lt.s32.totalorder %s493_s24, %s493_s24 }
  0xf2   : > { %p6386_p5 = scmp.ne.s32.totalorder %s493_s24, %s6385_s17  ;;  %p6394_p10 = scmp.lt.s32.totalorder %s6385_s17, %s6385_s17 }
  0xf4   : > { %p6388_p7 = pnand %p6386_p5, %p6670_p8  ;;  %p6395_p11 = por %p6394_p10, %p6393_p4 }
  0xf6   : > { %p6389_p9 = pneg %p6388_p7 }
  0xf8   : > { %p6396_p12 = pnand %p6395_p11, %p6389_p9 }
  0xfa   : > { %6399 = shalt.err (!%p6396_p12)
}
  0xfb   : > { %5855 = dma.hbm_to_vmem [thread:$0]  (!%p6654_p6), %s7847_s12, 256, %s493_s24, [#allocation18], %s7857_s26, %s7857_s26, %s7858_s13  }
  0xfc   : > { %s4847_s23 = sadd.s32 4294967294, %s6520_s16   ;;  %s6883_s21 = sadd.s32 1, %s6520_s16  }
  0xfd   : > { %s60_s2 = ssub.s32 %s6520_s16, %s6883_s21  ;;  %s63_s28 = sadd.s32 1, %s6516_s15 }
  0xfe   : > { %p61_p8 = scmp.eq.s32.totalorder %s60_s2, 0  ;;  %p70_p1 = scmp.ne.s32.totalorder %s6516_s15, %s6512_s30 }
  0xff   : > { %p71_p3 = scmp.eq.s32.totalorder %s6520_s16, 0  ;;  %p76_p13 = scmp.ne.s32.totalorder %s6512_s30, %s6508_s29 }
 0x100   : > { %s6894_s14 = scalar_select %p61_p8, %s6516_s15, %s63_s28  }
 0x101   : > { %p6896_p0 = por %p71_p3, %p70_p1  ;;  %p7874_p2 = scmp.eq.s32.totalorder %s6638_s19, 0 }
 0x102   : > { %p352_p5 = scmp.eq.s32.totalorder %s6638_s19, 1  ;;  %p358_p7 = scmp.eq.s32.totalorder %s4847_s23, 1 }
 0x103   : > { %p6902_p6 = por %p7874_p2, %p76_p13  ;;  %p5874_p9 = scmp.lt.s32.totalorder %s6520_s16, 2 }
 0x104   : > { %s509_s18 = sand.u32 1, %s6520_s16   ;;  %p6909_p4 = por %p352_p5, %p70_p1 }
 0x105   : > { %p6913_p10 = por %p358_p7, %p76_p13  ;;  %s511_s27 = sand.u32 1, %s6516_s15  }
 0x106   : > { %s7876_s10 = scalar_select %p6909_p4, 1, 0 }
 0x107   : > { %s7877_s1 = scalar_select %p6913_p10, 1, 0 }
 0x108   : > { %s4860_s20 = sshll.u32 %s511_s27, 6  ;;  %s5005_s17 = sshll.u32 %s6520_s16, 10 }
 0x109   : > { %s7878_s2 = sld [smem:[#allocation31_spill]]  ;;  %s513_s23 = scalar_lea.vmem [#allocation5], %s4860_s20 }
 0x10a   : > { %s520_s26 = sshll.u32 %s513_s23, 4  ;;  %p6926_p11 = pnand %p5874_p9, %p6896_p0  ;;  %s6930_s26 = int_to_ptr.vmem [resolvable:$true] %s520_s26 }
 0x10b   : > { %s6932_s27 = scalar_lea.sflag [#allocation6], %s509_s18 }
 0x10c   : > { %p6402_p8 = pneg %p6926_p11 }
 0x10f   : > { %s6922_s28 = scalar_lea.hbm %s7878_s2, %s5005_s17  ;;  %s6405_s17 = scalar_lea.hbm %s7878_s2, 2048 }
 0x110   : > { %s6400_s3 = scalar_lea.hbm %s6922_s28, 1024  ;;  %p6406_p13 = scmp.lt.u32.totalorder %s6922_s28, %s7878_s2 }
 0x111   : > { %p6401_p12 = scmp.ne.s32.totalorder %s6922_s28, %s6400_s3  ;;  %p6407_p0 = scmp.lt.u32.totalorder %s6405_s17, %s6400_s3 }
 0x112   : > { %p6409_p5 = scmp.lt.u32.totalorder %s6400_s3, %s6922_s28 }
 0x113   : > { %p6403_p1 = pnand %p6402_p8, %p6401_p12  ;;  %p6408_p2 = por %p6407_p0, %p6406_p13 }
 0x115   : > { %p6404_p3 = pneg %p6403_p1  ;;  %p6410_p7 = por %p6409_p5, %p6408_p2 }
 0x117   : > { %p6411_p9 = pnand %p6410_p7, %p6404_p3 }
 0x119   : > { %6414 = shalt.err (!%p6411_p9)
}
 0x11a   : > { %s6415_s18 = scalar_lea.vmem %s6930_s26, 1024  ;;  %s6534_s20 = smov [#allocation5]  }
 0x11b   : > { %p6416_p12 = scmp.ne.s32.totalorder %s6930_s26, %s6415_s18  ;;  %s6420_s22 = sshll.u32 %s6534_s20, 4  ;;  %s6421_s22 = int_to_ptr.vmem [resolvable:$false] %s6420_s22 }
 0x11c   : > { %s6422_s25 = scalar_lea.vmem %s6421_s22, 2048  ;;  %p6423_p4 = scmp.lt.s32.totalorder %s6930_s26, %s6421_s22 }
 0x11d   : > { %p6418_p1 = pnand %p6416_p12, %p6402_p8  ;;  %p6424_p13 = scmp.lt.s32.totalorder %s6422_s25, %s6415_s18 }
 0x11f   : > { %p6419_p10 = pneg %p6418_p1  ;;  %p6425_p0 = por %p6424_p13, %p6423_p4 }
 0x121   : > { %p6426_p2 = pnand %p6425_p0, %p6419_p10 }
 0x123   : > { %6429 = shalt.err (!%p6426_p2)
}
 0x124   : > { %s7880_s3 = smov 8   ;;  %s7881_s17 = smov 128  }
 0x125   : > { %5859 = dma.hbm_to_vmem [thread:$0]  (!%p6926_p11), %s6922_s28, 1024, %s6930_s26, %s6932_s27, %s7881_s17, %s7881_s17, %s7880_s3  }
 0x126   : > { %s7882_s23 = sld [smem:[#allocation29_spill]] }
 0x12c   : > { %p7883_p8 = scmp.ne.s32.totalorder %s7882_s23, 0 }
 0x12d   : > { %p7884_p3 = scmp.eq.s32.totalorder (!%p7883_p8), %s6638_s19, 0 }
 0x12e   : > { %532 = sbr.rel (%p7883_p8) target bundleno = 3425 (0xd61), region = 76 }
 0x135   : > { %6475 = dma.done.wait (%p7884_p3), [#allocation3], 64   ;;  %p7885_p5 = pmov %p7884_p3 }
 0x136   : > { %s538_s13 = sand.u32 1, %s6638_s19   ;;  %s6971_s18 = sand.u32 1, %s6512_s30  }
 0x137   : > { %6477 = vsyncadd (%p7885_p5), [#allocation3], 4294967232  ;;  %s4865_s20 = sshll.u32 %s6971_s18, 6  ;;  %s539_s22 = scalar_lea.sflag [#allocation6], %s538_s13 }
 0x138   : > { %s6974_s25 = scalar_lea.vmem [#allocation5], %s4865_s20 }
 0x139   : > { %6479 = dma.done.wait (%p6902_p6), %s539_s22, 1024  }
 0x13a   : > { %6481 = vsyncadd (%p6902_p6), %s539_s22, 4294966272  ;;  %p7886_p4 = pmov %p7884_p3 }
 0x13b   : > { %p7887_p10 = pmov %p7884_p3 }
 0x13c   : > { %6483 = dma.done.wait (%p7886_p4), [#allocation6], 256  }
 0x13d   : > { %6485 = vsyncadd (%p7887_p10), [#allocation6], 4294967040  ;;  %p7888_p11 = pmov %p7884_p3 }
 0x13e   : > { %p7889_p7 = pmov %p7884_p3 }
 0x13f   : > { %6487 = dma.done.wait (%p7888_p11), [#allocation9], 528  }
 0x140   : > { %6489 = vsyncadd (%p7889_p7), [#allocation9], 4294966768  ;;  %p7890_p9 = pmov %p7884_p3 }
 0x141   : > { %p7891_p12 = pmov %p7884_p3 }
 0x142   : > { %6491 = dma.done.wait (%p7890_p9), [#allocation12], 528  }
 0x143   : > { %6493 = vsyncadd (%p7891_p12), [#allocation12], 4294966768  ;;  %p7892_p6 = pmov %p7884_p3 }
 0x144   : > { %p7893_p1 = pmov %p7884_p3 }
 0x145   : > { %6495 = dma.done.wait (%p7892_p6), [#allocation15], 528  }
 0x146   : > { %6497 = vsyncadd (%p7893_p1), [#allocation15], 4294966768  ;;  %p7894_p13 = pmov %p7893_p1 }
 0x147   : > { %p7895_p0 = pmov %p7893_p1 }
 0x148   : > { %6499 = dma.done.wait (%p7894_p13), [#allocation18], 768  }
 0x149   : > { %6501 = vsyncadd (%p7895_p0), [#allocation18], 4294966528  ;;  %vm641_vm0 = vcmask 130048   ;;  %v632_v0 = vld [vmem:[#allocation7] sm:$0xff]  ;;  %v633_v1 = vld [vmem:[#allocation7 + $0x8] sm:$0xff]  ;;  %v6535_v11 = vmov 0.0|0.0  }
 0x14a   : > { %v624_v2 = vld [vmem:[%s6974_s25] sm:$0xff]  ;;  %v5573_v3 = vpack.c.bf16 %v633_v1, %v632_v0  ;;  %v625_v4 = vld [vmem:[%s6974_s25 + $0x8] sm:$0xff]  ;;  %v626_v5 = vld [vmem:[%s6974_s25 + $0x10] sm:$0xff]  ;;  %5577 = vmatprep.subr.bf16.mxu1 %v6535_v11  ;;  %vm6536_vm1 = vmmov 0   ;;  %v6537_v12 = vmov 0.0   ;;  %s7896_s28 = sld [smem:[#allocation33_spill]] }
 0x14b   : > { %5195 = vmatprep.mubr.msk.f32.mxu0 %vm641_vm0, %v624_v2  ;;  %v627_v6 = vld [vmem:[%s6974_s25 + $0x18] sm:$0xff]  ;;  %v628_v7 = vld [vmem:[%s6974_s25 + $0x20] sm:$0xff]  ;;  %v629_v8 = vld [vmem:[%s6974_s25 + $0x28] sm:$0xff]  ;;  %5215 = vmatprep.mubr.msk.f32.mxu1 %vm6536_vm1, %v6537_v12  ;;  %s7897_s17 = sld [smem:[#allocation34_spill]]  ;;  %vm856_vm2 = vcmask 261120   ;;  %vm1524_vm4 = vcmask 257024  }
 0x14c   : > { %5574 = vmatprep.subr.bf16.mxu0 %v5573_v3  ;;  %v630_v9 = vld [vmem:[%s6974_s25 + $0x30] sm:$0xff]  ;;  %v631_v10 = vld [vmem:[%s6974_s25 + $0x38] sm:$0xff]  ;;  %vm7049_vm3 = vmpackc.low %vm856_vm2, %vm856_vm2  ;;  %s6538_s24 = smov 32   ;;  %s6540_s27 = smov 64   ;;  %vm2716_vm5 = vcmask 1043456   ;;  %vm4517_vm6 = vcmask 1041409  }
 0x14d   : > { %5576 = vmatpush3.bf16.msra.mxu0 %v5573_v3  ;;  %v7101_v47 = vld [vmem:[#allocation2] sm:$0xf]  ;;  %s7900_s13 = sld [smem:[#allocation35_spill]]  ;;  %vm4520_vm7 = vcmask 1042434   ;;  %vm4523_vm8 = vcmask 1043459   ;;  %vm4526_vm9 = vcmask 1044484  }
 0x14e   : > { %5585 = vmatprep.subr.bf16.mxu0 %v6535_v11  ;;  %vm4529_vm10 = vcmask 1045509   ;;  %vm4532_vm11 = vcmask 1046534   ;;  %vm4535_vm12 = vcmask 1047559   ;;  %s4875_s25 = sshll.u32 %s6971_s18, 4  ;;  %vm4656_vm13 = vcmask 523264   ;;  %s7901_s23 = sld [smem:[#allocation36_spill]] }
 0x14f   : > { %s622_s26 = scalar_lea.vmem [#allocation20], %s4875_s25  ;;  %vm4658_vm14 = vcmask 785408   ;;  %p7902_p8 = scmp.ne.s32.totalorder %s7876_s10, 0 }
 0x150   : > { %5196 = vmatmul.mubr.msk.f32.vlgmr.msra.gmra.mrb[0].mxu0 %vm641_vm0, %v625_v4  ;;  %v7025_v13 = vld [vmem:[%s7896_s28] ss:$0 sm:$0xff]  ;;  %s6539_s28 = smov 96   ;;  %s6541_s25 = smov [#allocation20]  }
 0x151   : > { %5198 = vmatprep.mubr.msk.f32.mxu0 %vm641_vm0, %v626_v5  ;;  %v7030_v15 = vld [vmem:[%s7897_s17] sm:$0xff]  ;;  %v7035_v16 = vld [vmem:[%s7897_s17 + $0x8] sm:$0xff]  ;;  %v7060_v29 = vld [vmem:[%s7897_s17 + $0x10] sm:$0xff]  ;;  %s6434_s0 = sshll.u32 %s6541_s25, 4  ;;  %s6435_s0 = int_to_ptr.vmem [resolvable:$false] %s6434_s0 }
 0x152   : > { %v7065_v30 = vld [vmem:[%s7897_s17 + $0x18] sm:$0xff] }
 0x154   : > { %5199 = vmatmul.mubr.msk.f32.gmra.mrb[2].mxu0 %vm641_vm0, %v627_v6 }
 0x155   : > { %5201 = vmatprep.mubr.msk.f32.mxu0 %vm641_vm0, %v628_v7 }
 0x158   : > { %5202 = vmatmul.mubr.msk.f32.gmra.mrb[4].mxu0 %vm641_vm0, %v629_v8 }
 0x159   : > { %5204 = vmatprep.mubr.msk.f32.mxu0 %vm641_vm0, %v630_v9 }
 0x15c   : > { %5205 = vmatmul.mubr.msk.f32.gmra.mrb[6].mxu0 %vm641_vm0, %v631_v10 }
 0x15d   : > { %5226 = vmatprep.mubr.msk.f32.mxu0 %vm6536_vm1, %v6537_v12 }
 0x223   : > { %v5197_v14 = vpop.f32.mrb[0].mxu0 }
 0x224   : > { %v7038_v17 = vadd.f32 %v5197_v14, %v7025_v13  ;;  %v732_v18 = vpop.f32.mrb[1].mxu0 }
 0x225   : > { %v7041_v19 = vadd.f32 %v7025_v13, %v732_v18 }
 0x226   : > { %v780_v20 = vmul.f32 %v7030_v15, %v7038_v17  ;;  %v781_v21 = vmul.f32 %v7035_v16, %v7038_v17  ;;  %v782_v32 = vmul.f32 %v7060_v29, %v7038_v17  ;;  %v783_v33 = vmul.f32 %v7065_v30, %v7038_v17 }
 0x227   : > { %v776_v23 = vmul.f32 %v7030_v15, %v7041_v19  ;;  %v777_v24 = vmul.f32 %v7035_v16, %v7041_v19  ;;  %v5200_v25 = vpop.f32.mrb[2].mxu0  ;;  %v778_v35 = vmul.f32 %v7060_v29, %v7041_v19  ;;  %v779_v36 = vmul.f32 %v7065_v30, %v7041_v19 }
 0x228   : > { %v5586_v26 = vpack.c.bf16 %v781_v21, %v780_v20  ;;  %v742_v27 = vpop.f32.mrb[3].mxu0  ;;  %v7082_v37 = vadd.f32 %v5200_v25, %v7025_v13  ;;  %v5590_v40 = vpack.c.bf16 %v783_v33, %v782_v32 }
 0x229   : > { %v5578_v28 = vpack.c.bf16 %v777_v24, %v776_v23  ;;  %v7085_v38 = vadd.f32 %v7025_v13, %v742_v27  ;;  %v5582_v42 = vpack.c.bf16 %v779_v36, %v778_v35 }
 0x22a   : > { %5588 = vmatpush3.bf16.xpose.msk.msra.mxu0 %vm7049_vm3, %v5586_v26  ;;  %v788_v43 = vmul.f32 %v7030_v15, %v7082_v37  ;;  %v789_v44 = vmul.f32 %v7035_v16, %v7082_v37  ;;  %v790_v50 = vmul.f32 %v7060_v29, %v7082_v37  ;;  %v791_v51 = vmul.f32 %v7065_v30, %v7082_v37 }
 0x22b   : > { %5580 = vmatpush3.bf16.xpose.msk.msra.mxu1 %vm7049_vm3, %v5578_v28  ;;  %5589 = vmatprep.subr.bf16.mxu0 %v6535_v11  ;;  %v5203_v31 = vpop.f32.mrb[4].mxu0  ;;  %v784_v45 = vmul.f32 %v7030_v15, %v7085_v38  ;;  %v785_v46 = vmul.f32 %v7035_v16, %v7085_v38  ;;  %v786_v52 = vmul.f32 %v7060_v29, %v7085_v38 }
 0x22c   : > { %5581 = vmatprep.subr.bf16.mxu1 %v6535_v11  ;;  %v752_v34 = vpop.f32.mrb[5].mxu0  ;;  %v5602_v48 = vpack.c.bf16 %v789_v44, %v788_v43  ;;  %v787_v53 = vmul.f32 %v7065_v30, %v7085_v38  ;;  %v7126_v54 = vadd.f32 %v5203_v31, %v7025_v13  ;;  %v5606_v56 = vpack.c.bf16 %v791_v51, %v790_v50 }
 0x22d   : > { %v5594_v49 = vpack.c.bf16 %v785_v46, %v784_v45  ;;  %v7129_v55 = vadd.f32 %v7025_v13, %v752_v34 }
 0x22e   : > { %v5598_v57 = vpack.c.bf16 %v787_v53, %v786_v52  ;;  %v796_v58 = vmul.f32 %v7030_v15, %v7126_v54  ;;  %v797_v59 = vmul.f32 %v7035_v16, %v7126_v54  ;;  %v798_v0 = vmul.f32 %v7060_v29, %v7126_v54 }
 0x22f   : > { %v5206_v39 = vpop.f32.mrb[6].mxu0  ;;  %v792_v60 = vmul.f32 %v7030_v15, %v7129_v55  ;;  %v793_v61 = vmul.f32 %v7035_v16, %v7129_v55  ;;  %v799_v1 = vmul.f32 %v7065_v30, %v7126_v54  ;;  %v794_v2 = vmul.f32 %v7060_v29, %v7129_v55 }
 0x230   : > { %v762_v41 = vpop.f32.mrb[7].mxu0  ;;  %v5618_v62 = vpack.c.bf16 %v797_v59, %v796_v58  ;;  %v795_v3 = vmul.f32 %v7065_v30, %v7129_v55  ;;  %v7168_v4 = vadd.f32 %v5206_v39, %v7025_v13  ;;  %v1573_v58 = vld [vmem:[#allocation17] sm:$0xff]  ;;  %v1574_v59 = vld [vmem:[#allocation17 + $0x8] sm:$0xff] }
 0x231   : > { %v5610_v63 = vpack.c.bf16 %v793_v61, %v792_v60  ;;  %v7171_v5 = vadd.f32 %v7025_v13, %v762_v41  ;;  %v5622_v6 = vpack.c.bf16 %v799_v1, %v798_v0  ;;  %v5641_v60 = vpack.c.bf16 %v1574_v59, %v1573_v58  ;;  %v1575_v1 = vld [vmem:[#allocation17 + $0x10] sm:$0xff] }
 0x232   : > { %5592 = vmatpush3.bf16.xpose.msk.msra.mxu0 %vm7049_vm3, %v5590_v40  ;;  %v5614_v7 = vpack.c.bf16 %v795_v3, %v794_v2  ;;  %v804_v8 = vmul.f32 %v7030_v15, %v7168_v4  ;;  %v805_v9 = vmul.f32 %v7035_v16, %v7168_v4  ;;  %v806_v20 = vmul.f32 %v7060_v29, %v7168_v4  ;;  %v1576_v2 = vld [vmem:[#allocation17 + $0x18] sm:$0xff] }
 0x233   : > { %5584 = vmatpush3.bf16.xpose.msk.msra.mxu1 %vm7049_vm3, %v5582_v42  ;;  %5601 = vmatprep.subr.bf16.mxu0 %v6535_v11  ;;  %v800_v10 = vmul.f32 %v7030_v15, %v7171_v5  ;;  %v801_v13 = vmul.f32 %v7035_v16, %v7171_v5  ;;  %v807_v21 = vmul.f32 %v7065_v30, %v7168_v4 }
 0x234   : > { %5593 = vmatprep.subr.bf16.mxu1 %v6535_v11  ;;  %v5634_v14 = vpack.c.bf16 %v805_v9, %v804_v8  ;;  %v802_v23 = vmul.f32 %v7060_v29, %v7171_v5  ;;  %v803_v24 = vmul.f32 %v7065_v30, %v7171_v5 }
 0x235   : > { %v5626_v18 = vpack.c.bf16 %v801_v13, %v800_v10  ;;  %v5638_v25 = vpack.c.bf16 %v807_v21, %v806_v20 }
 0x236   : > { %v5630_v26 = vpack.c.bf16 %v803_v24, %v802_v23 }
 0x239   : > { %5227 = vmatmul.mubr.msk.f32.vlgmr.msra.gmra.mrb[8].mxu0 %vm856_vm2, %v7101_v47 }
 0x23a   : > { %5216 = vmatmul.mubr.msk.f32.vlgmr.msra.gmra.mrb[0].mxu1 %vm856_vm2, %v7101_v47  ;;  %5604 = vmatpush3.bf16.xpose.msk.msra.mxu0 %vm7049_vm3, %v5602_v48 }
 0x23b   : > { %5596 = vmatpush3.bf16.xpose.msk.msra.mxu1 %vm7049_vm3, %v5594_v49  ;;  %5605 = vmatprep.subr.bf16.mxu0 %v6535_v11 }
 0x23c   : > { %5597 = vmatprep.subr.bf16.mxu1 %v6535_v11  ;;  %5237 = vmatprep.mubr.msk.f32.mxu1 %vm6536_vm1, %v6537_v12 }
 0x23d   : > { %5248 = vmatprep.mubr.msk.f32.mxu0 %vm6536_vm1, %v6537_v12 }
 0x242   : > { %5608 = vmatpush3.bf16.xpose.msk.msra.mxu0 %vm7049_vm3, %v5606_v56 }
 0x243   : > { %5600 = vmatpush3.bf16.xpose.msk.msra.mxu1 %vm7049_vm3, %v5598_v57  ;;  %5617 = vmatprep.subr.bf16.mxu0 %v6535_v11 }
 0x244   : > { %5609 = vmatprep.subr.bf16.mxu1 %v6535_v11 }
 0x249   : > { %5249 = vmatmul.mubr.msk.f32.vlgmr.msra.gmra.mrb[10].mxu0 %vm856_vm2, %v7101_v47 }
 0x24a   : > { %5238 = vmatmul.mubr.msk.f32.vlgmr.msra.gmra.mrb[2].mxu1 %vm856_vm2, %v7101_v47  ;;  %5620 = vmatpush3.bf16.xpose.msk.msra.mxu0 %vm7049_vm3, %v5618_v62 }
 0x24b   : > { %5612 = vmatpush3.bf16.xpose.msk.msra.mxu1 %vm7049_vm3, %v5610_v63  ;;  %5621 = vmatprep.subr.bf16.mxu0 %v6535_v11 }
 0x24c   : > { %5613 = vmatprep.subr.bf16.mxu1 %v6535_v11  ;;  %5270 = vmatprep.mubr.msk.f32.mxu0 %vm6536_vm1, %v6537_v12 }
 0x24d   : > { %5259 = vmatprep.mubr.msk.f32.mxu1 %vm6536_vm1, %v6537_v12 }
 0x252   : > { %5624 = vmatpush3.bf16.xpose.msk.msra.mxu0 %vm7049_vm3, %v5622_v6 }
 0x253   : > { %5616 = vmatpush3.bf16.xpose.msk.msra.mxu1 %vm7049_vm3, %v5614_v7  ;;  %5633 = vmatprep.subr.bf16.mxu0 %v6535_v11  ;;  %v5645_v7 = vpack.c.bf16 %v1576_v2, %v1575_v1 }
 0x254   : > { %5625 = vmatprep.subr.bf16.mxu1 %v6535_v11 }
 0x259   : > { %5271 = vmatmul.mubr.msk.f32.vlgmr.msra.gmra.mrb[12].mxu0 %vm856_vm2, %v7101_v47 }
 0x25a   : > { %5260 = vmatmul.mubr.msk.f32.vlgmr.msra.gmra.mrb[4].mxu1 %vm856_vm2, %v7101_v47  ;;  %5636 = vmatpush3.bf16.xpose.msk.msra.mxu0 %vm7049_vm3, %v5634_v14 }
 0x25b   : > { %5628 = vmatpush3.bf16.xpose.msk.msra.mxu1 %vm7049_vm3, %v5626_v18  ;;  %5637 = vmatprep.subr.bf16.mxu0 %v6535_v11 }
 0x25c   : > { %5629 = vmatprep.subr.bf16.mxu1 %v6535_v11  ;;  %5292 = vmatprep.mubr.msk.f32.mxu0 %vm6536_vm1, %v6537_v12 }
 0x25d   : > { %5281 = vmatprep.mubr.msk.f32.mxu1 %vm6536_vm1, %v6537_v12 }
 0x262   : > { %5640 = vmatpush3.bf16.xpose.msk.msra.mxu0 %vm7049_vm3, %v5638_v25 }
 0x263   : > { %5632 = vmatpush3.bf16.xpose.msk.msra.mxu1 %vm7049_vm3, %v5630_v26  ;;  %5642 = vmatprep.subr.bf16.mxu0 %v5641_v60 }
 0x264   : > { %5655 = vmatprep.subr.bf16.mxu1 %v6535_v11 }
 0x269   : > { %5293 = vmatmul.mubr.msk.f32.vlgmr.msra.gmra.mrb[14].mxu0 %vm856_vm2, %v7101_v47 }
 0x26a   : > { %5282 = vmatmul.mubr.msk.f32.vlgmr.msra.gmra.mrb[6].mxu1 %vm856_vm2, %v7101_v47  ;;  %5644 = vmatpush3.bf16.msra.mxu0 %v5641_v60 }
 0x26b   : > { %5328 = vmatprep.mubr.msk.f32.mxu1 %vm6536_vm1, %v6537_v12  ;;  %5646 = vmatprep.subr.bf16.mxu0 %v5645_v7 }
 0x26e   : > { %5648 = vmatpush3.bf16.msra.mxu0 %v5645_v7 }
 0x26f   : > { %5649 = vmatprep.subr.bf16.mxu0 %v6535_v11 }
 0x30c   : > { %v1020_v27 = vpop.f32.mrb[8].mxu0 }
 0x30d   : > { %v938_v28 = vpop.f32.mrb[0].mxu1  ;;  %v5228_v31 = vpop.f32.mrb[9].mxu0  ;;  %v1517_v34 = vmul.f32 0.17677669, %v1020_v27 }
 0x30e   : > { %v1516_v32 = vmul.f32 0.17677669, %v938_v28  ;;  %v5217_v33 = vpop.f32.mrb[1].mxu1 }
 0x30f   : > { %v1528_v36 = vsel %vm1524_vm4, %v1517_v34, -inf }
 0x310   : > { %v1525_v35 = vsel %vm1524_vm4, %v1516_v32, -inf }
 0x311   : > { %1526 = vmax.xlane.f32.xlu0 %v1525_v35 }
 0x315   : > { %1529 = vmax.xlane.f32.xlu0 %v1528_v36 }
 0x31c   : > { %v1184_v39 = vpop.f32.mrb[10].mxu0 }
 0x31d   : > { %v1102_v40 = vpop.f32.mrb[2].mxu1  ;;  %v5250_v41 = vpop.f32.mrb[11].mxu0  ;;  %v1519_v44 = vmul.f32 0.17677669, %v1184_v39 }
 0x31e   : > { %v1518_v42 = vmul.f32 0.17677669, %v1102_v40  ;;  %v5239_v43 = vpop.f32.mrb[3].mxu1 }
 0x31f   : > { %v1534_v46 = vsel %vm1524_vm4, %v1519_v44, -inf }
 0x320   : > { %v1531_v45 = vsel %vm1524_vm4, %v1518_v42, -inf }
 0x321   : > { %1532 = vmax.xlane.f32.xlu1 %v1531_v45 }
 0x325   : > { %1535 = vmax.xlane.f32.xlu1 %v1534_v46 }
 0x32c   : > { %v1348_v48 = vpop.f32.mrb[12].mxu0 }
 0x32d   : > { %v1521_v49 = vmul.f32 0.17677669, %v1348_v48  ;;  %v1266_v50 = vpop.f32.mrb[4].mxu1  ;;  %v5272_v51 = vpop.f32.mrb[13].mxu0 }
 0x32e   : > { %v1520_v52 = vmul.f32 0.17677669, %v1266_v50  ;;  %v5261_v53 = vpop.f32.mrb[5].mxu1 }
 0x32f   : > { %v1540_v56 = vsel %vm1524_vm4, %v1521_v49, -inf }
 0x330   : > { %1541 = vmax.xlane.f32.xlu1 %v1540_v56  ;;  %v1537_v57 = vsel %vm1524_vm4, %v1520_v52, -inf }
 0x331   : > { %1538 = vmax.xlane.f32.xlu0 %v1537_v57 }
 0x33c   : > { %v1512_v61 = vpop.f32.mrb[14].mxu0 }
 0x33d   : > { %v1523_v62 = vmul.f32 0.17677669, %v1512_v61  ;;  %v1430_v63 = vpop.f32.mrb[6].mxu1  ;;  %v5294_v0 = vpop.f32.mrb[15].mxu0 }
 0x33e   : > { %v1522_v3 = vmul.f32 0.17677669, %v1430_v63  ;;  %v5283_v6 = vpop.f32.mrb[7].mxu1 }
 0x33f   : > { %v1546_v8 = vsel %vm1524_vm4, %v1523_v62, -inf }
 0x340   : > { %1547 = vmax.xlane.f32.xlu1 %v1546_v8  ;;  %v1543_v9 = vsel %vm1524_vm4, %v1522_v3, -inf }
 0x341   : > { %1544 = vmax.xlane.f32.xlu0 %v1543_v9 }
 0x351   : > { %814 = vrot.lane.b32.xlu1 %v7035_v16, %s6538_s24 }
 0x355   : > { %816 = vrot.lane.b32.xlu1 %v7060_v29, %s6538_s24 }
 0x357   : > { %812 = vrot.lane.b32.xlu0 %v7030_v15, %s6538_s24 }
 0x359   : > { %818 = vrot.lane.b32.xlu1 %v7065_v30, %s6538_s24 }
 0x39e   : > { %v1527_v10 = vpop.xlane.xlu0 %1526 }
 0x39f   : > { %v1549_v13 = vsub.f32 %v1516_v32, %v1527_v10 }
 0x3a1   : > { %v1557_v14 = vmul.f32 1.442695, %v1549_v13 }
 0x3a2   : > { %v1530_v18 = vpop.xlane.xlu0 %1529 }
 0x3a3   : > { %v1550_v20 = vsub.f32 %v1517_v34, %v1530_v18  ;;  %6056 = vpow2.f32 %v1557_v14 }
 0x3a5   : > { %v1559_v21 = vmul.f32 1.442695, %v1550_v20 }
 0x3a7   : > { %6058 = vpow2.f32 %v1559_v21 }
 0x3ad   : > { %v7237_v16 = vpop.eup %6056 }
 0x3ae   : > { %v1533_v23 = vpop.xlane.xlu1 %1532 }
 0x3af   : > { %v1551_v24 = vsub.f32 %v1518_v42, %v1533_v23 }
 0x3b1   : > { %v7239_v25 = vpop.eup %6058  ;;  %v1561_v29 = vmul.f32 1.442695, %v1551_v24 }
 0x3b2   : > { %v1536_v26 = vpop.xlane.xlu1 %1535  ;;  %v1585_v15 = vcombine.low %v7237_v16, %v7239_v25 }
 0x3b3   : > { %v1552_v30 = vsub.f32 %v1519_v44, %v1536_v26  ;;  %6060 = vpow2.f32 %v1561_v29 }
 0x3b4   : > { %5303 = vmatprep.mubr.msk.f32.mxu0 %vm856_vm2, %v1585_v15 }
 0x3b5   : > { %v1563_v27 = vmul.f32 1.442695, %v1552_v30 }
 0x3b7   : > { %6062 = vpow2.f32 %v1563_v27 }
 0x3bd   : > { %v1542_v28 = vpop.xlane.xlu1 %1541  ;;  %v7244_v34 = vpop.eup %6060 }
 0x3be   : > { %v1554_v31 = vsub.f32 %v1521_v49, %v1542_v28  ;;  %v1539_v32 = vpop.xlane.xlu0 %1538 }
 0x3bf   : > { %v1553_v33 = vsub.f32 %v1520_v52, %v1539_v32 }
 0x3c0   : > { %v1567_v35 = vmul.f32 1.442695, %v1554_v31 }
 0x3c1   : > { %v7246_v36 = vpop.eup %6062  ;;  %v1565_v39 = vmul.f32 1.442695, %v1553_v33 }
 0x3c2   : > { %6064 = vpow2.f32 %v1567_v35  ;;  %v1586_v40 = vcombine.low %v7244_v34, %v7246_v36 }
 0x3c3   : > { %6066 = vpow2.f32 %v1565_v39 }
 0x3c4   : > { %5304 = vmatmul.mubr.msk.f32.vlgmr.msra.gmra.mrb[16].mxu0 %vm856_vm2, %v1586_v40 }
 0x3cc   : > { %v7251_v41 = vpop.eup %6064 }
 0x3cd   : > { %v7253_v42 = vpop.eup %6066  ;;  %v1548_v43 = vpop.xlane.xlu1 %1547 }
 0x3ce   : > { %v1556_v44 = vsub.f32 %v1523_v62, %v1548_v43  ;;  %v1545_v45 = vpop.xlane.xlu0 %1544  ;;  %v1587_v46 = vcombine.low %v7253_v42, %v7251_v41 }
 0x3cf   : > { %v1555_v48 = vsub.f32 %v1522_v3, %v1545_v45 }
 0x3d0   : > { %v1571_v49 = vmul.f32 1.442695, %v1556_v44  ;;  %5306 = vmatprep.mubr.msk.f32.mxu0 %vm856_vm2, %v1587_v46 }
 0x3d1   : > { %v1569_v50 = vmul.f32 1.442695, %v1555_v48  ;;  %v815_v51 = vpop.permute.xlu1 %814 }
 0x3d2   : > { %6068 = vpow2.f32 %v1571_v49  ;;  %v813_v52 = vpop.permute.xlu0 %812  ;;  %v829_v53 = vmul.f32 %v815_v51, %v7038_v17  ;;  %v825_v56 = vmul.f32 %v815_v51, %v7041_v19  ;;  %v837_v6 = vmul.f32 %v815_v51, %v7082_v37 }
 0x3d3   : > { %6070 = vpow2.f32 %v1569_v50  ;;  %v828_v57 = vmul.f32 %v813_v52, %v7038_v17  ;;  %v824_v58 = vmul.f32 %v813_v52, %v7041_v19  ;;  %v836_v3 = vmul.f32 %v813_v52, %v7082_v37 }
 0x3d4   : > { %v832_v10 = vmul.f32 %v813_v52, %v7085_v38  ;;  %v833_v13 = vmul.f32 %v815_v51, %v7085_v38  ;;  %v844_v15 = vmul.f32 %v813_v52, %v7126_v54  ;;  %v845_v30 = vmul.f32 %v815_v51, %v7126_v54 }
 0x3d5   : > { %v7262_v59 = vpop.permute.xlu1 %816  ;;  %v5941_v60 = vpack.i.bf16 %v829_v53, %v828_v57  ;;  %v5936_v61 = vpack.i.bf16 %v825_v56, %v824_v58  ;;  %v5961_v20 = vpack.i.bf16 %v837_v6, %v836_v3  ;;  %v840_v31 = vmul.f32 %v813_v52, %v7129_v55 }
 0x3d6   : > { %v830_v63 = vmul.f32 %v7262_v59, %v7038_v17  ;;  %v826_v1 = vmul.f32 %v7262_v59, %v7041_v19  ;;  %v5956_v21 = vpack.i.bf16 %v833_v13, %v832_v10  ;;  %v838_v29 = vmul.f32 %v7262_v59, %v7082_v37 }
 0x3d7   : > { %5942 = vrot.lane.b32.xlu1 %v5941_v60, %s6539_s28  ;;  %5937 = vrot.lane.b32.xlu0 %v5936_v61, %s6539_s28  ;;  %v834_v26 = vmul.f32 %v7262_v59, %v7085_v38  ;;  %v841_v32 = vmul.f32 %v815_v51, %v7129_v55  ;;  %v5981_v33 = vpack.i.bf16 %v845_v30, %v844_v15 }
 0x3d8   : > { %v846_v43 = vmul.f32 %v7262_v59, %v7126_v54  ;;  %v842_v44 = vmul.f32 %v7262_v59, %v7129_v55  ;;  %v852_v45 = vmul.f32 %v813_v52, %v7168_v4  ;;  %v853_v46 = vmul.f32 %v815_v51, %v7168_v4 }
 0x3d9   : > { %v819_v62 = vpop.permute.xlu1 %818  ;;  %v5976_v35 = vpack.i.bf16 %v841_v32, %v840_v31  ;;  %v848_v50 = vmul.f32 %v813_v52, %v7171_v5  ;;  %v849_v53 = vmul.f32 %v815_v51, %v7171_v5  ;;  %v854_v61 = vmul.f32 %v7262_v59, %v7168_v4 }
 0x3da   : > { %v831_v0 = vmul.f32 %v819_v62, %v7038_v17  ;;  %v827_v2 = vmul.f32 %v819_v62, %v7041_v19  ;;  %v839_v23 = vmul.f32 %v819_v62, %v7082_v37  ;;  %v835_v24 = vmul.f32 %v819_v62, %v7085_v38 }
 0x3db   : > { %v847_v39 = vmul.f32 %v819_v62, %v7126_v54  ;;  %v843_v40 = vmul.f32 %v819_v62, %v7129_v55  ;;  %v6001_v56 = vpack.i.bf16 %v853_v46, %v852_v45  ;;  %v5996_v57 = vpack.i.bf16 %v849_v53, %v848_v50 }
 0x3dc   : > { %v7274_v7 = vpop.eup %6068  ;;  %v5951_v8 = vpack.i.bf16 %v831_v0, %v830_v63  ;;  %v5946_v9 = vpack.i.bf16 %v827_v2, %v826_v1  ;;  %v5971_v27 = vpack.i.bf16 %v839_v23, %v838_v29  ;;  %v5966_v28 = vpack.i.bf16 %v835_v24, %v834_v26 }
 0x3dd   : > { %v7278_v14 = vpop.eup %6070  ;;  %v5991_v48 = vpack.i.bf16 %v847_v39, %v846_v43  ;;  %v5986_v49 = vpack.i.bf16 %v843_v40, %v842_v44  ;;  %v855_v58 = vmul.f32 %v819_v62, %v7168_v4  ;;  %v851_v60 = vmul.f32 %v819_v62, %v7171_v5 }
 0x3de   : > { %5952 = vrot.lane.b32.xlu1 %v5951_v8, %s6539_s28  ;;  %5947 = vrot.lane.b32.xlu0 %v5946_v9, %s6539_s28  ;;  %v1588_v18 = vcombine.low %v7278_v14, %v7274_v7  ;;  %v850_v51 = vmul.f32 %v7262_v59, %v7171_v5 }
 0x3df   : > { %v6011_v52 = vpack.i.bf16 %v855_v58, %v854_v61 }
 0x3e0   : > { %5307 = vmatmul.mubr.msk.f32.gmra.mrb[18].mxu0 %vm856_vm2, %v1588_v18  ;;  %v6006_v63 = vpack.i.bf16 %v851_v60, %v850_v51 }
 0x3e1   : > { %5317 = vmatprep.mubr.msk.f32.mxu0 %vm6536_vm1, %v6537_v12 }
 0x3e2   : > { %5962 = vrot.lane.b32.xlu1 %v5961_v20, %s6539_s28  ;;  %5957 = vrot.lane.b32.xlu0 %v5956_v21, %s6539_s28 }
 0x3e6   : > { %5972 = vrot.lane.b32.xlu1 %v5971_v27, %s6539_s28  ;;  %5967 = vrot.lane.b32.xlu0 %v5966_v28, %s6539_s28 }
 0x3ea   : > { %5982 = vrot.lane.b32.xlu1 %v5981_v33, %s6539_s28  ;;  %5977 = vrot.lane.b32.xlu0 %v5976_v35, %s6539_s28 }
 0x3ee   : > { %5992 = vrot.lane.b32.xlu1 %v5991_v48, %s6539_s28  ;;  %5987 = vrot.lane.b32.xlu0 %v5986_v49, %s6539_s28 }
 0x3f2   : > { %6002 = vrot.lane.b32.xlu1 %v6001_v56, %s6539_s28  ;;  %5997 = vrot.lane.b32.xlu0 %v5996_v57, %s6539_s28 }
 0x3f6   : > { %6012 = vrot.lane.b32.xlu1 %v6011_v52, %s6539_s28  ;;  %6007 = vrot.lane.b32.xlu0 %v6006_v63, %s6539_s28 }
 0x3fa   : > { %2847 = vrot.lane.b32.xlu1 %v7038_v17, %s6540_s27  ;;  %2766 = vrot.lane.b32.xlu0 %v7041_v19, %s6540_s27 }
 0x3fe   : > { %3009 = vrot.lane.b32.xlu1 %v7082_v37, %s6540_s27  ;;  %2928 = vrot.lane.b32.xlu0 %v7085_v38, %s6540_s27 }
 0x402   : > { %3171 = vrot.lane.b32.xlu1 %v7126_v54, %s6540_s27  ;;  %3090 = vrot.lane.b32.xlu0 %v7129_v55, %s6540_s27 }
 0x406   : > { %3333 = vrot.lane.b32.xlu1 %v7168_v4, %s6540_s27  ;;  %3252 = vrot.lane.b32.xlu0 %v7171_v5, %s6540_s27 }
 0x449   : > { %v5943_v59 = vpop.permute.xlu1 %5942  ;;  %v5938_v62 = vpop.permute.xlu0 %5937 }
 0x44a   : > { %v5945_v0 = vunpack.i.h.bf16 %v5943_v59  ;;  %v5944_v1 = vunpack.i.l.bf16 %v5943_v59  ;;  %v5940_v2 = vunpack.i.h.bf16 %v5938_v62  ;;  %v5939_v3 = vunpack.i.l.bf16 %v5938_v62 }
 0x44c   : > { %v5656_v6 = vpack.c.bf16 %v5945_v0, %v5944_v1  ;;  %v5650_v8 = vpack.c.bf16 %v5940_v2, %v5939_v3 }
 0x44e   : > { %5651 = vmatpush3.bf16.msra.mxu0 %v5650_v8  ;;  %5657 = vmatpush3.bf16.msra.mxu1 %v5656_v6 }
 0x44f   : > { %5658 = vmatprep.subr.bf16.mxu1 %v6535_v11  ;;  %5652 = vmatprep.subr.bf16.mxu0 %v6535_v11 }
 0x450   : > { %v5953_v9 = vpop.permute.xlu1 %5952  ;;  %v5948_v10 = vpop.permute.xlu0 %5947 }
 0x451   : > { %v5955_v13 = vunpack.i.h.bf16 %v5953_v9  ;;  %v5954_v18 = vunpack.i.l.bf16 %v5953_v9  ;;  %v5950_v20 = vunpack.i.h.bf16 %v5948_v10  ;;  %v5949_v21 = vunpack.i.l.bf16 %v5948_v10 }
 0x453   : > { %v5659_v23 = vpack.c.bf16 %v5955_v13, %v5954_v18  ;;  %v5653_v24 = vpack.c.bf16 %v5950_v20, %v5949_v21 }
 0x454   : > { %v5958_v26 = vpop.permute.xlu0 %5957  ;;  %v5963_v27 = vpop.permute.xlu1 %5962 }
 0x455   : > { %5654 = vmatpush3.bf16.msra.mxu0 %v5653_v24  ;;  %5660 = vmatpush3.bf16.msra.mxu1 %v5659_v23  ;;  %v5960_v33 = vunpack.i.h.bf16 %v5958_v26  ;;  %v5959_v35 = vunpack.i.l.bf16 %v5958_v26  ;;  %v5965_v40 = vunpack.i.h.bf16 %v5963_v27  ;;  %v5964_v43 = vunpack.i.l.bf16 %v5963_v27 }
 0x456   : > { %5661 = vmatprep.subr.bf16.mxu0 %v6535_v11  ;;  %5667 = vmatprep.subr.bf16.mxu1 %v6535_v11 }
 0x457   : > { %v5662_v48 = vpack.c.bf16 %v5960_v33, %v5959_v35  ;;  %v5668_v57 = vpack.c.bf16 %v5965_v40, %v5964_v43 }
 0x458   : > { %v5968_v31 = vpop.permute.xlu0 %5967  ;;  %v5973_v32 = vpop.permute.xlu1 %5972 }
 0x459   : > { %v5970_v49 = vunpack.i.h.bf16 %v5968_v31  ;;  %v5969_v50 = vunpack.i.l.bf16 %v5968_v31  ;;  %v5975_v58 = vunpack.i.h.bf16 %v5973_v32  ;;  %v5974_v60 = vunpack.i.l.bf16 %v5973_v32 }
 0x45b   : > { %v5665_v61 = vpack.c.bf16 %v5970_v49, %v5969_v50  ;;  %v5671_v59 = vpack.c.bf16 %v5975_v58, %v5974_v60  ;;  %v2430_v58 = vld [vmem:[#allocation8] sm:$0xff]  ;;  %v2431_v60 = vld [vmem:[#allocation8 + $0x8] sm:$0xff] }
 0x45c   : > { %v5978_v44 = vpop.permute.xlu0 %5977  ;;  %v5983_v53 = vpop.permute.xlu1 %5982 }
 0x45d   : > { %v5980_v51 = vunpack.i.h.bf16 %v5978_v44  ;;  %v5979_v52 = vunpack.i.l.bf16 %v5978_v44  ;;  %v5985_v62 = vunpack.i.h.bf16 %v5983_v53  ;;  %v5984_v0 = vunpack.i.l.bf16 %v5983_v53 }
 0x45f   : > { %v5674_v3 = vpack.c.bf16 %v5980_v51, %v5979_v52  ;;  %v5680_v10 = vpack.c.bf16 %v5985_v62, %v5984_v0  ;;  %v2433_v51 = vld [vmem:[#allocation8 + $0x18] sm:$0xff] }
 0x460   : > { %v5993_v1 = vpop.permute.xlu1 %5992 }
 0x461   : > { %v5995_v13 = vunpack.i.h.bf16 %v5993_v1  ;;  %v5994_v18 = vunpack.i.l.bf16 %v5993_v1 }
 0x464   : > { %v6003_v26 = vpop.permute.xlu1 %6002 }
 0x465   : > { %v6005_v31 = vunpack.i.h.bf16 %v6003_v26  ;;  %v6004_v32 = vunpack.i.l.bf16 %v6003_v26 }
 0x468   : > { %v6013_v33 = vpop.permute.xlu1 %6012 }
 0x469   : > { %v6014_v49 = vunpack.i.l.bf16 %v6013_v33 }
 0x497   : > { %v5305_v29 = vpop.f32.mrb[16].mxu0 }
 0x498   : > { %v1663_v15 = vpop.f32.mrb[17].mxu0  ;;  %v1687_v28 = vcombine.high %v5305_v29, %v5305_v29 }
 0x499   : > { %v1686_v30 = vcombine.high %v1663_v15, %v1663_v15  ;;  %6072 = vrcp.f32 %v1663_v15 }
 0x49b   : > { %6074 = vrcp.f32 %v1686_v30 }
 0x49c   : > { %6076 = vrcp.f32 %v5305_v29 }
 0x49d   : > { %6078 = vrcp.f32 %v1687_v28 }
 0x4a3   : > { %v6073_v39 = vpop.eup %6072 }
 0x4a4   : > { %v1702_v45 = vmul.f32 %v6073_v39, %v7237_v16 }
 0x4a5   : > { %v6075_v46 = vpop.eup %6074 }
 0x4a6   : > { %5318 = vmatmul.mubr.msk.f32.vlgmr.msra.gmra.mrb[20].mxu0 %vm856_vm2, %v1702_v45  ;;  %v1703_v56 = vmul.f32 %v6075_v46, %v7239_v25  ;;  %v6077_v16 = vpop.eup %6076  ;;  %v5988_v25 = vpop.permute.xlu0 %5987  ;;  %v5692_v46 = vpack.c.bf16 %v6005_v31, %v6004_v32  ;;  %v2570_v31 = vld [vmem:[#allocation11] sm:$0xff]  ;;  %v2571_v32 = vld [vmem:[#allocation11 + $0x8] sm:$0xff] }
 0x4a7   : > { %5663 = vmatpush3.bf16.msra.mxu0 %v5662_v48  ;;  %5339 = vmatprep.mubr.msk.f32.mxu0 %vm6536_vm1, %v6537_v12  ;;  %v6079_v63 = vpop.eup %6078  ;;  %v1704_v2 = vmul.f32 %v6077_v16, %v7244_v34  ;;  %v5990_v6 = vunpack.i.h.bf16 %v5988_v25  ;;  %v5989_v8 = vunpack.i.l.bf16 %v5988_v25  ;;  %v6015_v48 = vunpack.i.h.bf16 %v6013_v33 }
 0x4a8   : > { %5329 = vmatmul.mubr.msk.f32.vlgmr.msra.gmra.mrb[8].mxu1 %vm856_vm2, %v1703_v56  ;;  %5664 = vmatprep.subr.bf16.mxu0 %v6535_v11  ;;  %v1705_v9 = vmul.f32 %v6079_v63, %v7246_v36  ;;  %v5683_v36 = vpack.c.bf16 %v5995_v13, %v5994_v18  ;;  %v5697_v16 = vpack.c.bf16 %v2431_v60, %v2430_v58 }
 0x4a9   : > { %5669 = vmatpush3.bf16.msra.mxu1 %v5668_v57  ;;  %5350 = vmatprep.mubr.msk.f32.mxu1 %vm6536_vm1, %v6537_v12  ;;  %v5677_v34 = vpack.c.bf16 %v5990_v6, %v5989_v8  ;;  %v5695_v53 = vpack.c.bf16 %v6015_v48, %v6014_v49  ;;  %v5705_v33 = vpack.c.bf16 %v2571_v32, %v2570_v31 }
 0x4aa   : > { %5670 = vmatprep.subr.bf16.mxu1 %v6535_v11  ;;  %v5998_v24 = vpop.permute.xlu0 %5997 }
 0x4ab   : > { %5666 = vmatpush3.bf16.msra.mxu0 %v5665_v61  ;;  %v6000_v15 = vunpack.i.h.bf16 %v5998_v24  ;;  %v5999_v30 = vunpack.i.l.bf16 %v5998_v24  ;;  %v2432_v61 = vld [vmem:[#allocation8 + $0x10] sm:$0xff] }
 0x4ac   : > { %5673 = vmatprep.subr.bf16.mxu0 %v6535_v11  ;;  %v5701_v52 = vpack.c.bf16 %v2433_v51, %v2432_v61 }
 0x4ad   : > { %5672 = vmatpush3.bf16.msra.mxu1 %v5671_v59  ;;  %v5686_v40 = vpack.c.bf16 %v6000_v15, %v5999_v30 }
 0x4ae   : > { %5340 = vmatmul.mubr.msk.f32.vlgmr.msra.gmra.mrb[22].mxu0 %vm856_vm2, %v1704_v2  ;;  %5679 = vmatprep.subr.bf16.mxu1 %v6535_v11  ;;  %v6008_v27 = vpop.permute.xlu0 %6007 }
 0x4af   : > { %5675 = vmatpush3.bf16.msra.mxu0 %v5674_v3  ;;  %5361 = vmatprep.mubr.msk.f32.mxu0 %vm6536_vm1, %v6537_v12  ;;  %v6010_v43 = vunpack.i.h.bf16 %v6008_v27  ;;  %v6009_v44 = vunpack.i.l.bf16 %v6008_v27 }
 0x4b0   : > { %5351 = vmatmul.mubr.msk.f32.vlgmr.msra.gmra.mrb[10].mxu1 %vm856_vm2, %v1705_v9  ;;  %5676 = vmatprep.subr.bf16.mxu0 %v6535_v11 }
 0x4b1   : > { %5681 = vmatpush3.bf16.msra.mxu1 %v5680_v10  ;;  %5372 = vmatprep.mubr.msk.f32.mxu1 %vm6536_vm1, %v6537_v12  ;;  %v5689_v50 = vpack.c.bf16 %v6010_v43, %v6009_v44 }
 0x4b2   : > { %5682 = vmatprep.subr.bf16.mxu1 %v6535_v11 }
 0x4b3   : > { %5678 = vmatpush3.bf16.msra.mxu0 %v5677_v34  ;;  %v5308_v20 = vpop.f32.mrb[18].mxu0 }
 0x4b4   : > { %v1673_v21 = vpop.f32.mrb[19].mxu0  ;;  %5685 = vmatprep.subr.bf16.mxu0 %v6535_v11  ;;  %v1689_v29 = vcombine.high %v5308_v20, %v5308_v20 }
 0x4b5   : > { %v1688_v23 = vcombine.high %v1673_v21, %v1673_v21  ;;  %6080 = vrcp.f32 %v1673_v21  ;;  %5684 = vmatpush3.bf16.msra.mxu1 %v5683_v36 }
 0x4b6   : > { %5691 = vmatprep.subr.bf16.mxu1 %v6535_v11 }
 0x4b7   : > { %6082 = vrcp.f32 %v1688_v23 }
 0x4b8   : > { %6084 = vrcp.f32 %v5308_v20 }
 0x4b9   : > { %6086 = vrcp.f32 %v1689_v29 }
 0x4bf   : > { %v6081_v28 = vpop.eup %6080 }
 0x4c0   : > { %v1706_v35 = vmul.f32 %v6081_v28, %v7253_v42 }
 0x4c1   : > { %v6083_v39 = vpop.eup %6082 }
 0x4c2   : > { %5362 = vmatmul.mubr.msk.f32.vlgmr.msra.gmra.mrb[24].mxu0 %vm856_vm2, %v1706_v35  ;;  %v1707_v45 = vmul.f32 %v6083_v39, %v7251_v41  ;;  %v6085_v42 = vpop.eup %6084  ;;  %v2572_v35 = vld [vmem:[#allocation11 + $0x10] sm:$0xff]  ;;  %v2573_v39 = vld [vmem:[#allocation11 + $0x18] sm:$0xff] }
 0x4c3   : > { %5687 = vmatpush3.bf16.msra.mxu0 %v5686_v40  ;;  %5383 = vmatprep.mubr.msk.f32.mxu0 %vm6536_vm1, %v6537_v12  ;;  %v6087_v41 = vpop.eup %6086  ;;  %v1708_v56 = vmul.f32 %v6085_v42, %v7278_v14  ;;  %v5709_v40 = vpack.c.bf16 %v2573_v39, %v2572_v35 }
 0x4c4   : > { %5373 = vmatmul.mubr.msk.f32.vlgmr.msra.gmra.mrb[12].mxu1 %vm856_vm2, %v1707_v45  ;;  %5688 = vmatprep.subr.bf16.mxu0 %v6535_v11  ;;  %v1709_v57 = vmul.f32 %v6087_v41, %v7274_v7 }
 0x4c5   : > { %5693 = vmatpush3.bf16.msra.mxu1 %v5692_v46  ;;  %5394 = vmatprep.mubr.msk.f32.mxu1 %vm6536_vm1, %v6537_v12 }
 0x4c6   : > { %5694 = vmatprep.subr.bf16.mxu1 %v6535_v11 }
 0x4c7   : > { %5690 = vmatpush3.bf16.msra.mxu0 %v5689_v50 }
 0x4c8   : > { %5698 = vmatprep.subr.bf16.mxu0 %v5697_v16 }
 0x4c9   : > { %5696 = vmatpush3.bf16.msra.mxu1 %v5695_v53 }
 0x4ca   : > { %5384 = vmatmul.mubr.msk.f32.vlgmr.msra.gmra.mrb[26].mxu0 %vm856_vm2, %v1708_v56  ;;  %5706 = vmatprep.subr.bf16.mxu1 %v5705_v33 }
 0x4cb   : > { %5700 = vmatpush3.bf16.msra.mxu0 %v5697_v16 }
 0x4cc   : > { %5395 = vmatmul.mubr.msk.f32.vlgmr.msra.gmra.mrb[14].mxu1 %vm856_vm2, %v1709_v57  ;;  %5702 = vmatprep.subr.bf16.mxu0 %v5701_v52 }
 0x4cd   : > { %5708 = vmatpush3.bf16.msra.mxu1 %v5705_v33 }
 0x4ce   : > { %5710 = vmatprep.subr.bf16.mxu1 %v5709_v40 }
 0x4cf   : > { %5704 = vmatpush3.bf16.msra.mxu0 %v5701_v52 }
 0x4d0   : > { %5713 = vmatprep.subr.bf16.mxu0 %v6535_v11 }
 0x4d1   : > { %5712 = vmatpush3.bf16.msra.mxu1 %v5709_v40  ;;  %v2848_v40 = vpop.permute.xlu1 %2847 }
 0x4d2   : > { %5717 = vmatprep.subr.bf16.mxu1 %v6535_v11 }
 0x579   : > { %v1795_v14 = vpop.f32.mrb[20].mxu0 }
 0x57a   : > { %v5319_v25 = vpop.f32.mrb[21].mxu0  ;;  %v2422_v59 = vadd.f32 %v1795_v14, %v7101_v47 }
 0x57b   : > { %v1884_v63 = vpop.f32.mrb[8].mxu1 }
 0x57c   : > { %v2423_v7 = vadd.f32 %v1884_v63, %v7101_v47  ;;  %v5330_v62 = vpop.f32.mrb[9].mxu1 }
 0x57e   : > { %v2449_v0 = vcombine.low %v2422_v59, %v2423_v7 }
 0x580   : > { %5405 = vmatprep.mubr.msk.f32.mxu0 %vm856_vm2, %v2449_v0 }
 0x581   : > { %v1973_v1 = vpop.f32.mrb[22].mxu0 }
 0x582   : > { %v5341_v2 = vpop.f32.mrb[23].mxu0  ;;  %v2424_v6 = vadd.f32 %v1973_v1, %v7101_v47 }
 0x583   : > { %v2062_v3 = vpop.f32.mrb[10].mxu1 }
 0x584   : > { %v2425_v8 = vadd.f32 %v2062_v3, %v7101_v47  ;;  %v5352_v9 = vpop.f32.mrb[11].mxu1 }
 0x586   : > { %v2450_v10 = vcombine.low %v2424_v6, %v2425_v8 }
 0x588   : > { %5406 = vmatmul.mubr.msk.f32.vlgmr.msra.gmra.mrb[28].mxu0 %vm856_vm2, %v2450_v10 }
 0x595   : > { %v2151_v13 = vpop.f32.mrb[24].mxu0 }
 0x596   : > { %v5363_v18 = vpop.f32.mrb[25].mxu0  ;;  %v2426_v36 = vadd.f32 %v2151_v13, %v7101_v47 }
 0x597   : > { %v2240_v34 = vpop.f32.mrb[12].mxu1  ;;  %v7405_v18 = vld [vmem:[#allocation19] sm:$0xff] }
 0x598   : > { %v2427_v20 = vadd.f32 %v2240_v34, %v7101_v47  ;;  %v5374_v21 = vpop.f32.mrb[13].mxu1  ;;  %v7407_v34 = vld [vmem:[#allocation19 + $0x8] sm:$0xff] }
 0x59a   : > { %v2451_v23 = vcombine.low %v2426_v36, %v2427_v20 }
 0x59c   : > { %5408 = vmatprep.mubr.msk.f32.mxu0 %vm856_vm2, %v2451_v23 }
 0x59d   : > { %v2329_v24 = vpop.f32.mrb[26].mxu0 }
 0x59e   : > { %v5385_v29 = vpop.f32.mrb[27].mxu0  ;;  %v2428_v15 = vadd.f32 %v2329_v24, %v7101_v47 }
 0x59f   : > { %v2418_v26 = vpop.f32.mrb[14].mxu1 }
 0x5a0   : > { %v2429_v30 = vadd.f32 %v2418_v26, %v7101_v47  ;;  %v5396_v27 = vpop.f32.mrb[15].mxu1  ;;  %v4937_v47 = vld [vmem:[#allocation10] ss:$0 sm:$0xff] }
 0x5a2   : > { %v2452_v28 = vcombine.low %v2428_v15, %v2429_v30 }
 0x5a4   : > { %5409 = vmatmul.mubr.msk.f32.gmra.mrb[30].mxu0 %vm856_vm2, %v2452_v28 }
 0x5a5   : > { %5429 = vmatprep.mubr.msk.f32.mxu0 %vm6536_vm1, %v6537_v12 }
 0x65b   : > { %v5407_v43 = vpop.f32.mrb[28].mxu0 }
 0x65c   : > { %v2533_v44 = vadd.f32 %v5407_v43, %v4937_v47  ;;  %v2527_v45 = vpop.f32.mrb[29].mxu0 }
 0x65d   : > { %v2528_v46 = vadd.f32 %v4937_v47, %v2527_v45  ;;  %v3010_v45 = vpop.permute.xlu1 %3009 }
 0x65e   : > { %v2547_v48 = vmax.f32 %v2533_v44, 0.0 }
 0x65f   : > { %v2546_v49 = vmax.f32 %v2528_v46, 0.0 }
 0x660   : > { %v2555_v42 = vcombine.high %v2547_v48, %v2547_v48  ;;  %v2564_v57 = vadd.f32 %v2547_v48, %v2424_v6  ;;  %v4942_v6 = vld [vmem:[#allocation13] ss:$0 sm:$0xff] }
 0x661   : > { %v2554_v50 = vcombine.high %v2546_v49, %v2546_v49  ;;  %v2562_v53 = vadd.f32 %v2546_v49, %v2422_v59 }
 0x662   : > { %v2565_v41 = vadd.f32 %v2555_v42, %v2425_v8 }
 0x663   : > { %v2563_v56 = vadd.f32 %v2554_v50, %v2423_v7 }
 0x664   : > { %v2590_v60 = vcombine.low %v2564_v57, %v2565_v41 }
 0x665   : > { %v2589_v58 = vcombine.low %v2562_v53, %v2563_v56 }
 0x667   : > { %5419 = vmatprep.mubr.msk.f32.mxu1 %vm856_vm2, %v2589_v58 }
 0x668   : > { %5420 = vmatmul.mubr.msk.f32.vlgmr.msra.gmra.mrb[16].mxu1 %vm856_vm2, %v2590_v60 }
 0x677   : > { %v5410_v16 = vpop.f32.mrb[30].mxu0 }
 0x678   : > { %v2543_v61 = vadd.f32 %v5410_v16, %v4937_v47  ;;  %v2537_v51 = vpop.f32.mrb[31].mxu0 }
 0x679   : > { %v2538_v52 = vadd.f32 %v4937_v47, %v2537_v51  ;;  %v2767_v47 = vpop.permute.xlu0 %2766 }
 0x67a   : > { %v2549_v14 = vmax.f32 %v2543_v61, 0.0 }
 0x67b   : > { %v2548_v25 = vmax.f32 %v2538_v52, 0.0 }
 0x67c   : > { %v2557_v63 = vcombine.high %v2549_v14, %v2549_v14  ;;  %v2568_v59 = vadd.f32 %v2549_v14, %v2428_v15 }
 0x67d   : > { %v2556_v62 = vcombine.high %v2548_v25, %v2548_v25  ;;  %v2566_v1 = vadd.f32 %v2548_v25, %v2426_v36  ;;  %v2929_v46 = vpop.permute.xlu0 %2928 }
 0x67e   : > { %v2569_v0 = vadd.f32 %v2557_v63, %v2429_v30 }
 0x67f   : > { %v2567_v2 = vadd.f32 %v2556_v62, %v2427_v20 }
 0x680   : > { %v2592_v3 = vcombine.low %v2568_v59, %v2569_v0 }
 0x681   : > { %v2591_v7 = vcombine.low %v2566_v1, %v2567_v2  ;;  %v3172_v2 = vpop.permute.xlu1 %3171  ;;  %v3091_v59 = vpop.permute.xlu0 %3090 }
 0x683   : > { %5422 = vmatprep.mubr.msk.f32.mxu1 %vm856_vm2, %v2591_v7 }
 0x684   : > { %5423 = vmatmul.mubr.msk.f32.gmra.mrb[18].mxu1 %vm856_vm2, %v2592_v3 }
 0x685   : > { %5436 = vmatprep.mubr.msk.f32.mxu1 %vm6536_vm1, %v6537_v12 }
 0x73b   : > { %v5421_v8 = vpop.f32.mrb[16].mxu1 }
 0x73c   : > { %v2667_v9 = vpop.f32.mrb[17].mxu1  ;;  %v2673_v10 = vadd.f32 %v5421_v8, %v4942_v6  ;;  %v3253_v8 = vpop.permute.xlu0 %3252 }
 0x73d   : > { %v2668_v13 = vadd.f32 %v4942_v6, %v2667_v9 }
 0x73e   : > { %v2702_v21 = vcombine.low %v2673_v10, %v2673_v10  ;;  %v7422_v30 = vcombine.high %v2673_v10, %v2673_v10 }
 0x73f   : > { %v7409_v36 = vcombine.high %v2668_v13, %v2668_v13  ;;  %v2700_v20 = vcombine.low %v2668_v13, %v2668_v13 }
 0x740   : > { %v7425_v31 = vsel %vm2716_vm5, %v2673_v10, %v2702_v21  ;;  %v2731_v35 = vmul.f32 %v7405_v18, %v7422_v30  ;;  %v2732_v39 = vmul.f32 %v7407_v34, %v7422_v30 }
 0x741   : > { %v7412_v23 = vsel %vm2716_vm5, %v2668_v13, %v2700_v20  ;;  %v2727_v24 = vmul.f32 %v7405_v18, %v7409_v36  ;;  %v2728_v15 = vmul.f32 %v7407_v34, %v7409_v36  ;;  %v2729_v32 = vmul.f32 %v7425_v31, %v7405_v18 }
 0x742   : > { %v2725_v29 = vmul.f32 %v7412_v23, %v7405_v18  ;;  %v2726_v26 = vmul.f32 %v7412_v23, %v7407_v34  ;;  %v2730_v33 = vmul.f32 %v7425_v31, %v7407_v34  ;;  %v5726_v44 = vpack.c.bf16 %v2732_v39, %v2731_v35 }
 0x743   : > { %v5718_v28 = vpack.c.bf16 %v2728_v15, %v2727_v24 }
 0x744   : > { %v5714_v27 = vpack.c.bf16 %v2726_v26, %v2725_v29  ;;  %v5722_v43 = vpack.c.bf16 %v2730_v33, %v2729_v32 }
 0x745   : > { %5720 = vmatpush3.bf16.xpose.msk.msra.mxu1 %vm7049_vm3, %v5718_v28 }
 0x746   : > { %5716 = vmatpush3.bf16.xpose.msk.msra.mxu0 %vm7049_vm3, %v5714_v27  ;;  %5725 = vmatprep.subr.bf16.mxu1 %v6535_v11 }
 0x747   : > { %5721 = vmatprep.subr.bf16.mxu0 %v6535_v11 }
 0x74c   : > { %5437 = vmatmul.mubr.msk.f32.vlgmr.msra.gmra.mrb[20].mxu1 %vm856_vm2, %v2848_v40 }
 0x74d   : > { %5430 = vmatmul.mubr.msk.f32.vlgmr.msra.gmra.mrb[32].mxu0 %vm856_vm2, %v2767_v47  ;;  %5728 = vmatpush3.bf16.xpose.msk.msra.mxu1 %vm7049_vm3, %v5726_v44 }
 0x74e   : > { %5724 = vmatpush3.bf16.xpose.msk.msra.mxu0 %vm7049_vm3, %v5722_v43  ;;  %5450 = vmatprep.mubr.msk.f32.mxu1 %vm6536_vm1, %v6537_v12 }
 0x74f   : > { %5443 = vmatprep.mubr.msk.f32.mxu0 %vm6536_vm1, %v6537_v12  ;;  %5733 = vmatprep.subr.bf16.mxu1 %v6535_v11 }
 0x750   : > { %5729 = vmatprep.subr.bf16.mxu0 %v6535_v11 }
 0x754   : > { %5451 = vmatmul.mubr.msk.f32.vlgmr.msra.gmra.mrb[22].mxu1 %vm856_vm2, %v3010_v45 }
 0x755   : > { %5444 = vmatmul.mubr.msk.f32.vlgmr.msra.gmra.mrb[34].mxu0 %vm856_vm2, %v2929_v46  ;;  %5464 = vmatprep.mubr.msk.f32.mxu1 %vm6536_vm1, %v6537_v12 }
 0x756   : > { %5457 = vmatprep.mubr.msk.f32.mxu0 %vm6536_vm1, %v6537_v12 }
 0x757   : > { %v5424_v48 = vpop.f32.mrb[18].mxu1 }
 0x758   : > { %v2677_v49 = vpop.f32.mrb[19].mxu1  ;;  %v2683_v42 = vadd.f32 %v5424_v48, %v4942_v6 }
 0x759   : > { %v2678_v50 = vadd.f32 %v4942_v6, %v2677_v49  ;;  %v3334_v6 = vpop.permute.xlu1 %3333 }
 0x75a   : > { %v2706_v56 = vcombine.low %v2683_v42, %v2683_v42  ;;  %v7472_v51 = vcombine.high %v2683_v42, %v2683_v42 }
 0x75b   : > { %v7459_v41 = vcombine.high %v2678_v50, %v2678_v50  ;;  %v2704_v53 = vcombine.low %v2678_v50, %v2678_v50 }
 0x75c   : > { %v7475_v25 = vsel %vm2716_vm5, %v2683_v42, %v2706_v56  ;;  %v2739_v0 = vmul.f32 %v7405_v18, %v7472_v51  ;;  %v2740_v1 = vmul.f32 %v7407_v34, %v7472_v51  ;;  %v3469_v42 = vld [vmem:[%s7900_s13] sm:$0xff] }
 0x75d   : > { %v7462_v57 = vsel %vm2716_vm5, %v2678_v50, %v2704_v53  ;;  %v2735_v58 = vmul.f32 %v7405_v18, %v7459_v41  ;;  %v2736_v61 = vmul.f32 %v7407_v34, %v7459_v41  ;;  %v2737_v63 = vmul.f32 %v7475_v25, %v7405_v18  ;;  %v3470_v50 = vld [vmem:[%s7900_s13 + $0x8] sm:$0xff] }
 0x75e   : > { %v2733_v60 = vmul.f32 %v7462_v57, %v7405_v18  ;;  %v2734_v16 = vmul.f32 %v7462_v57, %v7407_v34  ;;  %v2738_v62 = vmul.f32 %v7475_v25, %v7407_v34  ;;  %v5742_v3 = vpack.c.bf16 %v2740_v1, %v2739_v0 }
 0x75f   : > { %v5734_v14 = vpack.c.bf16 %v2736_v61, %v2735_v58  ;;  %v5745_v53 = vpack.c.bf16 %v3470_v50, %v3469_v42 }
 0x760   : > { %v5730_v52 = vpack.c.bf16 %v2734_v16, %v2733_v60  ;;  %v5738_v7 = vpack.c.bf16 %v2738_v62, %v2737_v63 }
 0x761   : > { %5736 = vmatpush3.bf16.xpose.msk.msra.mxu1 %vm7049_vm3, %v5734_v14 }
 0x762   : > { %5732 = vmatpush3.bf16.xpose.msk.msra.mxu0 %vm7049_vm3, %v5730_v52  ;;  %5741 = vmatprep.subr.bf16.mxu1 %v6535_v11 }
 0x763   : > { %5737 = vmatprep.subr.bf16.mxu0 %v6535_v11 }
 0x768   : > { %5465 = vmatmul.mubr.msk.f32.vlgmr.msra.gmra.mrb[24].mxu1 %vm856_vm2, %v3172_v2 }
 0x769   : > { %5458 = vmatmul.mubr.msk.f32.vlgmr.msra.gmra.mrb[36].mxu0 %vm856_vm2, %v3091_v59  ;;  %5744 = vmatpush3.bf16.xpose.msk.msra.mxu1 %vm7049_vm3, %v5742_v3 }
 0x76a   : > { %5740 = vmatpush3.bf16.xpose.msk.msra.mxu0 %vm7049_vm3, %v5738_v7  ;;  %5478 = vmatprep.mubr.msk.f32.mxu1 %vm6536_vm1, %v6537_v12 }
 0x76b   : > { %5471 = vmatprep.mubr.msk.f32.mxu0 %vm6536_vm1, %v6537_v12  ;;  %5749 = vmatprep.subr.bf16.mxu1 %v6535_v11 }
 0x76c   : > { %5746 = vmatprep.subr.bf16.mxu0 %v5745_v53 }
 0x770   : > { %5479 = vmatmul.mubr.msk.f32.vlgmr.msra.gmra.mrb[26].mxu1 %vm856_vm2, %v3334_v6 }
 0x771   : > { %5472 = vmatmul.mubr.msk.f32.vlgmr.msra.gmra.mrb[38].mxu0 %vm856_vm2, %v3253_v8  ;;  %5501 = vmatprep.mubr.msk.f32.mxu1 %vm6536_vm1, %v6537_v12 }
 0x772   : > { %5748 = vmatpush3.bf16.msra.mxu0 %v5745_v53 }
 0x773   : > { %5758 = vmatprep.subr.bf16.mxu0 %v6535_v11 }
 0x81f   : > { %v2923_v9 = vpop.f32.mrb[20].mxu1 }
 0x820   : > { %v2842_v22 = vpop.f32.mrb[32].mxu0  ;;  %v3414_v10 = vmul.f32 0.17677669, %v2923_v9  ;;  %v5438_v20 = vpop.f32.mrb[21].mxu1 }
 0x821   : > { %v3413_v13 = vmul.f32 0.17677669, %v2842_v22  ;;  %v5431_v21 = vpop.f32.mrb[33].mxu0 }
 0x822   : > { %v3424_v24 = vsel %vm641_vm0, %v3414_v10, -inf }
 0x823   : > { %v3421_v29 = vsel %vm641_vm0, %v3413_v13, -inf  ;;  %3425 = vmax.xlane.f32.xlu1 %v3424_v24 }
 0x824   : > { %3422 = vmax.xlane.f32.xlu0 %v3421_v29 }
 0x827   : > { %v3085_v26 = vpop.f32.mrb[22].mxu1 }
 0x828   : > { %v3004_v15 = vpop.f32.mrb[34].mxu0  ;;  %v3416_v27 = vmul.f32 0.17677669, %v3085_v26  ;;  %v5452_v28 = vpop.f32.mrb[23].mxu1 }
 0x829   : > { %v5445_v32 = vpop.f32.mrb[35].mxu0  ;;  %v3415_v33 = vmul.f32 0.17677669, %v3004_v15 }
 0x82a   : > { %v3430_v35 = vsel %vm641_vm0, %v3416_v27, -inf }
 0x82b   : > { %3431 = vmax.xlane.f32.xlu0 %v3430_v35  ;;  %v3427_v39 = vsel %vm641_vm0, %v3415_v33, -inf }
 0x82f   : > { %3428 = vmax.xlane.f32.xlu0 %v3427_v39 }
 0x83b   : > { %v3247_v40 = vpop.f32.mrb[24].mxu1 }
 0x83c   : > { %v3166_v47 = vpop.f32.mrb[36].mxu0  ;;  %v3418_v43 = vmul.f32 0.17677669, %v3247_v40  ;;  %v5466_v45 = vpop.f32.mrb[25].mxu1 }
 0x83d   : > { %v3417_v44 = vmul.f32 0.17677669, %v3166_v47  ;;  %v5459_v46 = vpop.f32.mrb[37].mxu0 }
 0x83e   : > { %v3436_v48 = vsel %vm641_vm0, %v3418_v43, -inf }
 0x83f   : > { %v3433_v49 = vsel %vm641_vm0, %v3417_v44, -inf  ;;  %3437 = vmax.xlane.f32.xlu1 %v3436_v48 }
 0x840   : > { %3434 = vmax.xlane.f32.xlu0 %v3433_v49 }
 0x843   : > { %v3409_v56 = vpop.f32.mrb[26].mxu1 }
 0x844   : > { %v3328_v58 = vpop.f32.mrb[38].mxu0  ;;  %v3420_v60 = vmul.f32 0.17677669, %v3409_v56  ;;  %v5480_v61 = vpop.f32.mrb[27].mxu1 }
 0x845   : > { %v3419_v16 = vmul.f32 0.17677669, %v3328_v58  ;;  %v5473_v52 = vpop.f32.mrb[39].mxu0 }
 0x846   : > { %v3442_v14 = vsel %vm641_vm0, %v3420_v60, -inf }
 0x847   : > { %v3439_v63 = vsel %vm641_vm0, %v3419_v16, -inf  ;;  %3443 = vmax.xlane.f32.xlu1 %v3442_v14 }
 0x848   : > { %3440 = vmax.xlane.f32.xlu0 %v3439_v63 }
 0x858   : > { %2745 = vrot.lane.b32.xlu1 %v7407_v34, %s6538_s24 }
 0x85e   : > { %2743 = vrot.lane.b32.xlu0 %v7405_v18, %s6538_s24 }
 0x8b0   : > { %v3426_v62 = vpop.xlane.xlu1 %3425 }
 0x8b1   : > { %v3423_v0 = vpop.xlane.xlu0 %3422  ;;  %v3446_v1 = vsub.f32 %v3414_v10, %v3426_v62 }
 0x8b2   : > { %v3445_v2 = vsub.f32 %v3413_v13, %v3423_v0 }
 0x8b3   : > { %v3455_v59 = vmul.f32 1.442695, %v3446_v1 }
 0x8b4   : > { %v3453_v7 = vmul.f32 1.442695, %v3445_v2 }
 0x8b6   : > { %6088 = vpow2.f32 %v3453_v7 }
 0x8b7   : > { %6090 = vpow2.f32 %v3455_v59 }
 0x8b8   : > { %v3432_v3 = vpop.xlane.xlu0 %3431 }
 0x8b9   : > { %v3448_v6 = vsub.f32 %v3416_v27, %v3432_v3 }
 0x8bb   : > { %v3459_v22 = vmul.f32 1.442695, %v3448_v6 }
 0x8bc   : > { %v3429_v8 = vpop.xlane.xlu0 %3428 }
 0x8bd   : > { %v3447_v9 = vsub.f32 %v3415_v33, %v3429_v8 }
 0x8bf   : > { %v3457_v20 = vmul.f32 1.442695, %v3447_v9 }
 0x8c0   : > { %v7525_v21 = vpop.eup %6088 }
 0x8c1   : > { %v7527_v34 = vpop.eup %6090  ;;  %6092 = vpow2.f32 %v3457_v20  ;;  %5485 = vmatprep.mubr.msk.f32.mxu0 %vm641_vm0, %v7525_v21 }
 0x8c2   : > { %6094 = vpow2.f32 %v3459_v22  ;;  %5486 = vmatmul.mubr.msk.f32.vlgmr.msra.gmra.mrb[40].mxu0 %vm641_vm0, %v7527_v34 }
 0x8cb   : > { %v7533_v18 = vpop.eup %6092 }
 0x8cc   : > { %v7535_v10 = vpop.eup %6094  ;;  %5488 = vmatprep.mubr.msk.f32.mxu0 %vm641_vm0, %v7533_v18  ;;  %v3438_v13 = vpop.xlane.xlu1 %3437 }
 0x8cd   : > { %v3435_v24 = vpop.xlane.xlu0 %3434  ;;  %v3450_v29 = vsub.f32 %v3418_v43, %v3438_v13  ;;  %5489 = vmatmul.mubr.msk.f32.gmra.mrb[42].mxu0 %vm641_vm0, %v7535_v10 }
 0x8ce   : > { %v3449_v26 = vsub.f32 %v3417_v44, %v3435_v24 }
 0x8cf   : > { %v3463_v15 = vmul.f32 1.442695, %v3450_v29 }
 0x8d0   : > { %v3461_v27 = vmul.f32 1.442695, %v3449_v26 }
 0x8d2   : > { %6096 = vpow2.f32 %v3461_v27 }
 0x8d3   : > { %6098 = vpow2.f32 %v3463_v15 }
 0x8d4   : > { %v3444_v28 = vpop.xlane.xlu1 %3443 }
 0x8d5   : > { %v3441_v32 = vpop.xlane.xlu0 %3440  ;;  %v3452_v33 = vsub.f32 %v3420_v60, %v3444_v28 }
 0x8d6   : > { %v3451_v35 = vsub.f32 %v3419_v16, %v3441_v32 }
 0x8d7   : > { %v3467_v39 = vmul.f32 1.442695, %v3452_v33 }
 0x8d8   : > { %v3465_v40 = vmul.f32 1.442695, %v3451_v35  ;;  %v2746_v47 = vpop.permute.xlu1 %2745 }
 0x8d9   : > { %v2744_v45 = vpop.permute.xlu0 %2743  ;;  %v2754_v43 = vmul.f32 %v2746_v47, %v7425_v31  ;;  %v2750_v44 = vmul.f32 %v2746_v47, %v7412_v23  ;;  %v2758_v50 = vmul.f32 %v2746_v47, %v7462_v57  ;;  %v2752_v60 = vmul.f32 %v2746_v47, %v7409_v36 }
 0x8da   : > { %v2753_v46 = vmul.f32 %v2744_v45, %v7425_v31  ;;  %v2749_v48 = vmul.f32 %v2744_v45, %v7412_v23  ;;  %6100 = vpow2.f32 %v3465_v40  ;;  %v2757_v42 = vmul.f32 %v2744_v45, %v7462_v57 }
 0x8db   : > { %6102 = vpow2.f32 %v3467_v39  ;;  %v2751_v58 = vmul.f32 %v2744_v45, %v7409_v36  ;;  %v2761_v31 = vmul.f32 %v2744_v45, %v7475_v25  ;;  %v2762_v57 = vmul.f32 %v2746_v47, %v7475_v25 }
 0x8dc   : > { %v6026_v49 = vpack.i.bf16 %v2754_v43, %v2753_v46  ;;  %v7547_v53 = vpop.eup %6096  ;;  %v6016_v56 = vpack.i.bf16 %v2750_v44, %v2749_v48  ;;  %v6036_v23 = vpack.i.bf16 %v2758_v50, %v2757_v42  ;;  %v2755_v36 = vmul.f32 %v2744_v45, %v7422_v30 }
 0x8dd   : > { %v7551_v16 = vpop.eup %6098  ;;  %5491 = vmatprep.mubr.msk.f32.mxu0 %vm641_vm0, %v7547_v53  ;;  %v6021_v61 = vpack.i.bf16 %v2752_v60, %v2751_v58  ;;  %v2756_v52 = vmul.f32 %v2746_v47, %v7422_v30  ;;  %v6046_v14 = vpack.i.bf16 %v2762_v57, %v2761_v31  ;;  %v2759_v0 = vmul.f32 %v2744_v45, %v7459_v41 }
 0x8de   : > { %6027 = vrot.lane.b32.xlu0 %v6026_v49, %s6539_s28  ;;  %5492 = vmatmul.mubr.msk.f32.gmra.mrb[44].mxu0 %vm641_vm0, %v7551_v16  ;;  %v2760_v1 = vmul.f32 %v2746_v47, %v7459_v41  ;;  %v2763_v25 = vmul.f32 %v2744_v45, %v7472_v51  ;;  %v2764_v41 = vmul.f32 %v2746_v47, %v7472_v51 }
 0x8df   : > { %6017 = vrot.lane.b32.xlu1 %v6016_v56, %s6539_s28  ;;  %v6031_v62 = vpack.i.bf16 %v2756_v52, %v2755_v36 }
 0x8e0   : > { %v6041_v30 = vpack.i.bf16 %v2760_v1, %v2759_v0  ;;  %v6051_v59 = vpack.i.bf16 %v2764_v41, %v2763_v25 }
 0x8e2   : > { %6037 = vrot.lane.b32.xlu0 %v6036_v23, %s6539_s28 }
 0x8e3   : > { %6022 = vrot.lane.b32.xlu1 %v6021_v61, %s6539_s28 }
 0x8e4   : > { %v7565_v63 = vpop.eup %6100 }
 0x8e5   : > { %v7569_v2 = vpop.eup %6102  ;;  %5494 = vmatprep.mubr.msk.f32.mxu0 %vm641_vm0, %v7565_v63 }
 0x8e6   : > { %6047 = vrot.lane.b32.xlu0 %v6046_v14, %s6539_s28  ;;  %5495 = vmatmul.mubr.msk.f32.gmra.mrb[46].mxu0 %vm641_vm0, %v7569_v2 }
 0x8e7   : > { %6032 = vrot.lane.b32.xlu1 %v6031_v62, %s6539_s28  ;;  %5522 = vmatprep.mubr.msk.f32.mxu0 %vm6536_vm1, %v6537_v12 }
 0x8eb   : > { %6042 = vrot.lane.b32.xlu1 %v6041_v30, %s6539_s28 }
 0x8ef   : > { %6052 = vrot.lane.b32.xlu1 %v6051_v59, %s6539_s28 }
 0x950   : > { %v6028_v27 = vpop.permute.xlu0 %6027 }
 0x951   : > { %v6018_v7 = vpop.permute.xlu1 %6017  ;;  %v6030_v40 = vunpack.i.h.bf16 %v6028_v27  ;;  %v6029_v47 = vunpack.i.l.bf16 %v6028_v27 }
 0x952   : > { %v6020_v3 = vunpack.i.h.bf16 %v6018_v7  ;;  %v6019_v6 = vunpack.i.l.bf16 %v6018_v7 }
 0x953   : > { %v5756_v48 = vpack.c.bf16 %v6030_v40, %v6029_v47  ;;  %v4306_v40 = vld [vmem:[#allocation14 + $0x10] sm:$0xff]  ;;  %v4307_v47 = vld [vmem:[#allocation14 + $0x18] sm:$0xff] }
 0x954   : > { %v5750_v8 = vpack.c.bf16 %v6020_v3, %v6019_v6  ;;  %v6038_v44 = vpop.permute.xlu0 %6037 }
 0x955   : > { %v6023_v9 = vpop.permute.xlu1 %6022  ;;  %v6040_v42 = vunpack.i.h.bf16 %v6038_v44  ;;  %v6039_v50 = vunpack.i.l.bf16 %v6038_v44 }
 0x956   : > { %5751 = vmatpush3.bf16.msra.mxu1 %v5750_v8  ;;  %v6025_v26 = vunpack.i.h.bf16 %v6023_v9  ;;  %v6024_v15 = vunpack.i.l.bf16 %v6023_v9 }
 0x957   : > { %5752 = vmatprep.subr.bf16.mxu1 %v6535_v11  ;;  %v5762_v31 = vpack.c.bf16 %v6040_v42, %v6039_v50 }
 0x958   : > { %v5753_v45 = vpack.c.bf16 %v6025_v26, %v6024_v15  ;;  %v6048_v61 = vpop.permute.xlu0 %6047 }
 0x959   : > { %v6033_v22 = vpop.permute.xlu1 %6032  ;;  %v6050_v0 = vunpack.i.h.bf16 %v6048_v61  ;;  %v6049_v1 = vunpack.i.l.bf16 %v6048_v61 }
 0x95a   : > { %v6035_v20 = vunpack.i.h.bf16 %v6033_v22  ;;  %v6034_v13 = vunpack.i.l.bf16 %v6033_v22 }
 0x95b   : > { %v5768_v3 = vpack.c.bf16 %v6050_v0, %v6049_v1 }
 0x95c   : > { %v5759_v24 = vpack.c.bf16 %v6035_v20, %v6034_v13 }
 0x95d   : > { %v6043_v46 = vpop.permute.xlu1 %6042 }
 0x95e   : > { %5760 = vmatpush3.bf16.msra.mxu0 %v5759_v24  ;;  %v6044_v49 = vunpack.i.l.bf16 %v6043_v46 }
 0x95f   : > { %5764 = vmatprep.subr.bf16.mxu0 %v6535_v11 }
 0x995   : > { %v5487_v51 = vpop.f32.mrb[40].mxu0 }
 0x996   : > { %v3561_v29 = vpop.f32.mrb[41].mxu0 }
 0x997   : > { %6104 = vrcp.f32 %v3561_v29 }
 0x998   : > { %6106 = vrcp.f32 %v5487_v51  ;;  %v4305_v51 = vld [vmem:[#allocation14 + $0x8] sm:$0xff] }
 0x9a0   : > { %v5490_v28 = vpop.f32.mrb[42].mxu0 }
 0x9a1   : > { %v6105_v32 = vpop.eup %6104  ;;  %6108 = vrcp.f32 %v5490_v28  ;;  %v3571_v33 = vpop.f32.mrb[43].mxu0 }
 0x9a2   : > { %v3608_v35 = vmul.f32 %v6105_v32, %v7525_v21  ;;  %6110 = vrcp.f32 %v3571_v33  ;;  %v6107_v39 = vpop.eup %6106  ;;  %v6045_v21 = vunpack.i.h.bf16 %v6043_v46 }
 0x9a3   : > { %v3609_v43 = vmul.f32 %v6107_v39, %v7527_v34 }
 0x9a4   : > { %5502 = vmatmul.mubr.msk.f32.vlgmr.msra.gmra.mrb[28].mxu1 %vm641_vm0, %v3608_v35  ;;  %v5765_v60 = vpack.c.bf16 %v6045_v21, %v6044_v49 }
 0x9a5   : > { %5754 = vmatpush3.bf16.msra.mxu1 %v5753_v45  ;;  %5508 = vmatprep.mubr.msk.f32.mxu1 %vm6536_vm1, %v6537_v12  ;;  %v5777_v45 = vpack.c.bf16 %v4307_v47, %v4306_v40 }
 0x9a6   : > { %5755 = vmatprep.subr.bf16.mxu1 %v6535_v11 }
 0x9a8   : > { %5509 = vmatmul.mubr.msk.f32.vlgmr.msra.gmra.mrb[30].mxu1 %vm641_vm0, %v3609_v43 }
 0x9a9   : > { %5757 = vmatpush3.bf16.msra.mxu1 %v5756_v48  ;;  %5515 = vmatprep.mubr.msk.f32.mxu1 %vm6536_vm1, %v6537_v12 }
 0x9aa   : > { %5761 = vmatprep.subr.bf16.mxu1 %v6535_v11 }
 0x9ab   : > { %v6109_v56 = vpop.eup %6108 }
 0x9ac   : > { %v6111_v58 = vpop.eup %6110  ;;  %v3611_v34 = vmul.f32 %v6109_v56, %v7535_v10 }
 0x9ad   : > { %v3610_v23 = vmul.f32 %v6111_v58, %v7533_v18  ;;  %v6053_v18 = vpop.permute.xlu1 %6052 }
 0x9ae   : > { %5523 = vmatmul.mubr.msk.f32.vlgmr.msra.gmra.mrb[48].mxu0 %vm641_vm0, %v3611_v34  ;;  %v6055_v52 = vunpack.i.h.bf16 %v6053_v18  ;;  %v6054_v14 = vunpack.i.l.bf16 %v6053_v18  ;;  %v4991_v18 = vld [vmem:[#allocation16] ss:$0 sm:$0xff] }
 0x9af   : > { %5766 = vmatpush3.bf16.msra.mxu0 %v5765_v60  ;;  %5516 = vmatmul.mubr.msk.f32.vlgmr.msra.gmra.mrb[32].mxu1 %vm641_vm0, %v3610_v23 }
 0x9b0   : > { %5763 = vmatpush3.bf16.msra.mxu1 %v5762_v31  ;;  %5536 = vmatprep.mubr.msk.f32.mxu0 %vm6536_vm1, %v6537_v12  ;;  %v5771_v59 = vpack.c.bf16 %v6055_v52, %v6054_v14 }
 0x9b1   : > { %v5493_v57 = vpop.f32.mrb[44].mxu0  ;;  %5770 = vmatprep.subr.bf16.mxu0 %v6535_v11  ;;  %5529 = vmatprep.mubr.msk.f32.mxu1 %vm6536_vm1, %v6537_v12 }
 0x9b2   : > { %6112 = vrcp.f32 %v5493_v57  ;;  %v3581_v10 = vpop.f32.mrb[45].mxu0  ;;  %5767 = vmatprep.subr.bf16.mxu1 %v6535_v11 }
 0x9b3   : > { %6114 = vrcp.f32 %v3581_v10 }
 0x9b9   : > { %v5496_v36 = vpop.f32.mrb[46].mxu0 }
 0x9ba   : > { %6116 = vrcp.f32 %v5496_v36  ;;  %v3591_v62 = vpop.f32.mrb[47].mxu0 }
 0x9bb   : > { %6118 = vrcp.f32 %v3591_v62 }
 0x9bc   : > { %v6113_v30 = vpop.eup %6112 }
 0x9bd   : > { %v6115_v25 = vpop.eup %6114  ;;  %v3613_v41 = vmul.f32 %v6113_v30, %v7551_v16 }
 0x9be   : > { %v3612_v7 = vmul.f32 %v6115_v25, %v7547_v53 }
 0x9bf   : > { %5537 = vmatmul.mubr.msk.f32.vlgmr.msra.gmra.mrb[50].mxu0 %vm641_vm0, %v3613_v41 }
 0x9c0   : > { %5772 = vmatpush3.bf16.msra.mxu0 %v5771_v59  ;;  %5530 = vmatmul.mubr.msk.f32.vlgmr.msra.gmra.mrb[34].mxu1 %vm641_vm0, %v3612_v7 }
 0x9c1   : > { %5769 = vmatpush3.bf16.msra.mxu1 %v5768_v3  ;;  %5550 = vmatprep.mubr.msk.f32.mxu0 %vm6536_vm1, %v6537_v12 }
 0x9c2   : > { %5543 = vmatprep.mubr.msk.f32.mxu1 %vm6536_vm1, %v6537_v12 }
 0x9c4   : > { %v6117_v11 = vpop.eup %6116 }
 0x9c5   : > { %v6119_v6 = vpop.eup %6118  ;;  %v3615_v16 = vmul.f32 %v6117_v11, %v7569_v2  ;;  %v4304_v2 = vld [vmem:[#allocation14] sm:$0xff] }
 0x9c6   : > { %v3614_v8 = vmul.f32 %v6119_v6, %v7565_v63  ;;  %v5773_v26 = vpack.c.bf16 %v4305_v51, %v4304_v2 }
 0x9c7   : > { %5551 = vmatmul.mubr.msk.f32.vlgmr.msra.gmra.mrb[52].mxu0 %vm641_vm0, %v3615_v16 }
 0x9c8   : > { %5544 = vmatmul.mubr.msk.f32.vlgmr.msra.gmra.mrb[36].mxu1 %vm641_vm0, %v3614_v8  ;;  %5774 = vmatprep.subr.bf16.mxu1 %v5773_v26 }
 0x9c9   : > { %5776 = vmatpush3.bf16.msra.mxu1 %v5773_v26 }
 0x9ca   : > { %5778 = vmatprep.subr.bf16.mxu1 %v5777_v45 }
 0x9cd   : > { %5780 = vmatpush3.bf16.msra.mxu1 %v5777_v45 }
 0xa77   : > { %v3693_v53 = vpop.f32.mrb[28].mxu1 }
 0xa78   : > { %4272 = vrot.lane.b32.xlu0 %v3693_v53, %s6540_s27  ;;  %v5503_v9 = vpop.f32.mrb[29].mxu1 }
 0xa7b   : > { %v3774_v22 = vpop.f32.mrb[30].mxu1 }
 0xa7c   : > { %4274 = vrot.lane.b32.xlu1 %v3774_v22, %s6540_s27  ;;  %v5510_v20 = vpop.f32.mrb[31].mxu1 }
 0xa81   : > { %v3936_v13 = vpop.f32.mrb[48].mxu0 }
 0xa82   : > { %v5524_v12 = vpop.f32.mrb[49].mxu0  ;;  %4278 = vrot.lane.b32.xlu1 %v3936_v13, %s6540_s27  ;;  %v3855_v24 = vpop.f32.mrb[32].mxu1 }
 0xa83   : > { %4276 = vrot.lane.b32.xlu0 %v3855_v24, %s6540_s27  ;;  %v5517_v63 = vpop.f32.mrb[33].mxu1 }
 0xa92   : > { %v4098_v29 = vpop.f32.mrb[50].mxu0 }
 0xa93   : > { %v5538_v15 = vpop.f32.mrb[51].mxu0  ;;  %4282 = vrot.lane.b32.xlu1 %v4098_v29, %s6540_s27  ;;  %v4017_v27 = vpop.f32.mrb[34].mxu1 }
 0xa94   : > { %4280 = vrot.lane.b32.xlu0 %v4017_v27, %s6540_s27  ;;  %v5531_v28 = vpop.f32.mrb[35].mxu1 }
 0xa9a   : > { %v4260_v32 = vpop.f32.mrb[52].mxu0 }
 0xa9b   : > { %v5552_v33 = vpop.f32.mrb[53].mxu0  ;;  %4286 = vrot.lane.b32.xlu1 %v4260_v32, %s6540_s27  ;;  %v4179_v35 = vpop.f32.mrb[36].mxu1 }
 0xa9c   : > { %4284 = vrot.lane.b32.xlu0 %v4179_v35, %s6540_s27  ;;  %v5545_v39 = vpop.f32.mrb[37].mxu1 }
 0xaea   : > { %v4273_v46 = vpop.permute.xlu0 %4272 }
 0xaeb   : > { %v7626_v43 = vadd.f32 %v4273_v46, %v7041_v19 }
 0xaed   : > { %4323 = vrot.lane.b32.xlu0 %v7626_v43, %s6540_s27 }
 0xaee   : > { %v4275_v48 = vpop.permute.xlu1 %4274 }
 0xaef   : > { %v7631_v44 = vadd.f32 %v4275_v48, %v7038_v17 }
 0xaf1   : > { %4325 = vrot.lane.b32.xlu1 %v7631_v44, %s6540_s27 }
 0xaf4   : > { %v4279_v21 = vpop.permute.xlu1 %4278 }
 0xaf5   : > { %v7636_v49 = vadd.f32 %v4279_v21, %v7082_v37  ;;  %v4277_v42 = vpop.permute.xlu0 %4276 }
 0xaf6   : > { %v7639_v50 = vadd.f32 %v4277_v42, %v7085_v38 }
 0xaf7   : > { %4329 = vrot.lane.b32.xlu1 %v7636_v49, %s6540_s27 }
 0xaf8   : > { %4327 = vrot.lane.b32.xlu0 %v7639_v50, %s6540_s27 }
 0xb05   : > { %v4283_v19 = vpop.permute.xlu1 %4282 }
 0xb06   : > { %v7646_v17 = vadd.f32 %v4283_v19, %v7126_v54  ;;  %v4281_v56 = vpop.permute.xlu0 %4280 }
 0xb07   : > { %v7649_v58 = vadd.f32 %v4281_v56, %v7129_v55 }
 0xb08   : > { %4333 = vrot.lane.b32.xlu1 %v7646_v17, %s6540_s27 }
 0xb09   : > { %4331 = vrot.lane.b32.xlu0 %v7649_v58, %s6540_s27 }
 0xb0d   : > { %v4287_v37 = vpop.permute.xlu1 %4286 }
 0xb0e   : > { %v7656_v38 = vadd.f32 %v4287_v37, %v7168_v4  ;;  %v4285_v34 = vpop.permute.xlu0 %4284 }
 0xb0f   : > { %v7659_v60 = vadd.f32 %v4285_v34, %v7171_v5 }
 0xb10   : > { %4337 = vrot.lane.b32.xlu1 %v7656_v38, %s6540_s27 }
 0xb11   : > { %4335 = vrot.lane.b32.xlu0 %v7659_v60, %s6540_s27 }
 0xb5f   : > { %v4324_v54 = vpop.permute.xlu0 %4323 }
 0xb60   : > { %5561 = vmatprep.mubr.msk.f32.mxu1 %vm856_vm2, %v4324_v54 }
 0xb63   : > { %v4326_v55 = vpop.permute.xlu1 %4325 }
 0xb64   : > { %5562 = vmatmul.mubr.msk.f32.vlgmr.msra.gmra.mrb[38].mxu1 %vm856_vm2, %v4326_v55 }
 0xb69   : > { %v4330_v31 = vpop.permute.xlu1 %4329 }
 0xb6a   : > { %v4328_v23 = vpop.permute.xlu0 %4327 }
 0xb6b   : > { %5564 = vmatprep.mubr.msk.f32.mxu1 %vm856_vm2, %v4328_v23 }
 0xb6c   : > { %5565 = vmatmul.mubr.msk.f32.gmra.mrb[40].mxu1 %vm856_vm2, %v4330_v31 }
 0xb7a   : > { %v4334_v5 = vpop.permute.xlu1 %4333 }
 0xb7b   : > { %v4332_v4 = vpop.permute.xlu0 %4331 }
 0xb7c   : > { %5567 = vmatprep.mubr.msk.f32.mxu1 %vm856_vm2, %v4332_v4 }
 0xb7d   : > { %5568 = vmatmul.mubr.msk.f32.gmra.mrb[42].mxu1 %vm856_vm2, %v4334_v5 }
 0xb82   : > { %v4338_v10 = vpop.permute.xlu1 %4337 }
 0xb83   : > { %v4336_v57 = vpop.permute.xlu0 %4335 }
 0xb84   : > { %5570 = vmatprep.mubr.msk.f32.mxu1 %vm856_vm2, %v4336_v57 }
 0xb85   : > { %5571 = vmatmul.mubr.msk.f32.gmra.mrb[44].mxu1 %vm856_vm2, %v4338_v10 }
 0xc37   : > { %v5563_v61 = vpop.f32.mrb[38].mxu1 }
 0xc38   : > { %v4427_v36 = vadd.f32 %v5563_v61, %v4991_v18  ;;  %v4421_v52 = vpop.f32.mrb[39].mxu1 }
 0xc39   : > { %v4422_v14 = vadd.f32 %v4991_v18, %v4421_v52 }
 0xc3a   : > { %v4461_v62 = vmax.f32 %v4427_v36, 0.0 }
 0xc3b   : > { %v4460_v0 = vmax.f32 %v4422_v14, 0.0 }
 0xc3c   : > { %4478 = vrot.lane.b32.xlu1 %v4461_v62, %s6540_s27 }
 0xc3d   : > { %4476 = vrot.lane.b32.xlu0 %v4460_v0, %s6540_s27 }
 0xc3f   : > { %v5566_v1 = vpop.f32.mrb[40].mxu1 }
 0xc40   : > { %v4437_v30 = vadd.f32 %v5566_v1, %v4991_v18  ;;  %v4431_v25 = vpop.f32.mrb[41].mxu1 }
 0xc41   : > { %v4432_v41 = vadd.f32 %v4991_v18, %v4431_v25 }
 0xc42   : > { %v4463_v59 = vmax.f32 %v4437_v30, 0.0 }
 0xc43   : > { %v4462_v7 = vmax.f32 %v4432_v41, 0.0 }
 0xc44   : > { %4482 = vrot.lane.b32.xlu1 %v4463_v59, %s6540_s27 }
 0xc45   : > { %4480 = vrot.lane.b32.xlu0 %v4462_v7, %s6540_s27 }
 0xc50   : > { %v5569_v3 = vpop.f32.mrb[42].mxu1 }
 0xc51   : > { %v4447_v11 = vadd.f32 %v5569_v3, %v4991_v18  ;;  %v4441_v6 = vpop.f32.mrb[43].mxu1 }
 0xc52   : > { %v4442_v16 = vadd.f32 %v4991_v18, %v4441_v6 }
 0xc53   : > { %v4465_v8 = vmax.f32 %v4447_v11, 0.0 }
 0xc54   : > { %v4464_v53 = vmax.f32 %v4442_v16, 0.0 }
 0xc55   : > { %4486 = vrot.lane.b32.xlu1 %v4465_v8, %s6540_s27 }
 0xc56   : > { %4484 = vrot.lane.b32.xlu0 %v4464_v53, %s6540_s27 }
 0xc58   : > { %v5572_v9 = vpop.f32.mrb[44].mxu1 }
 0xc59   : > { %v4457_v22 = vadd.f32 %v5572_v9, %v4991_v18  ;;  %v4451_v20 = vpop.f32.mrb[45].mxu1 }
 0xc5a   : > { %v4452_v13 = vadd.f32 %v4991_v18, %v4451_v20 }
 0xc5b   : > { %v4467_v12 = vmax.f32 %v4457_v22, 0.0 }
 0xc5c   : > { %v4466_v24 = vmax.f32 %v4452_v13, 0.0 }
 0xc5d   : > { %4490 = vrot.lane.b32.xlu1 %v4467_v12, %s6540_s27 }
 0xc5e   : > { %4488 = vrot.lane.b32.xlu0 %v4466_v24, %s6540_s27 }
 0xcae   : > { %v4479_v63 = vpop.permute.xlu1 %4478 }
 0xcaf   : > { %v4477_v2 = vpop.permute.xlu0 %4476  ;;  %v4501_v29 = vadd.f32 %v4479_v63, %v7631_v44 }
 0xcb0   : > { %v4500_v51 = vadd.f32 %v4477_v2, %v7626_v43 }
 0xcb1   : > { %v4624_v15 = vrot.slane %v4501_v29, 5  ;;  %v4558_v28 = vrot.slane %v4501_v29, 1  ;;  %v4516_v42 = vrot.slane %v4501_v29, 7  ;;  %v4607_v19 = vrot.slane %v4501_v29, 4 }
 0xcb2   : > { %v4623_v26 = vrot.slane %v4500_v51, 6  ;;  %v4557_v27 = vrot.slane %v4500_v51, 2  ;;  %v4606_v56 = vrot.slane %v4500_v51, 5  ;;  %v4590_v37 = vrot.slane %v4501_v29, 3 }
 0xcb3   : > { %v4639_v34 = vrot.slane %v4501_v29, 6  ;;  %v4589_v54 = vrot.slane %v4500_v51, 4  ;;  %v4638_v55 = vrot.slane %v4500_v51, 7  ;;  %v4572_v23 = vrot.slane %v4500_v51, 3 }
 0xcb4   : > { %v4625_v35 = vsel %vm4517_vm6, %v4624_v15, %v4623_v26  ;;  %v4559_v39 = vsel %vm4517_vm6, %v4558_v28, %v4557_v27  ;;  %v4573_v31 = vrot.slane %v4501_v29, 2  ;;  %v4518_v5 = vsel %vm4517_vm6, %v4516_v42, %v4500_v51 }
 0xcb5   : > { %v4608_v61 = vsel %vm4517_vm6, %v4607_v19, %v4606_v56  ;;  %v4591_v62 = vsel %vm4517_vm6, %v4590_v37, %v4589_v54  ;;  %v4640_v0 = vsel %vm4517_vm6, %v4639_v34, %v4638_v55 }
 0xcb6   : > { %v4483_v32 = vpop.permute.xlu1 %4482  ;;  %v4574_v1 = vsel %vm4517_vm6, %v4573_v31, %v4572_v23 }
 0xcb7   : > { %v4481_v33 = vpop.permute.xlu0 %4480  ;;  %v7687_v47 = vadd.f32 %v4483_v32, %v7636_v49  ;;  %v4540_v49 = vrot.slane %v4500_v51, 1 }
 0xcb8   : > { %v4502_v40 = vadd.f32 %v4481_v33, %v7639_v50 }
 0xcb9   : > { %v4628_v43 = vrot.slane %v7687_v47, 3  ;;  %v4561_v44 = vrot.slane %v7687_v47, 7  ;;  %v4541_v18 = vsel %vm4517_vm6, %v4501_v29, %v4540_v49  ;;  %v4544_v59 = vrot.slane %v7687_v47, 6 }
 0xcba   : > { %v4626_v45 = vrot.slane %v4502_v40, 4  ;;  %v4560_v48 = vsel %vm4520_vm7, %v4502_v40, %v4559_v39  ;;  %v4542_v4 = vrot.slane %v4502_v40, 7  ;;  %v4519_v57 = vrot.slane %v4502_v40, 6 }
 0xcbb   : > { %v7695_v50 = vsel %vm4523_vm8, %v4561_v44, %v4560_v48  ;;  %v4592_v10 = vrot.slane %v4502_v40, 2  ;;  %v4609_v36 = vrot.slane %v4502_v40, 3  ;;  %v4641_v52 = vrot.slane %v4502_v40, 5 }
 0xcbc   : > { %v4627_v46 = vsel %vm4520_vm7, %v4626_v45, %v4625_v35  ;;  %v4575_v30 = vrot.slane %v4502_v40, 1  ;;  %v4522_v7 = vrot.slane %v7687_v47, 5  ;;  %v4611_v3 = vrot.slane %v7687_v47, 2 }
 0xcbd   : > { %v4629_v21 = vsel %vm4523_vm8, %v4628_v43, %v4627_v46  ;;  %v4543_v6 = vsel %vm4520_vm7, %v4542_v4, %v4541_v18  ;;  %v4521_v16 = vsel %vm4520_vm7, %v4519_v57, %v4518_v5  ;;  %v4593_v8 = vsel %vm4520_vm7, %v4592_v10, %v4591_v62 }
 0xcbe   : > { %v4594_v53 = vrot.slane %v7687_v47, 1  ;;  %v4642_v9 = vsel %vm4520_vm7, %v4641_v52, %v4640_v0  ;;  %v4643_v22 = vrot.slane %v7687_v47, 4  ;;  %v4576_v12 = vsel %vm4520_vm7, %v4575_v30, %v4574_v1 }
 0xcbf   : > { %v4545_v24 = vsel %vm4523_vm8, %v4544_v59, %v4543_v6  ;;  %v4524_v63 = vsel %vm4523_vm8, %v4522_v7, %v4521_v16  ;;  %v4577_v35 = vsel %vm4523_vm8, %v7687_v47, %v4576_v12 }
 0xcc0   : > { %v4595_v2 = vsel %vm4523_vm8, %v4594_v53, %v4593_v8  ;;  %v4644_v15 = vsel %vm4523_vm8, %v4643_v22, %v4642_v9 }
 0xcc7   : > { %v4487_v14 = vpop.permute.xlu1 %4486 }
 0xcc8   : > { %v7704_v25 = vadd.f32 %v4487_v14, %v7646_v17  ;;  %v4485_v41 = vpop.permute.xlu0 %4484  ;;  %v4610_v17 = vsel %vm4520_vm7, %v4609_v36, %v4608_v61 }
 0xcc9   : > { %v7710_v11 = vadd.f32 %v4485_v41, %v7649_v58  ;;  %v4612_v29 = vsel %vm4523_vm8, %v4611_v3, %v4610_v17 }
 0xcca   : > { %v4597_v51 = vrot.slane %v7704_v25, 7  ;;  %v4548_v32 = vrot.slane %v7704_v25, 4  ;;  %v4528_v33 = vrot.slane %v7704_v25, 3  ;;  %v4632_v43 = vrot.slane %v7704_v25, 1 }
 0xccb   : > { %v4546_v20 = vrot.slane %v7710_v11, 5  ;;  %v4525_v58 = vrot.slane %v7710_v11, 4  ;;  %v4613_v13 = vrot.slane %v7710_v11, 1  ;;  %v4596_v26 = vsel %vm4526_vm9, %v7710_v11, %v4595_v2 }
 0xccc   : > { %v4630_v27 = vrot.slane %v7710_v11, 2  ;;  %v4598_v42 = vsel %vm4529_vm10, %v4597_v51, %v4596_v26  ;;  %v4645_v19 = vrot.slane %v7710_v11, 3  ;;  %v4647_v49 = vrot.slane %v7704_v25, 2 }
 0xccd   : > { %v4547_v28 = vsel %vm4526_vm9, %v4546_v20, %v4545_v24  ;;  %v4527_v40 = vsel %vm4526_vm9, %v4525_v58, %v4524_v63  ;;  %v4614_v45 = vsel %vm4526_vm9, %v4613_v13, %v4612_v29  ;;  %v4578_v56 = vrot.slane %v7710_v11, 7 }
 0xcce   : > { %v4631_v46 = vsel %vm4526_vm9, %v4630_v27, %v4629_v21  ;;  %v4580_v37 = vrot.slane %v7704_v25, 6  ;;  %v4549_v21 = vsel %vm4529_vm10, %v4548_v32, %v4547_v28  ;;  %v4530_v54 = vsel %vm4529_vm10, %v4528_v33, %v4527_v40 }
 0xccf   : > { %v4491_v39 = vpop.permute.xlu1 %4490  ;;  %v4633_v34 = vsel %vm4529_vm10, %v4632_v43, %v4631_v46  ;;  %v4563_v55 = vrot.slane %v7710_v11, 6  ;;  %v4646_v10 = vsel %vm4526_vm9, %v4645_v19, %v4644_v15  ;;  %v4579_v52 = vsel %vm4526_vm9, %v4578_v56, %v4577_v35 }
 0xcd0   : > { %v4507_v48 = vadd.f32 %v4491_v39, %v7656_v38  ;;  %v4489_v44 = vpop.permute.xlu0 %4488  ;;  %v4615_v38 = vsel %vm4529_vm10, %v7704_v25, %v4614_v45  ;;  %v4565_v14 = vrot.slane %v7704_v25, 5  ;;  %v4648_v8 = vsel %vm4529_vm10, %v4647_v49, %v4646_v10 }
 0xcd1   : > { %v4506_v47 = vadd.f32 %v4489_v44, %v7659_v60  ;;  %v4564_v3 = vsel %vm4526_vm9, %v4563_v55, %v7695_v50  ;;  %v4581_v20 = vsel %vm4529_vm10, %v4580_v37, %v4579_v52 }
 0xcd2   : > { %v4552_v60 = vrot.slane %v4507_v48, 2  ;;  %v4534_v57 = vrot.slane %v4507_v48, 1  ;;  %v4635_v7 = vrot.slane %v4507_v48, 7  ;;  %v4618_v11 = vrot.slane %v4507_v48, 6 }
 0xcd3   : > { %v4550_v23 = vrot.slane %v4506_v47, 3  ;;  %v4531_v31 = vrot.slane %v4506_v47, 2  ;;  %v4616_v4 = vrot.slane %v4506_v47, 7  ;;  %v4599_v5 = vrot.slane %v4506_v47, 6 }
 0xcd4   : > { %v4634_v18 = vsel %vm4532_vm11, %v4506_v47, %v4633_v34  ;;  %v4649_v1 = vrot.slane %v4506_v47, 1  ;;  %v4582_v30 = vrot.slane %v4506_v47, 5  ;;  %v4601_v25 = vrot.slane %v4507_v48, 5 }
 0xcd5   : > { %v4551_v61 = vsel %vm4532_vm11, %v4550_v23, %v4549_v21  ;;  %v4533_v36 = vsel %vm4532_vm11, %v4531_v31, %v4530_v54  ;;  %v4617_v41 = vsel %vm4532_vm11, %v4616_v4, %v4615_v38  ;;  %v4600_v59 = vsel %vm4532_vm11, %v4599_v5, %v4598_v42 }
 0xcd6   : > { %v4553_v62 = vsel %vm4535_vm12, %v4552_v60, %v4551_v61  ;;  %v4536_v0 = vsel %vm4535_vm12, %v4534_v57, %v4533_v36  ;;  %v4566_v6 = vsel %vm4529_vm10, %v4565_v14, %v4564_v3  ;;  %v4567_v16 = vrot.slane %v4506_v47, 4 }
 0xcd7   : > { %4554 = vrot.lane.b32.xlu1 %v4553_v62, %s6539_s28  ;;  %4537 = vrot.lane.b32.xlu0 %v4536_v0, %s6540_s27  ;;  %v4636_v17 = vsel %vm4535_vm12, %v4635_v7, %v4634_v18  ;;  %v4569_v53 = vrot.slane %v4507_v48, 3  ;;  %v4619_v9 = vsel %vm4535_vm12, %v4618_v11, %v4617_v41  ;;  %v4602_v22 = vsel %vm4535_vm12, %v4601_v25, %v4600_v59 }
 0xcd8   : > { %v4568_v58 = vsel %vm4532_vm11, %v4567_v16, %v4566_v6  ;;  %v4650_v50 = vsel %vm4532_vm11, %v4649_v1, %v4648_v8  ;;  %v4583_v13 = vsel %vm4532_vm11, %v4582_v30, %v4581_v20  ;;  %v4584_v24 = vrot.slane %v4507_v48, 4 }
 0xcd9   : > { %v4570_v12 = vsel %vm4535_vm12, %v4569_v53, %v4568_v58  ;;  %v4651_v63 = vsel %vm4535_vm12, %v4507_v48, %v4650_v50 }
 0xcda   : > { %v4585_v2 = vsel %vm4535_vm12, %v4584_v24, %v4583_v13 }
 0xcdb   : > { %4620 = vrot.lane.b32.xlu1 %v4619_v9, %s6539_s28  ;;  %4603 = vrot.lane.b32.xlu0 %v4602_v22, %s6540_s27  ;;  %s4680_s28 = sshll.u32 %s622_s26, 4  ;;  %s5006_s27 = sshll.u32 %s6638_s19, 8  ;;  %s7793_s28 = int_to_ptr.vmem [resolvable:$true] %s4680_s28 }
 0xcdc   : > { %s7791_s20 = scalar_lea.hbm %s7901_s23, %s5006_s27  ;;  %s4666_s19 = scalar_lea.sflag [#allocation4], %s6971_s18 }
 0xcdd   : > { %s6430_s22 = scalar_lea.vmem %s7793_s28, 256  ;;  %s6436_s27 = scalar_lea.vmem %s6435_s0, 512 }
 0xcde   : > { %p6431_p2 = scmp.ne.s32.totalorder %s7793_s28, %s6430_s22  ;;  %p6437_p4 = scmp.lt.s32.totalorder %s7793_s28, %s6435_s0 }
 0xcdf   : > { %4652 = vrot.lane.b32.xlu1 %v4651_v63, %s6538_s24  ;;  %4586 = vrot.lane.b32.xlu0 %v4585_v2, %s6538_s24  ;;  %p6438_p10 = scmp.lt.s32.totalorder %s6436_s27, %s6430_s22 }
 0xce0   : > { %p6432_p3 = pnand %p6431_p2, %p7902_p8 }
 0xce1   : > { %p6439_p11 = por %p6438_p10, %p6437_p4 }
 0xce2   : > { %p6433_p5 = pneg %p6432_p3 }
 0xce4   : > { %p6440_p7 = pnand %p6439_p11, %p6433_p5 }
 0xd49   : > { %v4555_v51 = vpop.permute.xlu1 %4554  ;;  %v4538_v29 = vpop.permute.xlu0 %4537 }
 0xd4a   : > { %v4655_v27 = vsel %vm856_vm2, %v4538_v29, %v4555_v51 }
 0xd4b   : > { %v4657_v35 = vsel %vm4656_vm13, %v4655_v27, %v4570_v12 }
 0xd4d   : > { %v4621_v26 = vpop.permute.xlu1 %4620  ;;  %v4604_v15 = vpop.permute.xlu0 %4603 }
 0xd4e   : > { %v4660_v28 = vsel %vm856_vm2, %v4604_v15, %v4621_v26 }
 0xd4f   : > { %v4661_v33 = vsel %vm4656_vm13, %v4660_v28, %v4636_v17 }
 0xd51   : > { %v4653_v32 = vpop.permute.xlu1 %4652  ;;  %v4587_v39 = vpop.permute.xlu0 %4586 }
 0xd52   : > { %v4662_v40 = vsel %vm4658_vm14, %v4661_v33, %v4653_v32  ;;  %v4659_v45 = vsel %vm4658_vm14, %v4657_v35, %v4587_v39 }
 0xd53   : > { %4664 = vst [vmem:[%s622_s26 + $0x8] sm:$0xff] %v4662_v40  ;;  %4663 = vst [vmem:[%s622_s26] sm:$0xff] %v4659_v45 }
 0xd54   : > { %6443 = shalt.err (!%p6440_p7)
}
 0xd55   : > { %s6444_s18 = scalar_lea.hbm %s7791_s20, 256  ;;  %s6448_s3 = scalar_lea.hbm %s7901_s23, 512 }
 0xd56   : > { %p6445_p9 = scmp.ne.s32.totalorder %s7791_s20, %s6444_s18  ;;  %p6449_p1 = scmp.lt.u32.totalorder %s7791_s20, %s7901_s23 }
 0xd57   : > { %p6450_p13 = scmp.lt.u32.totalorder %s6448_s3, %s6444_s18  ;;  %p6452_p2 = scmp.lt.u32.totalorder %s6444_s18, %s7791_s20 }
 0xd58   : > { %p6446_p12 = pnand %p6445_p9, %p7902_p8 }
 0xd59   : > { %p6451_p0 = por %p6450_p13, %p6449_p1 }
 0xd5a   : > { %p6447_p6 = pneg %p6446_p12 }
 0xd5b   : > { %p6453_p3 = por %p6452_p2, %p6451_p0 }
 0xd5d   : > { %p6454_p5 = pnand %p6453_p3, %p6447_p6 }
 0xd5f   : > { %6457 = shalt.err (!%p6454_p5)
}
 0xd60   : > { %5823 = dma.vmem_to_hbm [thread:$0]  (%p7902_p8), %s7793_s28, 256, %s7791_s20, %s4666_s19  }
 0xd61 PF: > { %s4692_s22 = sand.u32 1, %s6508_s29   ;;  %p7903_p4 = scmp.ne.s32.totalorder %s7877_s1, 0 }
 0xd62   : > { %p7904_p10 = scmp.ge.s32.totalorder %s6520_s16, 2  ;;  %s4693_s27 = scalar_lea.sflag [#allocation4], %s4692_s22 }
 0xd64   : > { %p5861_p11 = pnand %p7904_p10, %p7903_p4 }
 0xd66   : > { %6503 = dma.done.wait (!%p5861_p11), %s4693_s27, 256  }
 0xd67   : > { %6505 = vsyncadd (!%p5861_p11), %s4693_s27, 4294967040  ;;  %p32_p7 = scmp.ge.s32.totalorder %s6883_s21, 4   ;;  %s7905_s29 = smov %s6512_s30 }
 0xd68   : > { %s7906_s30 = smov %s6516_s15  ;;  %s7907_s15 = smov %s6894_s14 }
 0xd69   : > { %s7908_s16 = smov %s6883_s21  ;;  %34 = sbr.rel (!%p32_p7) target bundleno = 18 (0x12), region = 162 }
 0xd70   :  { %4698 = vsyncpa [#allocation3], 1 }
 0xd71   :  { %4700 = vsyncpa [#allocation3 + $0x1], 1 }
 0xd72   :  { %4701 = vsyncpa [#allocation6], 1 }
 0xd73   :  { %4703 = vsyncpa [#allocation6 + $0x1], 1 }
 0xd74   :  { %4704 = vsyncpa [#allocation9], 1 }
 0xd75   :  { %4705 = vsyncpa [#allocation12], 1 }
 0xd76   :  { %4706 = vsyncpa [#allocation15], 1 }
 0xd77   :  { %4707 = vsyncpa [#allocation18], 1 }
 0xd78   :  { %4708 = vsyncpa [#allocation4], 1 }
 0xd79   :  { %4710 = vsyncpa [#allocation4 + $0x1], 1 }

</bundles_post_ra>
